<compile_context>
chip_gen: v7x
topology: tpu7x:2x2x1
jax: 0.10.0
libtpu: 0.0.40
codegen_flags: <defaults>
</compile_context>

<pallas_src>
import functools

import jax
import jax.numpy as jnp
from jax.experimental import pallas as pl
from jax.experimental.pallas import tpu as pltpu


# ----------------------------------------------------------------------------
# Hardware / feature probes (all host-side, all with safe fallbacks).
# ----------------------------------------------------------------------------
def _vmem_capacity_bytes():
    try:
        return int(pltpu.get_tpu_info().vmem_capacity_bytes)
    except Exception:
        return 64 << 20          # conservative (v7x-sized) fallback


def _tensorcores_per_chip():
    # Split the batch tile only where a second TensorCore can take it (v7x);
    # on single-TC v5e/v6e the grid is a serial loop and splitting just adds
    # per-step overhead.  TODO(synk): also detect megacore v4/v5p parts.
    try:
        kind = jax.devices()[0].device_kind.lower()
    except Exception:
        return 1
    return 2 if ("v7" in kind or "tpu7" in kind) else 1


def _probe_copy_kernel(x_ref, o_ref):
    o_ref[...] = x_ref[...]


@functools.lru_cache(maxsize=None)
def _single_buffered_weights_supported():
    """True iff this jax/Mosaic accepts pipeline_mode=pl.Buffered(1) on an
    input BlockSpec (single-buffered constant blocks).  Runs a tiny probe
    kernel, so it must be called OUTSIDE jit; any failure -> default
    double-buffering (always safe)."""
    try:
        spec = pl.BlockSpec((8, 128), lambda i: (0, 0),
                            pipeline_mode=pl.Buffered(1))
        fn = pl.pallas_call(
            _probe_copy_kernel,
            out_shape=jax.ShapeDtypeStruct((8, 128), jnp.float32),
            grid=(1,),
            in_specs=[spec],
            out_specs=pl.BlockSpec((8, 128), lambda i: (0, 0)),
        )
        jax.block_until_ready(fn(jnp.zeros((8, 128), jnp.float32)))
        return True
    except Exception:
        return False


# ----------------------------------------------------------------------------
# Kernel
# ----------------------------------------------------------------------------
def _lstm_kernel(x_ref,       # (TT*TB, D)    bf16  time-major rows of this block
                 wih0_ref,    # (D,  4*Hp)    bf16
                 whh0_ref,    # (Hp, 4*Hp)    bf16
                 b0_ref,      # (1,  4*Hp)    f32   (b_ih0 + b_hh0)
                 wih1_ref,    # (Hp, 4*Hp)    bf16
                 whh1_ref,    # (Hp, 4*Hp)    bf16
                 b1_ref,      # (1,  4*Hp)    f32
                 wlin_ref,    # (Hp, O)       bf16
                 blin_ref,    # (1, O)        f32
                 out_ref,     # (TB, O)       f32
                 xp_ref,      # (TT*TB, 4*Hp) f32 scratch (staged x-projection)
                 h0, c0, h1, c1):            # (TB, Hp) f32 scratch, persist over t
    t = pl.program_id(1)                     # time-block index (inner, sequential)
    TB, Hp = h0.shape
    TT = x_ref.shape[0] // TB

    @pl.when(t == 0)
    def _init():
        h0[...] = jnp.zeros_like(h0)
        c0[...] = jnp.zeros_like(c0)
        h1[...] = jnp.zeros_like(h1)
        c1[...] = jnp.zeros_like(c1)

    # Layer-0 input projection for the whole time block in ONE MXU dot
    # (M = TT*TB rows), bias added once; staged through VMEM scratch so the
    # unrolled loop below reads one (TB, 4*Hp) slab per step (bounds the live
    # range instead of pinning TT slabs in vregs).
    xp_ref[...] = (jnp.dot(x_ref[...], wih0_ref[...],
                           preferred_element_type=jnp.float32) + b0_ref[...])

    # Hoisted bias broadcast (JAX does not CSE broadcast_in_dim inside loops).
    b1b = jnp.broadcast_to(b1_ref[...], (TB, 4 * Hp))

    def gates_to_hc(gates, c):
        # PyTorch gate order [i, f, g, o]; all slices are 128-lane aligned.
        i = jax.nn.sigmoid(gates[:, 0 * Hp:1 * Hp])
        f = jax.nn.sigmoid(gates[:, 1 * Hp:2 * Hp])
        g = jnp.tanh(gates[:, 2 * Hp:3 * Hp])
        o = jax.nn.sigmoid(gates[:, 3 * Hp:4 * Hp])
        c_new = f * c + i * g
        h_new = o * jnp.tanh(c_new)
        return h_new, c_new

    h0v, c0v = h0[...], c0[...]
    h1v, c1v = h1[...], c1[...]

    # Fully-unrolled recurrence over the TT timesteps of this block (static
    # indices give the LLO scheduler full visibility).
    for tt in range(TT):
        # Layer-1's W_hh1 term depends only on h1(t-1): issue it before the
        # serial layer-0 dot so the two MXU pushes can overlap.
        g1_hh = jnp.dot(h1v.astype(jnp.bfloat16), whh1_ref[...],
                        preferred_element_type=jnp.float32)
        g0 = xp_ref[tt * TB:(tt + 1) * TB, :] + jnp.dot(
            h0v.astype(jnp.bfloat16), whh0_ref[...],
            preferred_element_type=jnp.float32)
        h0v, c0v = gates_to_hc(g0, c0v)
        g1 = g1_hh + b1b + jnp.dot(h0v.astype(jnp.bfloat16), wih1_ref[...],
                                   preferred_element_type=jnp.float32)
        h1v, c1v = gates_to_hc(g1, c1v)
        # TODO(synk): h/c operands are re-quantized to bf16 each step for the
        # MXU; validated at these tolerances, revisit for very long sequences.

    h0[...], c0[...] = h0v, c0v
    h1[...], c1[...] = h1v, c1v

    # Fused head on the last timestep of the sequence.  The out block stays
    # resident across the (constant-index) time axis and is written once here.
    @pl.when(t == pl.num_programs(1) - 1)
    def _final():
        out_ref[...] = (jnp.dot(h1v.astype(jnp.bfloat16), wlin_ref[...],
                                preferred_element_type=jnp.float32)
                        + blin_ref[...])


# ----------------------------------------------------------------------------
# Wrapper
# ----------------------------------------------------------------------------
def _pick_time_tile(T, TB, time_block):
    """Largest divisor of T <= time_block whose (TT*TB) row block is 16-row
    aligned (bf16 sublane packing); falls back to the whole sequence, which is
    always layout-legal (block rows == full dim)."""
    for tt in range(min(time_block, T), 0, -1):
        if T % tt == 0 and (tt * TB) % 16 == 0:
            return tt
    return T


def simple_lstm_pallas(x, kernel_params, *, time_block=8,
                       single_buffer_weights=False):
    """x: (B, T, D) float32 (batch_first, like PyTorch).  Returns (B, O) f32."""
    B, T, D = x.shape
    wih0, whh0, b0, wih1, whh1, b1, wlin, blin = kernel_params
    Hp = whh0.shape[0]
    O = wlin.shape[1]

    # Batch tile: only split on 2-TensorCore parts; keep TB a multiple of 16.
    TB = B // 2 if (_tensorcores_per_chip() >= 2 and B % 32 == 0) else B
    nb = B // TB
    TT = _pick_time_tile(T, TB, time_block)
    nt = T // TT
    # TODO(synk): prime/ragged T falls back to TT=T (whole sequence resident);
    # callers should pad+mask time on the host if that matters for huge T.

    # Host-side repack: (B,T,D) -> (nb, T*TB, D), time-major rows inside each
    # batch tile, fused with the f32->bf16 cast (one XLA copy; halves both the
    # HBM write of the repack and the kernel's x DMA bytes).
    x_k = (x.reshape(nb, TB, T, D)
             .transpose(0, 2, 1, 3)
             .reshape(nb, T * TB, D)
             .astype(jnp.bfloat16))

    # VMEM budget hint: never below 32 MiB, capped at ~75% of this chip's
    # physical VMEM (so v7x's 64 MiB is never fully requested and v5e/v6e may
    # exceed 64 MiB when it helps).
    bf2, f4 = 2, 4
    wbuf = 1 if single_buffer_weights else 2
    lane = lambda n: max(n, 128)
    sub = lambda n: ((n + 7) // 8) * 8
    weight_bytes = (wih0.size + whh0.size + wih1.size + whh1.size
                    + wlin.shape[0] * lane(wlin.shape[1])) * bf2
    bias_bytes = (b0.size + b1.size + lane(blin.shape[1])) * f4
    budget = (2 * sub(TT * TB) * lane(D) * bf2        # double-buffered x blocks
              + wbuf * (weight_bytes + bias_bytes)    # resident weights/biases
              + 2 * sub(TB) * lane(O) * f4            # output block
              + sub(TT * TB) * 4 * Hp * f4            # xp scratch
              + 4 * sub(TB) * Hp * f4                 # h/c scratch
              + (8 << 20))                            # Mosaic internal headroom
    cap = (3 * _vmem_capacity_bytes()) // 4
    vmem_limit = int(min(max(budget, 32 << 20), cap))

    def const(arr):
        idx = lambda b, t: (0,) * arr.ndim
        if single_buffer_weights:
            return pl.BlockSpec(arr.shape, idx, pipeline_mode=pl.Buffered(1))
        return pl.BlockSpec(arr.shape, idx)

    out = pl.pallas_call(
        _lstm_kernel,
        out_shape=jax.ShapeDtypeStruct((B, O), jnp.float32),
        grid_spec=pltpu.PrefetchScalarGridSpec(
            num_scalar_prefetch=0,
            grid=(nb, nt),
            in_specs=[
                pl.BlockSpec((None, TT * TB, D), lambda b, t: (b, t, 0)),
                const(wih0), const(whh0), const(b0),
                const(wih1), const(whh1), const(b1),
                const(wlin), const(blin),
            ],
            out_specs=pl.BlockSpec((TB, O), lambda b, t: (b, 0)),
            scratch_shapes=[pltpu.VMEM((TT * TB, 4 * Hp), jnp.float32)]
                          + [pltpu.VMEM((TB, Hp), jnp.float32)] * 4,
        ),
        compiler_params=pltpu.CompilerParams(
            dimension_semantics=("parallel", "arbitrary"),
            vmem_limit_bytes=vmem_limit),
    )(x_k, wih0, whh0, b0, wih1, whh1, b1, wlin, blin)
    return out


# ----------------------------------------------------------------------------
# Parameters (PyTorch layout) and kernel-layout packing
# ----------------------------------------------------------------------------
def make_torch_params(key, input_dim, hidden_dim, output_dim):
    """Deterministic PyTorch-layout params, uniform(-1/sqrt(H), 1/sqrt(H))."""
    H = hidden_dim
    k = 1.0 / jnp.sqrt(jnp.float32(H))
    keys = jax.random.split(key, 10)
    u = lambda kk, shape: jax.random.uniform(kk, shape, jnp.float32, -k, k)
    wih0 = u(keys[0], (4 * H, input_dim))
    whh0 = u(keys[1], (4 * H, H))
    b0 = u(keys[2], (4 * H,)) + u(keys[3], (4 * H,))
    wih1 = u(keys[4], (4 * H, H))
    whh1 = u(keys[5], (4 * H, H))
    b1 = u(keys[6], (4 * H,)) + u(keys[7], (4 * H,))
    wlin = u(keys[8], (output_dim, H))
    blin = u(keys[9], (output_dim,))
    return (wih0, whh0, b0, wih1, whh1, b1, wlin, blin)


def pack_kernel_params(torch_params, lane=128):
    """Kernel-layout params: per-gate blocks zero-padded to Hp=round_up(H,128)
    (gate slices lane-aligned; padded h/c lanes stay exactly zero), (in,out)
    layout, layer-1 W_ih / W_hh kept as separate refs so their dots overlap,
    matmul weights in bf16, biases in f32."""
    wih0, whh0, b0, wih1, whh1, b1, wlin, blin = torch_params
    H = whh0.shape[1]
    Hp = ((H + lane - 1) // lane) * lane
    bf = jnp.bfloat16

    def gate_pad_cols(w_t):                 # (K, 4H) -> (K, 4Hp), gate-blocked
        K = w_t.shape[0]
        out = jnp.zeros((K, 4 * Hp), jnp.float32)
        for g in range(4):
            out = out.at[:, g * Hp:g * Hp + H].set(w_t[:, g * H:(g + 1) * H])
        return out

    def pad_rows(w, rows):                  # (K, N) -> (rows, N)
        return jnp.zeros((rows, w.shape[1]), w.dtype).at[:w.shape[0]].set(w)

    def gate_pad_bias(b):                   # (4H,) -> (1, 4Hp)
        out = jnp.zeros((4 * Hp,), jnp.float32)
        for g in range(4):
            out = out.at[g * Hp:g * Hp + H].set(b[g * H:(g + 1) * H])
        return out[None, :]

    wih0_k = gate_pad_cols(wih0.T).astype(bf)                   # (D, 4Hp)
    whh0_k = pad_rows(gate_pad_cols(whh0.T), Hp).astype(bf)     # (Hp, 4Hp)
    b0_k = gate_pad_bias(b0)                                    # (1, 4Hp)
    wih1_k = pad_rows(gate_pad_cols(wih1.T), Hp).astype(bf)     # (Hp, 4Hp)
    whh1_k = pad_rows(gate_pad_cols(whh1.T), Hp).astype(bf)     # (Hp, 4Hp)
    b1_k = gate_pad_bias(b1)                                    # (1, 4Hp)
    wlin_k = pad_rows(wlin.T, Hp).astype(bf)                    # (Hp, O)
    blin_k = blin[None, :].astype(jnp.float32)                  # (1, O)
    return (wih0_k, whh0_k, b0_k, wih1_k, whh1_k, b1_k, wlin_k, blin_k)


# ----------------------------------------------------------------------------
# Pure-JAX reference (torch.nn.LSTM(2 layers, batch_first) + Linear)
# ----------------------------------------------------------------------------
def simple_lstm_ref(x, torch_params, matmul_dtype=None):
    """matmul_dtype=jnp.bfloat16 mimics the kernel's bf16-operand / f32-accum
    matmuls (f32 state & element-wise) for a tight numerical check."""
    wih0, whh0, b0, wih1, whh1, b1, wlin, blin = torch_params
    B = x.shape[0]
    H = whh0.shape[1]
    cast = (lambda a: a.astype(matmul_dtype)) if matmul_dtype else (lambda a: a)

    def mm(a, w):
        return jnp.dot(cast(a), cast(w).T, preferred_element_type=jnp.float32)

    def layer(inputs, wih, whh, b):
        def step(carry, x_t):
            h, c = carry
            gates = mm(x_t, wih) + mm(h, whh) + b
            i, f, g, o = jnp.split(gates, 4, axis=-1)
            c = jax.nn.sigmoid(f) * c + jax.nn.sigmoid(i) * jnp.tanh(g)
            h = jax.nn.sigmoid(o) * jnp.tanh(c)
            return (h, c), h
        init = (jnp.zeros((B, H), jnp.float32), jnp.zeros((B, H), jnp.float32))
        _, hs = jax.lax.scan(step, init, jnp.swapaxes(inputs, 0, 1))
        return jnp.swapaxes(hs, 0, 1)

    h = layer(x, wih0, whh0, b0)
    h = layer(h, wih1, whh1, b1)
    return mm(h[:, -1, :], wlin) + blin


if __name__ == "__main__":
    B, T, D, H, O = 2, 16, 4, 32, 1   # T=16 with time_block=8 -> 2 grid steps

    key = jax.random.PRNGKey(0)
    kx, kp = jax.random.split(key)
    x = jax.random.normal(kx, (B, T, D), jnp.float32)
    torch_params = make_torch_params(kp, D, H, O)
    kernel_params = pack_kernel_params(torch_params)

    # Feature probe must run OUTSIDE jit (it compiles/executes a tiny kernel).
    sb = _single_buffered_weights_supported()

    run = jax.jit(functools.partial(simple_lstm_pallas, time_block=8,
                                    single_buffer_weights=sb))
    out = jax.block_until_ready(run(x, kernel_params))
    assert out.shape == (B, O)

    # Tight check vs a reference using the kernel's numerics (bf16 matmul
    # operands, f32 accumulation / state / element-wise).
    ref_bf16 = simple_lstm_ref(x, torch_params, matmul_dtype=jnp.bfloat16)
    assert jnp.allclose(out, ref_bf16, atol=2e-3, rtol=2e-3), (out, ref_bf16)

    # Loose sanity check vs the full-f32 torch-equivalent reference.
    ref_f32 = simple_lstm_ref(x, torch_params)
    assert jnp.allclose(out, ref_f32, atol=1e-1, rtol=1e-1), (out, ref_f32)

    print("KERNEL_OK")
</pallas_src>

<mosaic_0001>
module attributes {stable_mosaic.version = 11 : i64} {
  func.func @_probe_copy_kernel(%arg0: i32, %arg1: memref<8x128xf32, #tpu.memory_space<vmem>>, %arg2: memref<8x128xf32, #tpu.memory_space<vmem>>) attributes {dimension_semantics = [#tpu.dimension_semantics<arbitrary>], iteration_bounds = array<i64: 1>, scalar_prefetch = 0 : i64, scratch_operands = 0 : i64, tpu.core_type = #tpu.core_type<tc>, window_params = [{pipeline_mode = #tpu.pipeline_mode<synchronous>, transform_indices = @transform_0, window_bounds = array<i64: 8, 128>}, {pipeline_mode = #tpu.pipeline_mode<synchronous>, transform_indices = @transform_1, window_bounds = array<i64: 8, 128>}]} {
    %c0 = arith.constant 0 : index
    %c0_0 = arith.constant 0 : index
    %0 = vector.load %arg1[%c0, %c0_0] : memref<8x128xf32, #tpu.memory_space<vmem>>, vector<8x128xf32>
    %c0_1 = arith.constant 0 : index
    %c0_2 = arith.constant 0 : index
    %1 = vector.load %arg2[%c0_1, %c0_2] : memref<8x128xf32, #tpu.memory_space<vmem>>, vector<8x128xf32>
    tpu.vector_store %arg2[%c0_1, %c0_2], %0 {strides = array<i32>} : memref<8x128xf32, #tpu.memory_space<vmem>>, vector<8x128xf32>,
    return
  }
  func.func @transform_0(%arg0: i32) -> (i32, i32) {
    %c0_i32 = arith.constant 0 : i32
    %c0_i32_0 = arith.constant 0 : i32
    %c0_i32_1 = arith.constant 0 : i32
    return %c0_i32, %c0_i32_0 : i32, i32
  }
  func.func @transform_1(%arg0: i32) -> (i32, i32) {
    %c0_i32 = arith.constant 0 : i32
    %c0_i32_0 = arith.constant 0 : i32
    %c0_i32_1 = arith.constant 0 : i32
    return %c0_i32, %c0_i32_0 : i32, i32
  }
}

module attributes {stable_mosaic.version = 11 : i64} {
  func.func @_lstm_kernel(%arg0: i32, %arg1: i32, %arg2: memref<1x16x4xbf16, #tpu.memory_space<vmem>>, %arg3: memref<4x512xbf16, #tpu.memory_space<vmem>>, %arg4: memref<128x512xbf16, #tpu.memory_space<vmem>>, %arg5: memref<1x512xf32, #tpu.memory_space<vmem>>, %arg6: memref<128x512xbf16, #tpu.memory_space<vmem>>, %arg7: memref<128x512xbf16, #tpu.memory_space<vmem>>, %arg8: memref<1x512xf32, #tpu.memory_space<vmem>>, %arg9: memref<128x1xbf16, #tpu.memory_space<vmem>>, %arg10: memref<1x1xf32, #tpu.memory_space<vmem>>, %arg11: memref<2x1xf32, #tpu.memory_space<vmem>>, %arg12: memref<16x512xf32, #tpu.memory_space<vmem>>, %arg13: memref<2x128xf32, #tpu.memory_space<vmem>>, %arg14: memref<2x128xf32, #tpu.memory_space<vmem>>, %arg15: memref<2x128xf32, #tpu.memory_space<vmem>>, %arg16: memref<2x128xf32, #tpu.memory_space<vmem>>) attributes {dimension_semantics = [#tpu.dimension_semantics<parallel>, #tpu.dimension_semantics<arbitrary>], iteration_bounds = array<i64: 1, 2>, scalar_prefetch = 0 : i64, scratch_operands = 5 : i64, tpu.core_type = #tpu.core_type<tc>, window_params = [{transform_indices = @transform_0, window_bounds = array<i64: 1, 16, 4>}, {pipeline_mode = #tpu.pipeline_mode<synchronous>, transform_indices = @transform_1, window_bounds = array<i64: 4, 512>}, {pipeline_mode = #tpu.pipeline_mode<synchronous>, transform_indices = @transform_2, window_bounds = array<i64: 128, 512>}, {pipeline_mode = #tpu.pipeline_mode<synchronous>, transform_indices = @transform_3, window_bounds = array<i64: 1, 512>}, {pipeline_mode = #tpu.pipeline_mode<synchronous>, transform_indices = @transform_4, window_bounds = array<i64: 128, 512>}, {pipeline_mode = #tpu.pipeline_mode<synchronous>, transform_indices = @transform_5, window_bounds = array<i64: 128, 512>}, {pipeline_mode = #tpu.pipeline_mode<synchronous>, transform_indices = @transform_6, window_bounds = array<i64: 1, 512>}, {pipeline_mode = #tpu.pipeline_mode<synchronous>, transform_indices = @transform_7, window_bounds = array<i64: 128, 1>}, {pipeline_mode = #tpu.pipeline_mode<synchronous>, transform_indices = @transform_8, window_bounds = array<i64: 1, 1>}, {transform_indices = @transform_9, window_bounds = array<i64: 2, 1>}]} {
    %c0_i32 = arith.constant 0 : i32
    %0 = arith.cmpi eq, %arg1, %c0_i32 : i32
    %1 = arith.extui %0 : i1 to i32
    %c0_i32_0 = arith.constant 0 : i32
    %2 = arith.cmpi ne, %1, %c0_i32_0 : i32
    scf.if %2 {
      %cst_157 = arith.constant 0.000000e+00 : f32
      %529 = vector.broadcast %cst_157 : f32 to vector<2x128xf32>
      %c0_158 = arith.constant 0 : index
      %c0_159 = arith.constant 0 : index
      %530 = vector.load %arg13[%c0_158, %c0_159] : memref<2x128xf32, #tpu.memory_space<vmem>>, vector<2x128xf32>
      tpu.vector_store %arg13[%c0_158, %c0_159], %529 {strides = array<i32>} : memref<2x128xf32, #tpu.memory_space<vmem>>, vector<2x128xf32>,
      %cst_160 = arith.constant 0.000000e+00 : f32
      %531 = vector.broadcast %cst_160 : f32 to vector<2x128xf32>
      %c0_161 = arith.constant 0 : index
      %c0_162 = arith.constant 0 : index
      %532 = vector.load %arg14[%c0_161, %c0_162] : memref<2x128xf32, #tpu.memory_space<vmem>>, vector<2x128xf32>
      tpu.vector_store %arg14[%c0_161, %c0_162], %531 {strides = array<i32>} : memref<2x128xf32, #tpu.memory_space<vmem>>, vector<2x128xf32>,
      %cst_163 = arith.constant 0.000000e+00 : f32
      %533 = vector.broadcast %cst_163 : f32 to vector<2x128xf32>
      %c0_164 = arith.constant 0 : index
      %c0_165 = arith.constant 0 : index
      %534 = vector.load %arg15[%c0_164, %c0_165] : memref<2x128xf32, #tpu.memory_space<vmem>>, vector<2x128xf32>
      tpu.vector_store %arg15[%c0_164, %c0_165], %533 {strides = array<i32>} : memref<2x128xf32, #tpu.memory_space<vmem>>, vector<2x128xf32>,
      %cst_166 = arith.constant 0.000000e+00 : f32
      %535 = vector.broadcast %cst_166 : f32 to vector<2x128xf32>
      %c0_167 = arith.constant 0 : index
      %c0_168 = arith.constant 0 : index
      %536 = vector.load %arg16[%c0_167, %c0_168] : memref<2x128xf32, #tpu.memory_space<vmem>>, vector<2x128xf32>
      tpu.vector_store %arg16[%c0_167, %c0_168], %535 {strides = array<i32>} : memref<2x128xf32, #tpu.memory_space<vmem>>, vector<2x128xf32>,
    } else {
    }
    %c0 = arith.constant 0 : index
    %c0_1 = arith.constant 0 : index
    %c0_2 = arith.constant 0 : index
    %3 = vector.load %arg2[%c0, %c0_1, %c0_2] : memref<1x16x4xbf16, #tpu.memory_space<vmem>>, vector<1x16x4xbf16>
    %4 = vector.shape_cast %3 : vector<1x16x4xbf16> to vector<16x4xbf16>
    %c0_3 = arith.constant 0 : index
    %c0_4 = arith.constant 0 : index
    %5 = vector.load %arg3[%c0_3, %c0_4] : memref<4x512xbf16, #tpu.memory_space<vmem>>, vector<4x512xbf16>
    %cst = arith.constant dense<0.000000e+00> : vector<16x512xf32>
    %6 = tpu.matmul %4, %5, %cst {dimension_numbers = #tpu.dot_dimension_numbers<[1], [0], [0], [1], [0, 0, 1, 1], [], []>} : vector<16x4xbf16>, vector<4x512xbf16>, vector<16x512xf32> -> vector<16x512xf32>
    %c0_5 = arith.constant 0 : index
    %c0_6 = arith.constant 0 : index
    %7 = vector.load %arg5[%c0_5, %c0_6] : memref<1x512xf32, #tpu.memory_space<vmem>>, vector<1x512xf32>
    %8 = vector.broadcast %7 : vector<1x512xf32> to vector<16x512xf32>
    %9 = arith.addf %6, %8 : vector<16x512xf32>
    %c0_7 = arith.constant 0 : index
    %c0_8 = arith.constant 0 : index
    %10 = vector.load %arg12[%c0_7, %c0_8] : memref<16x512xf32, #tpu.memory_space<vmem>>, vector<16x512xf32>
    tpu.vector_store %arg12[%c0_7, %c0_8], %9 {strides = array<i32>} : memref<16x512xf32, #tpu.memory_space<vmem>>, vector<16x512xf32>,
    %c0_9 = arith.constant 0 : index
    %c0_10 = arith.constant 0 : index
    %11 = vector.load %arg8[%c0_9, %c0_10] : memref<1x512xf32, #tpu.memory_space<vmem>>, vector<1x512xf32>
    %12 = vector.shape_cast %11 : vector<1x512xf32> to vector<1x512xf32>
    %13 = vector.broadcast %12 : vector<1x512xf32> to vector<2x512xf32>
    %c0_11 = arith.constant 0 : index
    %c0_12 = arith.constant 0 : index
    %14 = vector.load %arg13[%c0_11, %c0_12] : memref<2x128xf32, #tpu.memory_space<vmem>>, vector<2x128xf32>
    %c0_13 = arith.constant 0 : index
    %c0_14 = arith.constant 0 : index
    %15 = vector.load %arg14[%c0_13, %c0_14] : memref<2x128xf32, #tpu.memory_space<vmem>>, vector<2x128xf32>
    %c0_15 = arith.constant 0 : index
    %c0_16 = arith.constant 0 : index
    %16 = vector.load %arg15[%c0_15, %c0_16] : memref<2x128xf32, #tpu.memory_space<vmem>>, vector<2x128xf32>
    %c0_17 = arith.constant 0 : index
    %c0_18 = arith.constant 0 : index
    %17 = vector.load %arg16[%c0_17, %c0_18] : memref<2x128xf32, #tpu.memory_space<vmem>>, vector<2x128xf32>
    %18 = arith.truncf %16 : vector<2x128xf32> to vector<2x128xbf16>
    %c0_19 = arith.constant 0 : index
    %c0_20 = arith.constant 0 : index
    %19 = vector.load %arg7[%c0_19, %c0_20] : memref<128x512xbf16, #tpu.memory_space<vmem>>, vector<128x512xbf16>
    %cst_21 = arith.constant dense<0.000000e+00> : vector<2x512xf32>
    %20 = tpu.matmul %18, %19, %cst_21 {dimension_numbers = #tpu.dot_dimension_numbers<[1], [0], [0], [1], [0, 0, 1, 1], [], []>} : vector<2x128xbf16>, vector<128x512xbf16>, vector<2x512xf32> -> vector<2x512xf32>
    %c0_22 = arith.constant 0 : index
    %c0_23 = arith.constant 0 : index
    %21 = vector.load %arg12[%c0_22, %c0_23] : memref<16x512xf32, #tpu.memory_space<vmem>>, vector<2x512xf32>
    %22 = arith.truncf %14 : vector<2x128xf32> to vector<2x128xbf16>
    %c0_24 = arith.constant 0 : index
    %c0_25 = arith.constant 0 : index
    %23 = vector.load %arg4[%c0_24, %c0_25] : memref<128x512xbf16, #tpu.memory_space<vmem>>, vector<128x512xbf16>
    %cst_26 = arith.constant dense<0.000000e+00> : vector<2x512xf32>
    %24 = tpu.matmul %22, %23, %cst_26 {dimension_numbers = #tpu.dot_dimension_numbers<[1], [0], [0], [1], [0, 0, 1, 1], [], []>} : vector<2x128xbf16>, vector<128x512xbf16>, vector<2x512xf32> -> vector<2x512xf32>
    %25 = arith.addf %21, %24 : vector<2x512xf32>
    %26 = vector.extract_strided_slice %25 {offsets = [0, 0], sizes = [2, 128], strides = [1, 1]} : vector<2x512xf32> to vector<2x128xf32>
    %27 = arith.negf %26 : vector<2x128xf32>
    %28 = math.exp %27 : vector<2x128xf32>
    %cst_27 = arith.constant 1.000000e+00 : f32
    %29 = vector.broadcast %cst_27 : f32 to vector<2x128xf32>
    %30 = arith.addf %29, %28 : vector<2x128xf32>
    %31 = arith.divf %29, %30 : vector<2x128xf32>
    %32 = vector.extract_strided_slice %25 {offsets = [0, 128], sizes = [2, 128], strides = [1, 1]} : vector<2x512xf32> to vector<2x128xf32>
    %33 = arith.negf %32 : vector<2x128xf32>
    %34 = math.exp %33 : vector<2x128xf32>
    %cst_28 = arith.constant 1.000000e+00 : f32
    %35 = vector.broadcast %cst_28 : f32 to vector<2x128xf32>
    %36 = arith.addf %35, %34 : vector<2x128xf32>
    %37 = arith.divf %35, %36 : vector<2x128xf32>
    %38 = vector.extract_strided_slice %25 {offsets = [0, 256], sizes = [2, 128], strides = [1, 1]} : vector<2x512xf32> to vector<2x128xf32>
    %39 = math.tanh %38 : vector<2x128xf32>
    %40 = vector.extract_strided_slice %25 {offsets = [0, 384], sizes = [2, 128], strides = [1, 1]} : vector<2x512xf32> to vector<2x128xf32>
    %41 = arith.negf %40 : vector<2x128xf32>
    %42 = math.exp %41 : vector<2x128xf32>
    %cst_29 = arith.constant 1.000000e+00 : f32
    %43 = vector.broadcast %cst_29 : f32 to vector<2x128xf32>
    %44 = arith.addf %43, %42 : vector<2x128xf32>
    %45 = arith.divf %43, %44 : vector<2x128xf32>
    %46 = arith.mulf %37, %15 : vector<2x128xf32>
    %47 = arith.mulf %31, %39 : vector<2x128xf32>
    %48 = arith.addf %46, %47 : vector<2x128xf32>
    %49 = math.tanh %48 : vector<2x128xf32>
    %50 = arith.mulf %45, %49 : vector<2x128xf32>
    %51 = arith.addf %20, %13 : vector<2x512xf32>
    %52 = arith.truncf %50 : vector<2x128xf32> to vector<2x128xbf16>
    %c0_30 = arith.constant 0 : index
    %c0_31 = arith.constant 0 : index
    %53 = vector.load %arg6[%c0_30, %c0_31] : memref<128x512xbf16, #tpu.memory_space<vmem>>, vector<128x512xbf16>
    %cst_32 = arith.constant dense<0.000000e+00> : vector<2x512xf32>
    %54 = tpu.matmul %52, %53, %cst_32 {dimension_numbers = #tpu.dot_dimension_numbers<[1], [0], [0], [1], [0, 0, 1, 1], [], []>} : vector<2x128xbf16>, vector<128x512xbf16>, vector<2x512xf32> -> vector<2x512xf32>
    %55 = arith.addf %51, %54 : vector<2x512xf32>
    %56 = vector.extract_strided_slice %55 {offsets = [0, 0], sizes = [2, 128], strides = [1, 1]} : vector<2x512xf32> to vector<2x128xf32>
    %57 = arith.negf %56 : vector<2x128xf32>
    %58 = math.exp %57 : vector<2x128xf32>
    %cst_33 = arith.constant 1.000000e+00 : f32
    %59 = vector.broadcast %cst_33 : f32 to vector<2x128xf32>
    %60 = arith.addf %59, %58 : vector<2x128xf32>
    %61 = arith.divf %59, %60 : vector<2x128xf32>
    %62 = vector.extract_strided_slice %55 {offsets = [0, 128], sizes = [2, 128], strides = [1, 1]} : vector<2x512xf32> to vector<2x128xf32>
    %63 = arith.negf %62 : vector<2x128xf32>
    %64 = math.exp %63 : vector<2x128xf32>
    %cst_34 = arith.constant 1.000000e+00 : f32
    %65 = vector.broadcast %cst_34 : f32 to vector<2x128xf32>
    %66 = arith.addf %65, %64 : vector<2x128xf32>
    %67 = arith.divf %65, %66 : vector<2x128xf32>
    %68 = vector.extract_strided_slice %55 {offsets = [0, 256], sizes = [2, 128], strides = [1, 1]} : vector<2x512xf32> to vector<2x128xf32>
    %69 = math.tanh %68 : vector<2x128xf32>
    %70 = vector.extract_strided_slice %55 {offsets = [0, 384], sizes = [2, 128], strides = [1, 1]} : vector<2x512xf32> to vector<2x128xf32>
    %71 = arith.negf %70 : vector<2x128xf32>
    %72 = math.exp %71 : vector<2x128xf32>
    %cst_35 = arith.constant 1.000000e+00 : f32
    %73 = vector.broadcast %cst_35 : f32 to vector<2x128xf32>
    %74 = arith.addf %73, %72 : vector<2x128xf32>
    %75 = arith.divf %73, %74 : vector<2x128xf32>
    %76 = arith.mulf %67, %17 : vector<2x128xf32>
    %77 = arith.mulf %61, %69 : vector<2x128xf32>
    %78 = arith.addf %76, %77 : vector<2x128xf32>
    %79 = math.tanh %78 : vector<2x128xf32>
    %80 = arith.mulf %75, %79 : vector<2x128xf32>
    %81 = arith.truncf %80 : vector<2x128xf32> to vector<2x128xbf16>
    %c0_36 = arith.constant 0 : index
    %c0_37 = arith.constant 0 : index
    %82 = vector.load %arg7[%c0_36, %c0_37] : memref<128x512xbf16, #tpu.memory_space<vmem>>, vector<128x512xbf16>
    %cst_38 = arith.constant dense<0.000000e+00> : vector<2x512xf32>
    %83 = tpu.matmul %81, %82, %cst_38 {dimension_numbers = #tpu.dot_dimension_numbers<[1], [0], [0], [1], [0, 0, 1, 1], [], []>} : vector<2x128xbf16>, vector<128x512xbf16>, vector<2x512xf32> -> vector<2x512xf32>
    %c2 = arith.constant 2 : index
    %c0_39 = arith.constant 0 : index
    %84 = vector.load %arg12[%c2, %c0_39] : memref<16x512xf32, #tpu.memory_space<vmem>>, vector<2x512xf32>
    %85 = arith.truncf %50 : vector<2x128xf32> to vector<2x128xbf16>
    %c0_40 = arith.constant 0 : index
    %c0_41 = arith.constant 0 : index
    %86 = vector.load %arg4[%c0_40, %c0_41] : memref<128x512xbf16, #tpu.memory_space<vmem>>, vector<128x512xbf16>
    %cst_42 = arith.constant dense<0.000000e+00> : vector<2x512xf32>
    %87 = tpu.matmul %85, %86, %cst_42 {dimension_numbers = #tpu.dot_dimension_numbers<[1], [0], [0], [1], [0, 0, 1, 1], [], []>} : vector<2x128xbf16>, vector<128x512xbf16>, vector<2x512xf32> -> vector<2x512xf32>
    %88 = arith.addf %84, %87 : vector<2x512xf32>
    %89 = vector.extract_strided_slice %88 {offsets = [0, 0], sizes = [2, 128], strides = [1, 1]} : vector<2x512xf32> to vector<2x128xf32>
    %90 = arith.negf %89 : vector<2x128xf32>
    %91 = math.exp %90 : vector<2x128xf32>
    %cst_43 = arith.constant 1.000000e+00 : f32
    %92 = vector.broadcast %cst_43 : f32 to vector<2x128xf32>
    %93 = arith.addf %92, %91 : vector<2x128xf32>
    %94 = arith.divf %92, %93 : vector<2x128xf32>
    %95 = vector.extract_strided_slice %88 {offsets = [0, 128], sizes = [2, 128], strides = [1, 1]} : vector<2x512xf32> to vector<2x128xf32>
    %96 = arith.negf %95 : vector<2x128xf32>
    %97 = math.exp %96 : vector<2x128xf32>
    %cst_44 = arith.constant 1.000000e+00 : f32
    %98 = vector.broadcast %cst_44 : f32 to vector<2x128xf32>
    %99 = arith.addf %98, %97 : vector<2x128xf32>
    %100 = arith.divf %98, %99 : vector<2x128xf32>
    %101 = vector.extract_strided_slice %88 {offsets = [0, 256], sizes = [2, 128], strides = [1, 1]} : vector<2x512xf32> to vector<2x128xf32>
    %102 = math.tanh %101 : vector<2x128xf32>
    %103 = vector.extract_strided_slice %88 {offsets = [0, 384], sizes = [2, 128], strides = [1, 1]} : vector<2x512xf32> to vector<2x128xf32>
    %104 = arith.negf %103 : vector<2x128xf32>
    %105 = math.exp %104 : vector<2x128xf32>
    %cst_45 = arith.constant 1.000000e+00 : f32
    %106 = vector.broadcast %cst_45 : f32 to vector<2x128xf32>
    %107 = arith.addf %106, %105 : vector<2x128xf32>
    %108 = arith.divf %106, %107 : vector<2x128xf32>
    %109 = arith.mulf %100, %48 : vector<2x128xf32>
    %110 = arith.mulf %94, %102 : vector<2x128xf32>
    %111 = arith.addf %109, %110 : vector<2x128xf32>
    %112 = math.tanh %111 : vector<2x128xf32>
    %113 = arith.mulf %108, %112 : vector<2x128xf32>
    %114 = arith.addf %83, %13 : vector<2x512xf32>
    %115 = arith.truncf %113 : vector<2x128xf32> to vector<2x128xbf16>
    %c0_46 = arith.constant 0 : index
    %c0_47 = arith.constant 0 : index
    %116 = vector.load %arg6[%c0_46, %c0_47] : memref<128x512xbf16, #tpu.memory_space<vmem>>, vector<128x512xbf16>
    %cst_48 = arith.constant dense<0.000000e+00> : vector<2x512xf32>
    %117 = tpu.matmul %115, %116, %cst_48 {dimension_numbers = #tpu.dot_dimension_numbers<[1], [0], [0], [1], [0, 0, 1, 1], [], []>} : vector<2x128xbf16>, vector<128x512xbf16>, vector<2x512xf32> -> vector<2x512xf32>
    %118 = arith.addf %114, %117 : vector<2x512xf32>
    %119 = vector.extract_strided_slice %118 {offsets = [0, 0], sizes = [2, 128], strides = [1, 1]} : vector<2x512xf32> to vector<2x128xf32>
    %120 = arith.negf %119 : vector<2x128xf32>
    %121 = math.exp %120 : vector<2x128xf32>
    %cst_49 = arith.constant 1.000000e+00 : f32
    %122 = vector.broadcast %cst_49 : f32 to vector<2x128xf32>
    %123 = arith.addf %122, %121 : vector<2x128xf32>
    %124 = arith.divf %122, %123 : vector<2x128xf32>
    %125 = vector.extract_strided_slice %118 {offsets = [0, 128], sizes = [2, 128], strides = [1, 1]} : vector<2x512xf32> to vector<2x128xf32>
    %126 = arith.negf %125 : vector<2x128xf32>
    %127 = math.exp %126 : vector<2x128xf32>
    %cst_50 = arith.constant 1.000000e+00 : f32
    %128 = vector.broadcast %cst_50 : f32 to vector<2x128xf32>
    %129 = arith.addf %128, %127 : vector<2x128xf32>
    %130 = arith.divf %128, %129 : vector<2x128xf32>
    %131 = vector.extract_strided_slice %118 {offsets = [0, 256], sizes = [2, 128], strides = [1, 1]} : vector<2x512xf32> to vector<2x128xf32>
    %132 = math.tanh %131 : vector<2x128xf32>
    %133 = vector.extract_strided_slice %118 {offsets = [0, 384], sizes = [2, 128], strides = [1, 1]} : vector<2x512xf32> to vector<2x128xf32>
    %134 = arith.negf %133 : vector<2x128xf32>
    %135 = math.exp %134 : vector<2x128xf32>
    %cst_51 = arith.constant 1.000000e+00 : f32
    %136 = vector.broadcast %cst_51 : f32 to vector<2x128xf32>
    %137 = arith.addf %136, %135 : vector<2x128xf32>
    %138 = arith.divf %136, %137 : vector<2x128xf32>
    %139 = arith.mulf %130, %78 : vector<2x128xf32>
    %140 = arith.mulf %124, %132 : vector<2x128xf32>
    %141 = arith.addf %139, %140 : vector<2x128xf32>
    %142 = math.tanh %141 : vector<2x128xf32>
    %143 = arith.mulf %138, %142 : vector<2x128xf32>
    %144 = arith.truncf %143 : vector<2x128xf32> to vector<2x128xbf16>
    %c0_52 = arith.constant 0 : index
    %c0_53 = arith.constant 0 : index
    %145 = vector.load %arg7[%c0_52, %c0_53] : memref<128x512xbf16, #tpu.memory_space<vmem>>, vector<128x512xbf16>
    %cst_54 = arith.constant dense<0.000000e+00> : vector<2x512xf32>
    %146 = tpu.matmul %144, %145, %cst_54 {dimension_numbers = #tpu.dot_dimension_numbers<[1], [0], [0], [1], [0, 0, 1, 1], [], []>} : vector<2x128xbf16>, vector<128x512xbf16>, vector<2x512xf32> -> vector<2x512xf32>
    %c4 = arith.constant 4 : index
    %c0_55 = arith.constant 0 : index
    %147 = vector.load %arg12[%c4, %c0_55] : memref<16x512xf32, #tpu.memory_space<vmem>>, vector<2x512xf32>
    %148 = arith.truncf %113 : vector<2x128xf32> to vector<2x128xbf16>
    %c0_56 = arith.constant 0 : index
    %c0_57 = arith.constant 0 : index
    %149 = vector.load %arg4[%c0_56, %c0_57] : memref<128x512xbf16, #tpu.memory_space<vmem>>, vector<128x512xbf16>
    %cst_58 = arith.constant dense<0.000000e+00> : vector<2x512xf32>
    %150 = tpu.matmul %148, %149, %cst_58 {dimension_numbers = #tpu.dot_dimension_numbers<[1], [0], [0], [1], [0, 0, 1, 1], [], []>} : vector<2x128xbf16>, vector<128x512xbf16>, vector<2x512xf32> -> vector<2x512xf32>
    %151 = arith.addf %147, %150 : vector<2x512xf32>
    %152 = vector.extract_strided_slice %151 {offsets = [0, 0], sizes = [2, 128], strides = [1, 1]} : vector<2x512xf32> to vector<2x128xf32>
    %153 = arith.negf %152 : vector<2x128xf32>
    %154 = math.exp %153 : vector<2x128xf32>
    %cst_59 = arith.constant 1.000000e+00 : f32
    %155 = vector.broadcast %cst_59 : f32 to vector<2x128xf32>
    %156 = arith.addf %155, %154 : vector<2x128xf32>
    %157 = arith.divf %155, %156 : vector<2x128xf32>
    %158 = vector.extract_strided_slice %151 {offsets = [0, 128], sizes = [2, 128], strides = [1, 1]} : vector<2x512xf32> to vector<2x128xf32>
    %159 = arith.negf %158 : vector<2x128xf32>
    %160 = math.exp %159 : vector<2x128xf32>
    %cst_60 = arith.constant 1.000000e+00 : f32
    %161 = vector.broadcast %cst_60 : f32 to vector<2x128xf32>
    %162 = arith.addf %161, %160 : vector<2x128xf32>
    %163 = arith.divf %161, %162 : vector<2x128xf32>
    %164 = vector.extract_strided_slice %151 {offsets = [0, 256], sizes = [2, 128], strides = [1, 1]} : vector<2x512xf32> to vector<2x128xf32>
    %165 = math.tanh %164 : vector<2x128xf32>
    %166 = vector.extract_strided_slice %151 {offsets = [0, 384], sizes = [2, 128], strides = [1, 1]} : vector<2x512xf32> to vector<2x128xf32>
    %167 = arith.negf %166 : vector<2x128xf32>
    %168 = math.exp %167 : vector<2x128xf32>
    %cst_61 = arith.constant 1.000000e+00 : f32
    %169 = vector.broadcast %cst_61 : f32 to vector<2x128xf32>
    %170 = arith.addf %169, %168 : vector<2x128xf32>
    %171 = arith.divf %169, %170 : vector<2x128xf32>
    %172 = arith.mulf %163, %111 : vector<2x128xf32>
    %173 = arith.mulf %157, %165 : vector<2x128xf32>
    %174 = arith.addf %172, %173 : vector<2x128xf32>
    %175 = math.tanh %174 : vector<2x128xf32>
    %176 = arith.mulf %171, %175 : vector<2x128xf32>
    %177 = arith.addf %146, %13 : vector<2x512xf32>
    %178 = arith.truncf %176 : vector<2x128xf32> to vector<2x128xbf16>
    %c0_62 = arith.constant 0 : index
    %c0_63 = arith.constant 0 : index
    %179 = vector.load %arg6[%c0_62, %c0_63] : memref<128x512xbf16, #tpu.memory_space<vmem>>, vector<128x512xbf16>
    %cst_64 = arith.constant dense<0.000000e+00> : vector<2x512xf32>
    %180 = tpu.matmul %178, %179, %cst_64 {dimension_numbers = #tpu.dot_dimension_numbers<[1], [0], [0], [1], [0, 0, 1, 1], [], []>} : vector<2x128xbf16>, vector<128x512xbf16>, vector<2x512xf32> -> vector<2x512xf32>
    %181 = arith.addf %177, %180 : vector<2x512xf32>
    %182 = vector.extract_strided_slice %181 {offsets = [0, 0], sizes = [2, 128], strides = [1, 1]} : vector<2x512xf32> to vector<2x128xf32>
    %183 = arith.negf %182 : vector<2x128xf32>
    %184 = math.exp %183 : vector<2x128xf32>
    %cst_65 = arith.constant 1.000000e+00 : f32
    %185 = vector.broadcast %cst_65 : f32 to vector<2x128xf32>
    %186 = arith.addf %185, %184 : vector<2x128xf32>
    %187 = arith.divf %185, %186 : vector<2x128xf32>
    %188 = vector.extract_strided_slice %181 {offsets = [0, 128], sizes = [2, 128], strides = [1, 1]} : vector<2x512xf32> to vector<2x128xf32>
    %189 = arith.negf %188 : vector<2x128xf32>
    %190 = math.exp %189 : vector<2x128xf32>
    %cst_66 = arith.constant 1.000000e+00 : f32
    %191 = vector.broadcast %cst_66 : f32 to vector<2x128xf32>
    %192 = arith.addf %191, %190 : vector<2x128xf32>
    %193 = arith.divf %191, %192 : vector<2x128xf32>
    %194 = vector.extract_strided_slice %181 {offsets = [0, 256], sizes = [2, 128], strides = [1, 1]} : vector<2x512xf32> to vector<2x128xf32>
    %195 = math.tanh %194 : vector<2x128xf32>
    %196 = vector.extract_strided_slice %181 {offsets = [0, 384], sizes = [2, 128], strides = [1, 1]} : vector<2x512xf32> to vector<2x128xf32>
    %197 = arith.negf %196 : vector<2x128xf32>
    %198 = math.exp %197 : vector<2x128xf32>
    %cst_67 = arith.constant 1.000000e+00 : f32
    %199 = vector.broadcast %cst_67 : f32 to vector<2x128xf32>
    %200 = arith.addf %199, %198 : vector<2x128xf32>
    %201 = arith.divf %199, %200 : vector<2x128xf32>
    %202 = arith.mulf %193, %141 : vector<2x128xf32>
    %203 = arith.mulf %187, %195 : vector<2x128xf32>
    %204 = arith.addf %202, %203 : vector<2x128xf32>
    %205 = math.tanh %204 : vector<2x128xf32>
    %206 = arith.mulf %201, %205 : vector<2x128xf32>
    %207 = arith.truncf %206 : vector<2x128xf32> to vector<2x128xbf16>
    %c0_68 = arith.constant 0 : index
    %c0_69 = arith.constant 0 : index
    %208 = vector.load %arg7[%c0_68, %c0_69] : memref<128x512xbf16, #tpu.memory_space<vmem>>, vector<128x512xbf16>
    %cst_70 = arith.constant dense<0.000000e+00> : vector<2x512xf32>
    %209 = tpu.matmul %207, %208, %cst_70 {dimension_numbers = #tpu.dot_dimension_numbers<[1], [0], [0], [1], [0, 0, 1, 1], [], []>} : vector<2x128xbf16>, vector<128x512xbf16>, vector<2x512xf32> -> vector<2x512xf32>
    %c6 = arith.constant 6 : index
    %c0_71 = arith.constant 0 : index
    %210 = vector.load %arg12[%c6, %c0_71] : memref<16x512xf32, #tpu.memory_space<vmem>>, vector<2x512xf32>
    %211 = arith.truncf %176 : vector<2x128xf32> to vector<2x128xbf16>
    %c0_72 = arith.constant 0 : index
    %c0_73 = arith.constant 0 : index
    %212 = vector.load %arg4[%c0_72, %c0_73] : memref<128x512xbf16, #tpu.memory_space<vmem>>, vector<128x512xbf16>
    %cst_74 = arith.constant dense<0.000000e+00> : vector<2x512xf32>
    %213 = tpu.matmul %211, %212, %cst_74 {dimension_numbers = #tpu.dot_dimension_numbers<[1], [0], [0], [1], [0, 0, 1, 1], [], []>} : vector<2x128xbf16>, vector<128x512xbf16>, vector<2x512xf32> -> vector<2x512xf32>
    %214 = arith.addf %210, %213 : vector<2x512xf32>
    %215 = vector.extract_strided_slice %214 {offsets = [0, 0], sizes = [2, 128], strides = [1, 1]} : vector<2x512xf32> to vector<2x128xf32>
    %216 = arith.negf %215 : vector<2x128xf32>
    %217 = math.exp %216 : vector<2x128xf32>
    %cst_75 = arith.constant 1.000000e+00 : f32
    %218 = vector.broadcast %cst_75 : f32 to vector<2x128xf32>
    %219 = arith.addf %218, %217 : vector<2x128xf32>
    %220 = arith.divf %218, %219 : vector<2x128xf32>
    %221 = vector.extract_strided_slice %214 {offsets = [0, 128], sizes = [2, 128], strides = [1, 1]} : vector<2x512xf32> to vector<2x128xf32>
    %222 = arith.negf %221 : vector<2x128xf32>
    %223 = math.exp %222 : vector<2x128xf32>
    %cst_76 = arith.constant 1.000000e+00 : f32
    %224 = vector.broadcast %cst_76 : f32 to vector<2x128xf32>
    %225 = arith.addf %224, %223 : vector<2x128xf32>
    %226 = arith.divf %224, %225 : vector<2x128xf32>
    %227 = vector.extract_strided_slice %214 {offsets = [0, 256], sizes = [2, 128], strides = [1, 1]} : vector<2x512xf32> to vector<2x128xf32>
    %228 = math.tanh %227 : vector<2x128xf32>
    %229 = vector.extract_strided_slice %214 {offsets = [0, 384], sizes = [2, 128], strides = [1, 1]} : vector<2x512xf32> to vector<2x128xf32>
    %230 = arith.negf %229 : vector<2x128xf32>
    %231 = math.exp %230 : vector<2x128xf32>
    %cst_77 = arith.constant 1.000000e+00 : f32
    %232 = vector.broadcast %cst_77 : f32 to vector<2x128xf32>
    %233 = arith.addf %232, %231 : vector<2x128xf32>
    %234 = arith.divf %232, %233 : vector<2x128xf32>
    %235 = arith.mulf %226, %174 : vector<2x128xf32>
    %236 = arith.mulf %220, %228 : vector<2x128xf32>
    %237 = arith.addf %235, %236 : vector<2x128xf32>
    %238 = math.tanh %237 : vector<2x128xf32>
    %239 = arith.mulf %234, %238 : vector<2x128xf32>
    %240 = arith.addf %209, %13 : vector<2x512xf32>
    %241 = arith.truncf %239 : vector<2x128xf32> to vector<2x128xbf16>
    %c0_78 = arith.constant 0 : index
    %c0_79 = arith.constant 0 : index
    %242 = vector.load %arg6[%c0_78, %c0_79] : memref<128x512xbf16, #tpu.memory_space<vmem>>, vector<128x512xbf16>
    %cst_80 = arith.constant dense<0.000000e+00> : vector<2x512xf32>
    %243 = tpu.matmul %241, %242, %cst_80 {dimension_numbers = #tpu.dot_dimension_numbers<[1], [0], [0], [1], [0, 0, 1, 1], [], []>} : vector<2x128xbf16>, vector<128x512xbf16>, vector<2x512xf32> -> vector<2x512xf32>
    %244 = arith.addf %240, %243 : vector<2x512xf32>
    %245 = vector.extract_strided_slice %244 {offsets = [0, 0], sizes = [2, 128], strides = [1, 1]} : vector<2x512xf32> to vector<2x128xf32>
    %246 = arith.negf %245 : vector<2x128xf32>
    %247 = math.exp %246 : vector<2x128xf32>
    %cst_81 = arith.constant 1.000000e+00 : f32
    %248 = vector.broadcast %cst_81 : f32 to vector<2x128xf32>
    %249 = arith.addf %248, %247 : vector<2x128xf32>
    %250 = arith.divf %248, %249 : vector<2x128xf32>
    %251 = vector.extract_strided_slice %244 {offsets = [0, 128], sizes = [2, 128], strides = [1, 1]} : vector<2x512xf32> to vector<2x128xf32>
    %252 = arith.negf %251 : vector<2x128xf32>
    %253 = math.exp %252 : vector<2x128xf32>
    %cst_82 = arith.constant 1.000000e+00 : f32
    %254 = vector.broadcast %cst_82 : f32 to vector<2x128xf32>
    %255 = arith.addf %254, %253 : vector<2x128xf32>
    %256 = arith.divf %254, %255 : vector<2x128xf32>
    %257 = vector.extract_strided_slice %244 {offsets = [0, 256], sizes = [2, 128], strides = [1, 1]} : vector<2x512xf32> to vector<2x128xf32>
    %258 = math.tanh %257 : vector<2x128xf32>
    %259 = vector.extract_strided_slice %244 {offsets = [0, 384], sizes = [2, 128], strides = [1, 1]} : vector<2x512xf32> to vector<2x128xf32>
    %260 = arith.negf %259 : vector<2x128xf32>
    %261 = math.exp %260 : vector<2x128xf32>
    %cst_83 = arith.constant 1.000000e+00 : f32
    %262 = vector.broadcast %cst_83 : f32 to vector<2x128xf32>
    %263 = arith.addf %262, %261 : vector<2x128xf32>
    %264 = arith.divf %262, %263 : vector<2x128xf32>
    %265 = arith.mulf %256, %204 : vector<2x128xf32>
    %266 = arith.mulf %250, %258 : vector<2x128xf32>
    %267 = arith.addf %265, %266 : vector<2x128xf32>
    %268 = math.tanh %267 : vector<2x128xf32>
    %269 = arith.mulf %264, %268 : vector<2x128xf32>
    %270 = arith.truncf %269 : vector<2x128xf32> to vector<2x128xbf16>
    %c0_84 = arith.constant 0 : index
    %c0_85 = arith.constant 0 : index
    %271 = vector.load %arg7[%c0_84, %c0_85] : memref<128x512xbf16, #tpu.memory_space<vmem>>, vector<128x512xbf16>
    %cst_86 = arith.constant dense<0.000000e+00> : vector<2x512xf32>
    %272 = tpu.matmul %270, %271, %cst_86 {dimension_numbers = #tpu.dot_dimension_numbers<[1], [0], [0], [1], [0, 0, 1, 1], [], []>} : vector<2x128xbf16>, vector<128x512xbf16>, vector<2x512xf32> -> vector<2x512xf32>
    %c8 = arith.constant 8 : index
    %c0_87 = arith.constant 0 : index
    %273 = vector.load %arg12[%c8, %c0_87] : memref<16x512xf32, #tpu.memory_space<vmem>>, vector<2x512xf32>
    %274 = arith.truncf %239 : vector<2x128xf32> to vector<2x128xbf16>
    %c0_88 = arith.constant 0 : index
    %c0_89 = arith.constant 0 : index
    %275 = vector.load %arg4[%c0_88, %c0_89] : memref<128x512xbf16, #tpu.memory_space<vmem>>, vector<128x512xbf16>
    %cst_90 = arith.constant dense<0.000000e+00> : vector<2x512xf32>
    %276 = tpu.matmul %274, %275, %cst_90 {dimension_numbers = #tpu.dot_dimension_numbers<[1], [0], [0], [1], [0, 0, 1, 1], [], []>} : vector<2x128xbf16>, vector<128x512xbf16>, vector<2x512xf32> -> vector<2x512xf32>
    %277 = arith.addf %273, %276 : vector<2x512xf32>
    %278 = vector.extract_strided_slice %277 {offsets = [0, 0], sizes = [2, 128], strides = [1, 1]} : vector<2x512xf32> to vector<2x128xf32>
    %279 = arith.negf %278 : vector<2x128xf32>
    %280 = math.exp %279 : vector<2x128xf32>
    %cst_91 = arith.constant 1.000000e+00 : f32
    %281 = vector.broadcast %cst_91 : f32 to vector<2x128xf32>
    %282 = arith.addf %281, %280 : vector<2x128xf32>
    %283 = arith.divf %281, %282 : vector<2x128xf32>
    %284 = vector.extract_strided_slice %277 {offsets = [0, 128], sizes = [2, 128], strides = [1, 1]} : vector<2x512xf32> to vector<2x128xf32>
    %285 = arith.negf %284 : vector<2x128xf32>
    %286 = math.exp %285 : vector<2x128xf32>
    %cst_92 = arith.constant 1.000000e+00 : f32
    %287 = vector.broadcast %cst_92 : f32 to vector<2x128xf32>
    %288 = arith.addf %287, %286 : vector<2x128xf32>
    %289 = arith.divf %287, %288 : vector<2x128xf32>
    %290 = vector.extract_strided_slice %277 {offsets = [0, 256], sizes = [2, 128], strides = [1, 1]} : vector<2x512xf32> to vector<2x128xf32>
    %291 = math.tanh %290 : vector<2x128xf32>
    %292 = vector.extract_strided_slice %277 {offsets = [0, 384], sizes = [2, 128], strides = [1, 1]} : vector<2x512xf32> to vector<2x128xf32>
    %293 = arith.negf %292 : vector<2x128xf32>
    %294 = math.exp %293 : vector<2x128xf32>
    %cst_93 = arith.constant 1.000000e+00 : f32
    %295 = vector.broadcast %cst_93 : f32 to vector<2x128xf32>
    %296 = arith.addf %295, %294 : vector<2x128xf32>
    %297 = arith.divf %295, %296 : vector<2x128xf32>
    %298 = arith.mulf %289, %237 : vector<2x128xf32>
    %299 = arith.mulf %283, %291 : vector<2x128xf32>
    %300 = arith.addf %298, %299 : vector<2x128xf32>
    %301 = math.tanh %300 : vector<2x128xf32>
    %302 = arith.mulf %297, %301 : vector<2x128xf32>
    %303 = arith.addf %272, %13 : vector<2x512xf32>
    %304 = arith.truncf %302 : vector<2x128xf32> to vector<2x128xbf16>
    %c0_94 = arith.constant 0 : index
    %c0_95 = arith.constant 0 : index
    %305 = vector.load %arg6[%c0_94, %c0_95] : memref<128x512xbf16, #tpu.memory_space<vmem>>, vector<128x512xbf16>
    %cst_96 = arith.constant dense<0.000000e+00> : vector<2x512xf32>
    %306 = tpu.matmul %304, %305, %cst_96 {dimension_numbers = #tpu.dot_dimension_numbers<[1], [0], [0], [1], [0, 0, 1, 1], [], []>} : vector<2x128xbf16>, vector<128x512xbf16>, vector<2x512xf32> -> vector<2x512xf32>
    %307 = arith.addf %303, %306 : vector<2x512xf32>
    %308 = vector.extract_strided_slice %307 {offsets = [0, 0], sizes = [2, 128], strides = [1, 1]} : vector<2x512xf32> to vector<2x128xf32>
    %309 = arith.negf %308 : vector<2x128xf32>
    %310 = math.exp %309 : vector<2x128xf32>
    %cst_97 = arith.constant 1.000000e+00 : f32
    %311 = vector.broadcast %cst_97 : f32 to vector<2x128xf32>
    %312 = arith.addf %311, %310 : vector<2x128xf32>
    %313 = arith.divf %311, %312 : vector<2x128xf32>
    %314 = vector.extract_strided_slice %307 {offsets = [0, 128], sizes = [2, 128], strides = [1, 1]} : vector<2x512xf32> to vector<2x128xf32>
    %315 = arith.negf %314 : vector<2x128xf32>
    %316 = math.exp %315 : vector<2x128xf32>
    %cst_98 = arith.constant 1.000000e+00 : f32
    %317 = vector.broadcast %cst_98 : f32 to vector<2x128xf32>
    %318 = arith.addf %317, %316 : vector<2x128xf32>
    %319 = arith.divf %317, %318 : vector<2x128xf32>
    %320 = vector.extract_strided_slice %307 {offsets = [0, 256], sizes = [2, 128], strides = [1, 1]} : vector<2x512xf32> to vector<2x128xf32>
    %321 = math.tanh %320 : vector<2x128xf32>
    %322 = vector.extract_strided_slice %307 {offsets = [0, 384], sizes = [2, 128], strides = [1, 1]} : vector<2x512xf32> to vector<2x128xf32>
    %323 = arith.negf %322 : vector<2x128xf32>
    %324 = math.exp %323 : vector<2x128xf32>
    %cst_99 = arith.constant 1.000000e+00 : f32
    %325 = vector.broadcast %cst_99 : f32 to vector<2x128xf32>
    %326 = arith.addf %325, %324 : vector<2x128xf32>
    %327 = arith.divf %325, %326 : vector<2x128xf32>
    %328 = arith.mulf %319, %267 : vector<2x128xf32>
    %329 = arith.mulf %313, %321 : vector<2x128xf32>
    %330 = arith.addf %328, %329 : vector<2x128xf32>
    %331 = math.tanh %330 : vector<2x128xf32>
    %332 = arith.mulf %327, %331 : vector<2x128xf32>
    %333 = arith.truncf %332 : vector<2x128xf32> to vector<2x128xbf16>
    %c0_100 = arith.constant 0 : index
    %c0_101 = arith.constant 0 : index
    %334 = vector.load %arg7[%c0_100, %c0_101] : memref<128x512xbf16, #tpu.memory_space<vmem>>, vector<128x512xbf16>
    %cst_102 = arith.constant dense<0.000000e+00> : vector<2x512xf32>
    %335 = tpu.matmul %333, %334, %cst_102 {dimension_numbers = #tpu.dot_dimension_numbers<[1], [0], [0], [1], [0, 0, 1, 1], [], []>} : vector<2x128xbf16>, vector<128x512xbf16>, vector<2x512xf32> -> vector<2x512xf32>
    %c10 = arith.constant 10 : index
    %c0_103 = arith.constant 0 : index
    %336 = vector.load %arg12[%c10, %c0_103] : memref<16x512xf32, #tpu.memory_space<vmem>>, vector<2x512xf32>
    %337 = arith.truncf %302 : vector<2x128xf32> to vector<2x128xbf16>
    %c0_104 = arith.constant 0 : index
    %c0_105 = arith.constant 0 : index
    %338 = vector.load %arg4[%c0_104, %c0_105] : memref<128x512xbf16, #tpu.memory_space<vmem>>, vector<128x512xbf16>
    %cst_106 = arith.constant dense<0.000000e+00> : vector<2x512xf32>
    %339 = tpu.matmul %337, %338, %cst_106 {dimension_numbers = #tpu.dot_dimension_numbers<[1], [0], [0], [1], [0, 0, 1, 1], [], []>} : vector<2x128xbf16>, vector<128x512xbf16>, vector<2x512xf32> -> vector<2x512xf32>
    %340 = arith.addf %336, %339 : vector<2x512xf32>
    %341 = vector.extract_strided_slice %340 {offsets = [0, 0], sizes = [2, 128], strides = [1, 1]} : vector<2x512xf32> to vector<2x128xf32>
    %342 = arith.negf %341 : vector<2x128xf32>
    %343 = math.exp %342 : vector<2x128xf32>
    %cst_107 = arith.constant 1.000000e+00 : f32
    %344 = vector.broadcast %cst_107 : f32 to vector<2x128xf32>
    %345 = arith.addf %344, %343 : vector<2x128xf32>
    %346 = arith.divf %344, %345 : vector<2x128xf32>
    %347 = vector.extract_strided_slice %340 {offsets = [0, 128], sizes = [2, 128], strides = [1, 1]} : vector<2x512xf32> to vector<2x128xf32>
    %348 = arith.negf %347 : vector<2x128xf32>
    %349 = math.exp %348 : vector<2x128xf32>
    %cst_108 = arith.constant 1.000000e+00 : f32
    %350 = vector.broadcast %cst_108 : f32 to vector<2x128xf32>
    %351 = arith.addf %350, %349 : vector<2x128xf32>
    %352 = arith.divf %350, %351 : vector<2x128xf32>
    %353 = vector.extract_strided_slice %340 {offsets = [0, 256], sizes = [2, 128], strides = [1, 1]} : vector<2x512xf32> to vector<2x128xf32>
    %354 = math.tanh %353 : vector<2x128xf32>
    %355 = vector.extract_strided_slice %340 {offsets = [0, 384], sizes = [2, 128], strides = [1, 1]} : vector<2x512xf32> to vector<2x128xf32>
    %356 = arith.negf %355 : vector<2x128xf32>
    %357 = math.exp %356 : vector<2x128xf32>
    %cst_109 = arith.constant 1.000000e+00 : f32
    %358 = vector.broadcast %cst_109 : f32 to vector<2x128xf32>
    %359 = arith.addf %358, %357 : vector<2x128xf32>
    %360 = arith.divf %358, %359 : vector<2x128xf32>
    %361 = arith.mulf %352, %300 : vector<2x128xf32>
    %362 = arith.mulf %346, %354 : vector<2x128xf32>
    %363 = arith.addf %361, %362 : vector<2x128xf32>
    %364 = math.tanh %363 : vector<2x128xf32>
    %365 = arith.mulf %360, %364 : vector<2x128xf32>
    %366 = arith.addf %335, %13 : vector<2x512xf32>
    %367 = arith.truncf %365 : vector<2x128xf32> to vector<2x128xbf16>
    %c0_110 = arith.constant 0 : index
    %c0_111 = arith.constant 0 : index
    %368 = vector.load %arg6[%c0_110, %c0_111] : memref<128x512xbf16, #tpu.memory_space<vmem>>, vector<128x512xbf16>
    %cst_112 = arith.constant dense<0.000000e+00> : vector<2x512xf32>
    %369 = tpu.matmul %367, %368, %cst_112 {dimension_numbers = #tpu.dot_dimension_numbers<[1], [0], [0], [1], [0, 0, 1, 1], [], []>} : vector<2x128xbf16>, vector<128x512xbf16>, vector<2x512xf32> -> vector<2x512xf32>
    %370 = arith.addf %366, %369 : vector<2x512xf32>
    %371 = vector.extract_strided_slice %370 {offsets = [0, 0], sizes = [2, 128], strides = [1, 1]} : vector<2x512xf32> to vector<2x128xf32>
    %372 = arith.negf %371 : vector<2x128xf32>
    %373 = math.exp %372 : vector<2x128xf32>
    %cst_113 = arith.constant 1.000000e+00 : f32
    %374 = vector.broadcast %cst_113 : f32 to vector<2x128xf32>
    %375 = arith.addf %374, %373 : vector<2x128xf32>
    %376 = arith.divf %374, %375 : vector<2x128xf32>
    %377 = vector.extract_strided_slice %370 {offsets = [0, 128], sizes = [2, 128], strides = [1, 1]} : vector<2x512xf32> to vector<2x128xf32>
    %378 = arith.negf %377 : vector<2x128xf32>
    %379 = math.exp %378 : vector<2x128xf32>
    %cst_114 = arith.constant 1.000000e+00 : f32
    %380 = vector.broadcast %cst_114 : f32 to vector<2x128xf32>
    %381 = arith.addf %380, %379 : vector<2x128xf32>
    %382 = arith.divf %380, %381 : vector<2x128xf32>
    %383 = vector.extract_strided_slice %370 {offsets = [0, 256], sizes = [2, 128], strides = [1, 1]} : vector<2x512xf32> to vector<2x128xf32>
    %384 = math.tanh %383 : vector<2x128xf32>
    %385 = vector.extract_strided_slice %370 {offsets = [0, 384], sizes = [2, 128], strides = [1, 1]} : vector<2x512xf32> to vector<2x128xf32>
    %386 = arith.negf %385 : vector<2x128xf32>
    %387 = math.exp %386 : vector<2x128xf32>
    %cst_115 = arith.constant 1.000000e+00 : f32
    %388 = vector.broadcast %cst_115 : f32 to vector<2x128xf32>
    %389 = arith.addf %388, %387 : vector<2x128xf32>
    %390 = arith.divf %388, %389 : vector<2x128xf32>
    %391 = arith.mulf %382, %330 : vector<2x128xf32>
    %392 = arith.mulf %376, %384 : vector<2x128xf32>
    %393 = arith.addf %391, %392 : vector<2x128xf32>
    %394 = math.tanh %393 : vector<2x128xf32>
    %395 = arith.mulf %390, %394 : vector<2x128xf32>
    %396 = arith.truncf %395 : vector<2x128xf32> to vector<2x128xbf16>
    %c0_116 = arith.constant 0 : index
    %c0_117 = arith.constant 0 : index
    %397 = vector.load %arg7[%c0_116, %c0_117] : memref<128x512xbf16, #tpu.memory_space<vmem>>, vector<128x512xbf16>
    %cst_118 = arith.constant dense<0.000000e+00> : vector<2x512xf32>
    %398 = tpu.matmul %396, %397, %cst_118 {dimension_numbers = #tpu.dot_dimension_numbers<[1], [0], [0], [1], [0, 0, 1, 1], [], []>} : vector<2x128xbf16>, vector<128x512xbf16>, vector<2x512xf32> -> vector<2x512xf32>
    %c12 = arith.constant 12 : index
    %c0_119 = arith.constant 0 : index
    %399 = vector.load %arg12[%c12, %c0_119] : memref<16x512xf32, #tpu.memory_space<vmem>>, vector<2x512xf32>
    %400 = arith.truncf %365 : vector<2x128xf32> to vector<2x128xbf16>
    %c0_120 = arith.constant 0 : index
    %c0_121 = arith.constant 0 : index
    %401 = vector.load %arg4[%c0_120, %c0_121] : memref<128x512xbf16, #tpu.memory_space<vmem>>, vector<128x512xbf16>
    %cst_122 = arith.constant dense<0.000000e+00> : vector<2x512xf32>
    %402 = tpu.matmul %400, %401, %cst_122 {dimension_numbers = #tpu.dot_dimension_numbers<[1], [0], [0], [1], [0, 0, 1, 1], [], []>} : vector<2x128xbf16>, vector<128x512xbf16>, vector<2x512xf32> -> vector<2x512xf32>
    %403 = arith.addf %399, %402 : vector<2x512xf32>
    %404 = vector.extract_strided_slice %403 {offsets = [0, 0], sizes = [2, 128], strides = [1, 1]} : vector<2x512xf32> to vector<2x128xf32>
    %405 = arith.negf %404 : vector<2x128xf32>
    %406 = math.exp %405 : vector<2x128xf32>
    %cst_123 = arith.constant 1.000000e+00 : f32
    %407 = vector.broadcast %cst_123 : f32 to vector<2x128xf32>
    %408 = arith.addf %407, %406 : vector<2x128xf32>
    %409 = arith.divf %407, %408 : vector<2x128xf32>
    %410 = vector.extract_strided_slice %403 {offsets = [0, 128], sizes = [2, 128], strides = [1, 1]} : vector<2x512xf32> to vector<2x128xf32>
    %411 = arith.negf %410 : vector<2x128xf32>
    %412 = math.exp %411 : vector<2x128xf32>
    %cst_124 = arith.constant 1.000000e+00 : f32
    %413 = vector.broadcast %cst_124 : f32 to vector<2x128xf32>
    %414 = arith.addf %413, %412 : vector<2x128xf32>
    %415 = arith.divf %413, %414 : vector<2x128xf32>
    %416 = vector.extract_strided_slice %403 {offsets = [0, 256], sizes = [2, 128], strides = [1, 1]} : vector<2x512xf32> to vector<2x128xf32>
    %417 = math.tanh %416 : vector<2x128xf32>
    %418 = vector.extract_strided_slice %403 {offsets = [0, 384], sizes = [2, 128], strides = [1, 1]} : vector<2x512xf32> to vector<2x128xf32>
    %419 = arith.negf %418 : vector<2x128xf32>
    %420 = math.exp %419 : vector<2x128xf32>
    %cst_125 = arith.constant 1.000000e+00 : f32
    %421 = vector.broadcast %cst_125 : f32 to vector<2x128xf32>
    %422 = arith.addf %421, %420 : vector<2x128xf32>
    %423 = arith.divf %421, %422 : vector<2x128xf32>
    %424 = arith.mulf %415, %363 : vector<2x128xf32>
    %425 = arith.mulf %409, %417 : vector<2x128xf32>
    %426 = arith.addf %424, %425 : vector<2x128xf32>
    %427 = math.tanh %426 : vector<2x128xf32>
    %428 = arith.mulf %423, %427 : vector<2x128xf32>
    %429 = arith.addf %398, %13 : vector<2x512xf32>
    %430 = arith.truncf %428 : vector<2x128xf32> to vector<2x128xbf16>
    %c0_126 = arith.constant 0 : index
    %c0_127 = arith.constant 0 : index
    %431 = vector.load %arg6[%c0_126, %c0_127] : memref<128x512xbf16, #tpu.memory_space<vmem>>, vector<128x512xbf16>
    %cst_128 = arith.constant dense<0.000000e+00> : vector<2x512xf32>
    %432 = tpu.matmul %430, %431, %cst_128 {dimension_numbers = #tpu.dot_dimension_numbers<[1], [0], [0], [1], [0, 0, 1, 1], [], []>} : vector<2x128xbf16>, vector<128x512xbf16>, vector<2x512xf32> -> vector<2x512xf32>
    %433 = arith.addf %429, %432 : vector<2x512xf32>
    %434 = vector.extract_strided_slice %433 {offsets = [0, 0], sizes = [2, 128], strides = [1, 1]} : vector<2x512xf32> to vector<2x128xf32>
    %435 = arith.negf %434 : vector<2x128xf32>
    %436 = math.exp %435 : vector<2x128xf32>
    %cst_129 = arith.constant 1.000000e+00 : f32
    %437 = vector.broadcast %cst_129 : f32 to vector<2x128xf32>
    %438 = arith.addf %437, %436 : vector<2x128xf32>
    %439 = arith.divf %437, %438 : vector<2x128xf32>
    %440 = vector.extract_strided_slice %433 {offsets = [0, 128], sizes = [2, 128], strides = [1, 1]} : vector<2x512xf32> to vector<2x128xf32>
    %441 = arith.negf %440 : vector<2x128xf32>
    %442 = math.exp %441 : vector<2x128xf32>
    %cst_130 = arith.constant 1.000000e+00 : f32
    %443 = vector.broadcast %cst_130 : f32 to vector<2x128xf32>
    %444 = arith.addf %443, %442 : vector<2x128xf32>
    %445 = arith.divf %443, %444 : vector<2x128xf32>
    %446 = vector.extract_strided_slice %433 {offsets = [0, 256], sizes = [2, 128], strides = [1, 1]} : vector<2x512xf32> to vector<2x128xf32>
    %447 = math.tanh %446 : vector<2x128xf32>
    %448 = vector.extract_strided_slice %433 {offsets = [0, 384], sizes = [2, 128], strides = [1, 1]} : vector<2x512xf32> to vector<2x128xf32>
    %449 = arith.negf %448 : vector<2x128xf32>
    %450 = math.exp %449 : vector<2x128xf32>
    %cst_131 = arith.constant 1.000000e+00 : f32
    %451 = vector.broadcast %cst_131 : f32 to vector<2x128xf32>
    %452 = arith.addf %451, %450 : vector<2x128xf32>
    %453 = arith.divf %451, %452 : vector<2x128xf32>
    %454 = arith.mulf %445, %393 : vector<2x128xf32>
    %455 = arith.mulf %439, %447 : vector<2x128xf32>
    %456 = arith.addf %454, %455 : vector<2x128xf32>
    %457 = math.tanh %456 : vector<2x128xf32>
    %458 = arith.mulf %453, %457 : vector<2x128xf32>
    %459 = arith.truncf %458 : vector<2x128xf32> to vector<2x128xbf16>
    %c0_132 = arith.constant 0 : index
    %c0_133 = arith.constant 0 : index
    %460 = vector.load %arg7[%c0_132, %c0_133] : memref<128x512xbf16, #tpu.memory_space<vmem>>, vector<128x512xbf16>
    %cst_134 = arith.constant dense<0.000000e+00> : vector<2x512xf32>
    %461 = tpu.matmul %459, %460, %cst_134 {dimension_numbers = #tpu.dot_dimension_numbers<[1], [0], [0], [1], [0, 0, 1, 1], [], []>} : vector<2x128xbf16>, vector<128x512xbf16>, vector<2x512xf32> -> vector<2x512xf32>
    %c14 = arith.constant 14 : index
    %c0_135 = arith.constant 0 : index
    %462 = vector.load %arg12[%c14, %c0_135] : memref<16x512xf32, #tpu.memory_space<vmem>>, vector<2x512xf32>
    %463 = arith.truncf %428 : vector<2x128xf32> to vector<2x128xbf16>
    %c0_136 = arith.constant 0 : index
    %c0_137 = arith.constant 0 : index
    %464 = vector.load %arg4[%c0_136, %c0_137] : memref<128x512xbf16, #tpu.memory_space<vmem>>, vector<128x512xbf16>
    %cst_138 = arith.constant dense<0.000000e+00> : vector<2x512xf32>
    %465 = tpu.matmul %463, %464, %cst_138 {dimension_numbers = #tpu.dot_dimension_numbers<[1], [0], [0], [1], [0, 0, 1, 1], [], []>} : vector<2x128xbf16>, vector<128x512xbf16>, vector<2x512xf32> -> vector<2x512xf32>
    %466 = arith.addf %462, %465 : vector<2x512xf32>
    %467 = vector.extract_strided_slice %466 {offsets = [0, 0], sizes = [2, 128], strides = [1, 1]} : vector<2x512xf32> to vector<2x128xf32>
    %468 = arith.negf %467 : vector<2x128xf32>
    %469 = math.exp %468 : vector<2x128xf32>
    %cst_139 = arith.constant 1.000000e+00 : f32
    %470 = vector.broadcast %cst_139 : f32 to vector<2x128xf32>
    %471 = arith.addf %470, %469 : vector<2x128xf32>
    %472 = arith.divf %470, %471 : vector<2x128xf32>
    %473 = vector.extract_strided_slice %466 {offsets = [0, 128], sizes = [2, 128], strides = [1, 1]} : vector<2x512xf32> to vector<2x128xf32>
    %474 = arith.negf %473 : vector<2x128xf32>
    %475 = math.exp %474 : vector<2x128xf32>
    %cst_140 = arith.constant 1.000000e+00 : f32
    %476 = vector.broadcast %cst_140 : f32 to vector<2x128xf32>
    %477 = arith.addf %476, %475 : vector<2x128xf32>
    %478 = arith.divf %476, %477 : vector<2x128xf32>
    %479 = vector.extract_strided_slice %466 {offsets = [0, 256], sizes = [2, 128], strides = [1, 1]} : vector<2x512xf32> to vector<2x128xf32>
    %480 = math.tanh %479 : vector<2x128xf32>
    %481 = vector.extract_strided_slice %466 {offsets = [0, 384], sizes = [2, 128], strides = [1, 1]} : vector<2x512xf32> to vector<2x128xf32>
    %482 = arith.negf %481 : vector<2x128xf32>
    %483 = math.exp %482 : vector<2x128xf32>
    %cst_141 = arith.constant 1.000000e+00 : f32
    %484 = vector.broadcast %cst_141 : f32 to vector<2x128xf32>
    %485 = arith.addf %484, %483 : vector<2x128xf32>
    %486 = arith.divf %484, %485 : vector<2x128xf32>
    %487 = arith.mulf %478, %426 : vector<2x128xf32>
    %488 = arith.mulf %472, %480 : vector<2x128xf32>
    %489 = arith.addf %487, %488 : vector<2x128xf32>
    %490 = math.tanh %489 : vector<2x128xf32>
    %491 = arith.mulf %486, %490 : vector<2x128xf32>
    %492 = arith.addf %461, %13 : vector<2x512xf32>
    %493 = arith.truncf %491 : vector<2x128xf32> to vector<2x128xbf16>
    %c0_142 = arith.constant 0 : index
    %c0_143 = arith.constant 0 : index
    %494 = vector.load %arg6[%c0_142, %c0_143] : memref<128x512xbf16, #tpu.memory_space<vmem>>, vector<128x512xbf16>
    %cst_144 = arith.constant dense<0.000000e+00> : vector<2x512xf32>
    %495 = tpu.matmul %493, %494, %cst_144 {dimension_numbers = #tpu.dot_dimension_numbers<[1], [0], [0], [1], [0, 0, 1, 1], [], []>} : vector<2x128xbf16>, vector<128x512xbf16>, vector<2x512xf32> -> vector<2x512xf32>
    %496 = arith.addf %492, %495 : vector<2x512xf32>
    %497 = vector.extract_strided_slice %496 {offsets = [0, 0], sizes = [2, 128], strides = [1, 1]} : vector<2x512xf32> to vector<2x128xf32>
    %498 = arith.negf %497 : vector<2x128xf32>
    %499 = math.exp %498 : vector<2x128xf32>
    %cst_145 = arith.constant 1.000000e+00 : f32
    %500 = vector.broadcast %cst_145 : f32 to vector<2x128xf32>
    %501 = arith.addf %500, %499 : vector<2x128xf32>
    %502 = arith.divf %500, %501 : vector<2x128xf32>
    %503 = vector.extract_strided_slice %496 {offsets = [0, 128], sizes = [2, 128], strides = [1, 1]} : vector<2x512xf32> to vector<2x128xf32>
    %504 = arith.negf %503 : vector<2x128xf32>
    %505 = math.exp %504 : vector<2x128xf32>
    %cst_146 = arith.constant 1.000000e+00 : f32
    %506 = vector.broadcast %cst_146 : f32 to vector<2x128xf32>
    %507 = arith.addf %506, %505 : vector<2x128xf32>
    %508 = arith.divf %506, %507 : vector<2x128xf32>
    %509 = vector.extract_strided_slice %496 {offsets = [0, 256], sizes = [2, 128], strides = [1, 1]} : vector<2x512xf32> to vector<2x128xf32>
    %510 = math.tanh %509 : vector<2x128xf32>
    %511 = vector.extract_strided_slice %496 {offsets = [0, 384], sizes = [2, 128], strides = [1, 1]} : vector<2x512xf32> to vector<2x128xf32>
    %512 = arith.negf %511 : vector<2x128xf32>
    %513 = math.exp %512 : vector<2x128xf32>
    %cst_147 = arith.constant 1.000000e+00 : f32
    %514 = vector.broadcast %cst_147 : f32 to vector<2x128xf32>
    %515 = arith.addf %514, %513 : vector<2x128xf32>
    %516 = arith.divf %514, %515 : vector<2x128xf32>
    %517 = arith.mulf %508, %456 : vector<2x128xf32>
    %518 = arith.mulf %502, %510 : vector<2x128xf32>
    %519 = arith.addf %517, %518 : vector<2x128xf32>
    %520 = math.tanh %519 : vector<2x128xf32>
    %521 = arith.mulf %516, %520 : vector<2x128xf32>
    %c0_148 = arith.constant 0 : index
    %c0_149 = arith.constant 0 : index
    %522 = vector.load %arg13[%c0_148, %c0_149] : memref<2x128xf32, #tpu.memory_space<vmem>>, vector<2x128xf32>
    tpu.vector_store %arg13[%c0_148, %c0_149], %491 {strides = array<i32>} : memref<2x128xf32, #tpu.memory_space<vmem>>, vector<2x128xf32>,
    %c0_150 = arith.constant 0 : index
    %c0_151 = arith.constant 0 : index
    %523 = vector.load %arg14[%c0_150, %c0_151] : memref<2x128xf32, #tpu.memory_space<vmem>>, vector<2x128xf32>
    tpu.vector_store %arg14[%c0_150, %c0_151], %489 {strides = array<i32>} : memref<2x128xf32, #tpu.memory_space<vmem>>, vector<2x128xf32>,
    %c0_152 = arith.constant 0 : index
    %c0_153 = arith.constant 0 : index
    %524 = vector.load %arg15[%c0_152, %c0_153] : memref<2x128xf32, #tpu.memory_space<vmem>>, vector<2x128xf32>
    tpu.vector_store %arg15[%c0_152, %c0_153], %521 {strides = array<i32>} : memref<2x128xf32, #tpu.memory_space<vmem>>, vector<2x128xf32>,
    %c0_154 = arith.constant 0 : index
    %c0_155 = arith.constant 0 : index
    %525 = vector.load %arg16[%c0_154, %c0_155] : memref<2x128xf32, #tpu.memory_space<vmem>>, vector<2x128xf32>
    tpu.vector_store %arg16[%c0_154, %c0_155], %519 {strides = array<i32>} : memref<2x128xf32, #tpu.memory_space<vmem>>, vector<2x128xf32>,
    %c1_i32 = arith.constant 1 : i32
    %526 = arith.cmpi eq, %arg1, %c1_i32 : i32
    %527 = arith.extui %526 : i1 to i32
    %c0_i32_156 = arith.constant 0 : i32
    %528 = arith.cmpi ne, %527, %c0_i32_156 : i32
    scf.if %528 {
      %529 = arith.truncf %521 : vector<2x128xf32> to vector<2x128xbf16>
      %c0_157 = arith.constant 0 : index
      %c0_158 = arith.constant 0 : index
      %530 = vector.load %arg9[%c0_157, %c0_158] : memref<128x1xbf16, #tpu.memory_space<vmem>>, vector<128x1xbf16>
      %cst_159 = arith.constant dense<0.000000e+00> : vector<2x1xf32>
      %531 = tpu.matmul %529, %530, %cst_159 {dimension_numbers = #tpu.dot_dimension_numbers<[1], [0], [0], [1], [0, 0, 1, 1], [], []>} : vector<2x128xbf16>, vector<128x1xbf16>, vector<2x1xf32> -> vector<2x1xf32>
      %c0_160 = arith.constant 0 : index
      %c0_161 = arith.constant 0 : index
      %532 = vector.load %arg10[%c0_160, %c0_161] : memref<1x1xf32, #tpu.memory_space<vmem>>, vector<1x1xf32>
      %533 = vector.broadcast %532 : vector<1x1xf32> to vector<2x1xf32>
      %534 = arith.addf %531, %533 : vector<2x1xf32>
      %c0_162 = arith.constant 0 : index
      %c0_163 = arith.constant 0 : index
      %535 = vector.load %arg11[%c0_162, %c0_163] : memref<2x1xf32, #tpu.memory_space<vmem>>, vector<2x1xf32>
      tpu.vector_store %arg11[%c0_162, %c0_163], %534 {strides = array<i32>} : memref<2x1xf32, #tpu.memory_space<vmem>>, vector<2x1xf32>,
    } else {
    }
    return
  }
  func.func @transform_0(%arg0: i32, %arg1: i32) -> (i32, i32, i32) {
    %c0_i32 = arith.constant 0 : i32
    %c0_i32_0 = arith.constant 0 : i32
    return %arg0, %arg1, %c0_i32 : i32, i32, i32
  }
  func.func @transform_1(%arg0: i32, %arg1: i32) -> (i32, i32) {
    %c0_i32 = arith.constant 0 : i32
    %c0_i32_0 = arith.constant 0 : i32
    %c0_i32_1 = arith.constant 0 : i32
    return %c0_i32, %c0_i32_0 : i32, i32
  }
  func.func @transform_2(%arg0: i32, %arg1: i32) -> (i32, i32) {
    %c0_i32 = arith.constant 0 : i32
    %c0_i32_0 = arith.constant 0 : i32
    %c0_i32_1 = arith.constant 0 : i32
    return %c0_i32, %c0_i32_0 : i32, i32
  }
  func.func @transform_3(%arg0: i32, %arg1: i32) -> (i32, i32) {
    %c0_i32 = arith.constant 0 : i32
    %c0_i32_0 = arith.constant 0 : i32
    %c0_i32_1 = arith.constant 0 : i32
    return %c0_i32, %c0_i32_0 : i32, i32
  }
  func.func @transform_4(%arg0: i32, %arg1: i32) -> (i32, i32) {
    %c0_i32 = arith.constant 0 : i32
    %c0_i32_0 = arith.constant 0 : i32
    %c0_i32_1 = arith.constant 0 : i32
    return %c0_i32, %c0_i32_0 : i32, i32
  }
  func.func @transform_5(%arg0: i32, %arg1: i32) -> (i32, i32) {
    %c0_i32 = arith.constant 0 : i32
    %c0_i32_0 = arith.constant 0 : i32
    %c0_i32_1 = arith.constant 0 : i32
    return %c0_i32, %c0_i32_0 : i32, i32
  }
  func.func @transform_6(%arg0: i32, %arg1: i32) -> (i32, i32) {
    %c0_i32 = arith.constant 0 : i32
    %c0_i32_0 = arith.constant 0 : i32
    %c0_i32_1 = arith.constant 0 : i32
    return %c0_i32, %c0_i32_0 : i32, i32
  }
  func.func @transform_7(%arg0: i32, %arg1: i32) -> (i32, i32) {
    %c0_i32 = arith.constant 0 : i32
    %c0_i32_0 = arith.constant 0 : i32
    %c0_i32_1 = arith.constant 0 : i32
    return %c0_i32, %c0_i32_0 : i32, i32
  }
  func.func @transform_8(%arg0: i32, %arg1: i32) -> (i32, i32) {
    %c0_i32 = arith.constant 0 : i32
    %c0_i32_0 = arith.constant 0 : i32
    %c0_i32_1 = arith.constant 0 : i32
    return %c0_i32, %c0_i32_0 : i32, i32
  }
  func.func @transform_9(%arg0: i32, %arg1: i32) -> (i32, i32) {
    %c0_i32 = arith.constant 0 : i32
    %c0_i32_0 = arith.constant 0 : i32
    return %arg0, %c0_i32 : i32, i32
  }
}

</mosaic_0001>

<bundles_post_ra>
// kernel: tpu_custom_call.1
= control target key start
LH: loop header
LB: loop body
LE: loop exit
PB: predicated region body
PF: predicated region fallthrough
CT: control target
= control target key end

     0   :  { %6 = vsyncpa [#allocation3], 0  ;;  %s124_s0 = inlined_call_operand.hbm [shape: f32[8,128], index: 0, kind: input, shape index: {}]   ;;  %s125_s1 = inlined_call_operand.hbm [shape: f32[8,128], index: 1, kind: output, shape index: {}]  }
   0x1   :  { %7 = vsyncpa [#allocation4], 0  ;;  %s88_s6 = smov [#allocation2]   ;;  %s40_s10 = scalar_lea.hbm %s124_s0, 128 }
   0x2   :  { %s14_s7 = sshll.u32 %s88_s6, 4  ;;  %p41_p0 = scmp.ne.s32.totalorder %s124_s0, %s40_s10  ;;  %s15_s7 = int_to_ptr.vmem [resolvable:$true] %s14_s7 }
   0x3   :  { %p44_p1 = scmp.lt.u32.totalorder %s40_s10, %s124_s0 }
   0x5   :  { %p46_p2 = pnand %p44_p1, %p41_p0 }
   0x7   :  { %49 = shalt.err (!%p46_p2)
}
   0x8   :  { %s50_s15 = scalar_lea.vmem %s15_s7, 128  ;;  %p55_p4 = scmp.lt.s32.totalorder %s15_s7, %s15_s7 }
   0x9   :  { %p51_p3 = scmp.ne.s32.totalorder %s15_s7, %s50_s15  ;;  %p56_p5 = scmp.lt.s32.totalorder %s50_s15, %s50_s15 }
   0xb   :  { %p57_p6 = por %p56_p5, %p55_p4 }
   0xd   :  { %p58_p7 = pnand %p57_p6, %p51_p3 }
   0xf   :  { %61 = shalt.err (!%p58_p7)
}
  0x10   :  { %17 = dma.hbm_to_vmem [thread:$0]  %s124_s0, 128, %s15_s7, [#allocation3]  }
  0x11   :  { %84 = dma.done.wait [#allocation3], 128  }
  0x12   :  { %85 = vsyncadd [#allocation3], 4294967168  ;;  %s89_s18 = smov [#allocation5]   ;;  %v21_v0 = vld [vmem:[#allocation2] sm:$0xff] }
  0x13   :  { %s29_s19 = sshll.u32 %s89_s18, 4  ;;  %22 = vst [vmem:[#allocation5] sm:$0xff] %v21_v0  ;;  %s30_s19 = int_to_ptr.vmem [resolvable:$true] %s29_s19 }
  0x14   :  { %s62_s20 = scalar_lea.vmem %s30_s19, 128  ;;  %p67_p9 = scmp.lt.s32.totalorder %s30_s19, %s30_s19 }
  0x15   :  { %p63_p8 = scmp.ne.s32.totalorder %s30_s19, %s62_s20  ;;  %p68_p10 = scmp.lt.s32.totalorder %s62_s20, %s62_s20 }
  0x17   :  { %p69_p11 = por %p68_p10, %p67_p9 }
  0x19   :  { %p70_p12 = pnand %p69_p11, %p63_p8 }
  0x1b   :  { %73 = shalt.err (!%p70_p12)
}
  0x1c   :  { %s74_s23 = scalar_lea.hbm %s125_s1, 128 }
  0x1d   :  { %p75_p13 = scmp.ne.s32.totalorder %s125_s1, %s74_s23  ;;  %p78_p0 = scmp.lt.u32.totalorder %s74_s23, %s125_s1 }
  0x1f   :  { %p80_p1 = pnand %p78_p0, %p75_p13 }
  0x21   :  { %83 = shalt.err (!%p80_p1)
}
  0x22   :  { %32 = dma.vmem_to_hbm [thread:$0]  %s30_s19, 128, %s125_s1, [#allocation4]  }
  0x23   :  { %86 = dma.done.wait [#allocation4], 128  }
  0x24   :  { %87 = vsyncadd [#allocation4], 4294967168 }
  0x25   :  { %36 = vsyncpa [#allocation3], 1 }
  0x26   :  { %37 = vsyncpa [#allocation4], 1 }

// kernel: simple_lstm_pallas.1
= control target key start
LH: loop header
LB: loop body
LE: loop exit
PB: predicated region body
PF: predicated region fallthrough
CT: control target
= control target key end

     0   :  { %s6811_s0 = inlined_call_operand.vmem [shape: bf16[1,32,4], index: 0, kind: input, shape index: {}]   ;;  %s6812_s1 = inlined_call_operand.vmem [shape: bf16[4,512], index: 1, kind: input, shape index: {}]   ;;  %s6813_s2 = inlined_call_operand.hbm [shape: bf16[128,512], index: 2, kind: input, shape index: {}]   ;;  %s6814_s3 = inlined_call_operand.vmem [shape: f32[1,512], index: 3, kind: input, shape index: {}]   ;;  %s6815_s4 = inlined_call_operand.hbm [shape: bf16[128,512], index: 4, kind: input, shape index: {}]   ;;  %s6816_s5 = inlined_call_operand.hbm [shape: bf16[128,512], index: 5, kind: input, shape index: {}]   ;;  %s6817_s6 = inlined_call_operand.vmem [shape: f32[1,512], index: 6, kind: input, shape index: {}]   ;;  %s6818_s7 = inlined_call_operand.vmem [shape: bf16[128,1], index: 7, kind: input, shape index: {}]   ;;  %s6819_s8 = inlined_call_operand.<no memory space> [shape: f32[1,1], index: 8, kind: input, shape index: {}]   ;;  %s6820_s9 = inlined_call_operand.vmem [shape: f32[2,1], index: 9, kind: output, shape index: {}]  }
   0x1   :  { %v14_v0 = vstv %s6819_s8 }
   0x2   :  { %15 = vst [vmem:[#allocation7] sm:$0x1] %v14_v0 }
   0x3   :  { %16 = vsyncpa [#allocation9], 0 }
   0x4   :  { %17 = vsyncpa [#allocation11], 0  ;;  %s5112_s11 = smov 0   ;;  %s5114_s12 = smov 0  }
   0x5   :  { %s5116_s13 = smov 0  }
   0x6 LB: > { %s3969_s8 = sadd.s32 4294967295, %s5047_s13   ;;  %p3970_p0 = scmp.ge.s32.totalorder %s5047_s13, 1  ;;  %s5047_s13 = sphi %s5116_s13, %s23_s13   ;;  %s5043_s12 = sphi %s5114_s12, %s7556_s12   ;;  %s5039_s11 = sphi %s5112_s11, %s7555_s11  }
   0x7   : > { %p262_p1 = scmp.lt.s32.totalorder %s5047_s13, 3  ;;  %p5130_p2 = scmp.eq.s32.totalorder %s3969_s8, 0 }
   0x8   : > { %s5049_s16 = smov [#allocation10]   ;;  %s32_s19 = sadd.s32 1, %s5043_s12 }
   0x9   : > { %s7142_s14 = scalar_select %p5130_p2, 1, 0 }
   0xa   : > { %p5134_p3 = pnand %p3970_p0, %p262_p1  ;;  %s293_s17 = sshll.u32 %s5049_s16, 4  ;;  %s5138_s17 = int_to_ptr.vmem [resolvable:$true] %s293_s17 }
   0xb   : > { %p5149_p6 = scmp.ge.s32.totalorder %s32_s19, 2  ;;  %s5050_s21 = smov [#allocation8]  }
   0xc   : > { %s7143_s15 = scalar_select %p5134_p3, 1, 0 }
   0xd   : > { %p4281_p4 = pneg %p5134_p3  ;;  %s277_s22 = sshll.u32 %s5050_s21, 4  ;;  %s278_s22 = int_to_ptr.vmem [resolvable:$true] %s277_s22 }
   0xe   : > { %s4933_s25 = scalar_lea.hbm %s6815_s4, 4096 }
   0xf   : > { %p5144_p5 = pnand %p5130_p2, %p4281_p4  ;;  %p4934_p7 = scmp.ne.s32.totalorder %s6815_s4, %s4933_s25 }
  0x10   : > { %p4940_p11 = scmp.lt.u32.totalorder %s4933_s25, %s6815_s4 }
  0x11   : > { %p5161_p8 = pneg %p5144_p5 }
  0x13   : > { %p4936_p9 = pnand %p5161_p8, %p4934_p7 }
  0x15   : > { %p4937_p10 = pneg %p4936_p9 }
  0x17   : > { %p4942_p12 = pnand %p4940_p11, %p4937_p10 }
  0x19   : > { %4945 = shalt.err (!%p4942_p12)
}
  0x1a   : > { %s4946_s10 = scalar_lea.vmem %s5138_s17, 4096  ;;  %p4954_p4 = scmp.lt.s32.totalorder %s5138_s17, %s5138_s17 }
  0x1b   : > { %p4947_p13 = scmp.ne.s32.totalorder %s5138_s17, %s4946_s10  ;;  %p4955_p2 = scmp.lt.s32.totalorder %s4946_s10, %s4946_s10 }
  0x1d   : > { %p4949_p0 = pnand %p4947_p13, %p5161_p8  ;;  %p4956_p7 = por %p4955_p2, %p4954_p4 }
  0x1f   : > { %p4950_p1 = pneg %p4949_p0 }
  0x21   : > { %p4957_p9 = pnand %p4956_p7, %p4950_p1 }
  0x23   : > { %4960 = shalt.err (!%p4957_p9)
}
  0x24   : > { %s5051_s8 = smov 256   ;;  %s5052_s16 = smov 16  }
  0x25   : > { %4287 = dma.hbm_to_vmem [thread:$0]  (!%p5144_p5), %s6815_s4, 4096, %s5138_s17, [#allocation11], %s5051_s8, %s5051_s8, %s5052_s16  }
  0x26   : > { %s7558_s19 = smov (%p5149_p6, %s32_s19), 0  ;;  %s4961_s26 = scalar_lea.hbm %s6813_s2, 4096 }
  0x27   : > { %p4962_p2 = scmp.ne.s32.totalorder %s6813_s2, %s4961_s26  ;;  %p4968_p12 = scmp.lt.u32.totalorder %s4961_s26, %s6813_s2 }
  0x29   : > { %p4964_p10 = pnand %p4962_p2, %p5161_p8 }
  0x2b   : > { %p4965_p11 = pneg %p4964_p10 }
  0x2d   : > { %p4970_p13 = pnand %p4968_p12, %p4965_p11 }
  0x2f   : > { %4973 = shalt.err (!%p4970_p13)
}
  0x30   : > { %s4974_s17 = scalar_lea.vmem %s278_s22, 4096  ;;  %p4982_p4 = scmp.lt.s32.totalorder %s278_s22, %s278_s22 }
  0x31   : > { %p4975_p6 = scmp.ne.s32.totalorder %s278_s22, %s4974_s17  ;;  %p4983_p7 = scmp.lt.s32.totalorder %s4974_s17, %s4974_s17 }
  0x33   : > { %p4977_p0 = pnand %p4975_p6, %p5161_p8  ;;  %p4984_p9 = por %p4983_p7, %p4982_p4 }
  0x35   : > { %p4978_p1 = pneg %p4977_p0 }
  0x37   : > { %p4985_p3 = pnand %p4984_p9, %p4978_p1 }
  0x39   : > { %4988 = shalt.err (!%p4985_p3)
}
  0x3a   : > { %4284 = dma.hbm_to_vmem [thread:$0]  (!%p5144_p5), %s6813_s2, 4096, %s278_s22, [#allocation9], %s5051_s8, %s5051_s8, %s5052_s16  }
  0x3b   : > { %s5053_s23 = smov [#allocation12]   ;;  %s4989_s27 = scalar_lea.hbm %s6816_s5, 4096 }
  0x3c   : > { %s306_s24 = sshll.u32 %s5053_s23, 4  ;;  %p4990_p3 = scmp.ne.s32.totalorder %s6816_s5, %s4989_s27  ;;  %s307_s24 = int_to_ptr.vmem [resolvable:$true] %s306_s24 }
  0x3d   : > { %p4996_p11 = scmp.lt.u32.totalorder %s4989_s27, %s6816_s5 }
  0x3e   : > { %p4992_p2 = pnand %p4990_p3, %p5161_p8 }
  0x40   : > { %p4993_p10 = pneg %p4992_p2 }
  0x42   : > { %p4998_p12 = pnand %p4996_p11, %p4993_p10 }
  0x44   : > { %5001 = shalt.err (!%p4998_p12)
}
  0x45   : > { %s5002_s22 = scalar_lea.vmem %s307_s24, 4096  ;;  %p5010_p1 = scmp.lt.s32.totalorder %s307_s24, %s307_s24 }
  0x46   : > { %p5003_p13 = scmp.ne.s32.totalorder %s307_s24, %s5002_s22  ;;  %p5011_p4 = scmp.lt.s32.totalorder %s5002_s22, %s5002_s22 }
  0x48   : > { %p5005_p6 = pnand %p5003_p13, %p5161_p8  ;;  %p5012_p7 = por %p5011_p4, %p5010_p1 }
  0x4a   : > { %p5006_p0 = pneg %p5005_p6 }
  0x4c   : > { %p5013_p9 = pnand %p5012_p7, %p5006_p0 }
  0x4e   : > { %5016 = shalt.err (!%p5013_p9)
}
  0x4f   : > { %4290 = dma.hbm_to_vmem [thread:$0]  (!%p5144_p5), %s6816_s5, 4096, %s307_s24, [#allocation11], %s5051_s8, %s5051_s8, %s5052_s16  }
  0x50   : > { %p7147_p3 = scmp.ne.s32.totalorder %s7143_s15, 0 }
  0x52   : > { %344 = sbr.rel (%p7147_p3) target bundleno = 2962 (0xb92), region = 56 }
  0x59   : > { %p7148_p8 = scmp.ne.s32.totalorder %s7142_s14, 0 }
  0x5b   : > { %5030 = dma.done.wait (%p7148_p8), [#allocation9], 4096  }
  0x5c   : > { %5032 = vsyncadd (%p7148_p8), [#allocation9], 4294963200 }
  0x5d   : > { %5034 = dma.done.wait (%p7148_p8), [#allocation11], 8192  }
  0x5e   : > { %5036 = vsyncadd (%p7148_p8), [#allocation11], 4294959104  ;;  %s3979_s18 = sshll.u32 %s5039_s11, 1  ;;  %p3981_p5 = scmp.ne.s32.totalorder %s5039_s11, 0 }
  0x5f   : > { %p394_p2 = scmp.lt.s32.totalorder %s3979_s18, 3  ;;  %v5054_v1 = vmov (!%p3981_p5), 0.0  }
  0x60   : > { %409 = sbr.rel (%p3981_p5) target bundleno = 103 (0x67), region = 72  ;;  %410 = vst [vmem:[#allocation3] sm:$0x3] (!%p3981_p5), %v5054_v1  ;;  %411 = vst [vmem:[#allocation4] sm:$0x3] (!%p3981_p5), %v5054_v1 }
  0x61   : > { %s7560_s18 = smov (!%p394_p2, %s3979_s18), 3  ;;  %412 = vst [vmem:[#allocation5] sm:$0x3] (!%p3981_p5), %v5054_v1  ;;  %413 = vst [vmem:[#allocation6] sm:$0x3] (!%p3981_p5), %v5054_v1 }
  0x62   : > { %s3980_s28 = sshll.u32 %s7560_s18, 2 }
  0x63   : > { %s399_s16 = scalar_lea.vmem %s6811_s0, %s3980_s28 }
  0x67 PF: > { %v416_v2 = vld [vmem:[%s6812_s1] sm:$0xff]  ;;  %v419_v3 = vlaneseq  ;;  %v5055_v4 = vmov 1983009808   ;;  %v6824_v6 = vmov 0   ;;  %vm466_vm0 = vcmask 1041408   ;;  %p4131_p10 = scmp.ne.s32.totalorder %s5039_s11, 1 }
  0x68   : > { %v447_v5 = vunpack.c.l.s4 %v5055_v4  ;;  %511 = vmatprep.mubr.bf16.mxu0 %v6824_v6  ;;  %554 = vmatprep.mubr.bf16.mxu1 %v6824_v6  ;;  %v445_v9 = vcombine.high %v416_v2, %v416_v2  ;;  %v5254_v17 = vld [vmem:[#allocation8 + $0x4] ss:$16 sps:$4 sm:$0xff]   ;;  %v5256_v18 = vld [vmem:[#allocation8 + $0xc] ss:$16 sps:$4 sm:$0xff]   ;;  %v5258_v20 = vld [vmem:[#allocation8] ss:$16 sps:$4 sm:$0xff]  }
  0x69   : > { %v5251_v7 = vshrl.u32 %v419_v3, 7  ;;  %v4332_v19 = vld [vmem:[%s399_s16] sm:$0xff]   ;;  %vm462_vm1 = vcmask 31744   ;;  %v5268_v24 = vld [vmem:[#allocation8 + $0x20] ss:$16 sps:$4 sm:$0xff]   ;;  %vm5058_vm2 = vmmov (!%p4131_p10), 0  }
  0x6a   : > { %v448_v8 = vunpack.c.0.s8 %v447_v5  ;;  %v5260_v21 = vld [vmem:[#allocation8 + $0x8] ss:$16 sps:$4 sm:$0xff]   ;;  %v5262_v22 = vld [vmem:[#allocation8 + $0x24] ss:$16 sps:$4 sm:$0xff]   ;;  %v5266_v23 = vld [vmem:[#allocation8 + $0x2c] ss:$16 sps:$4 sm:$0xff]  }
  0x6b   : > { %7149 = vst [vmem:[#allocation15_spill] sm:$0xff] %v5251_v7  ;;  %v5272_v25 = vld [vmem:[#allocation8 + $0x28] ss:$16 sps:$4 sm:$0xff]   ;;  %v5276_v26 = vld [vmem:[#allocation8 + $0x44] ss:$16 sps:$4 sm:$0xff]   ;;  %vm3871_vm3 = vcmask (!%p4131_p10), 1024  }
  0x6c   : > { %v451_v10 = vsub.s32 %v448_v8, %v5251_v7  ;;  %v5278_v27 = vld [vmem:[#allocation8 + $0x4c] ss:$16 sps:$4 sm:$0xff]   ;;  %v5282_v28 = vld [vmem:[#allocation8 + $0x40] ss:$16 sps:$4 sm:$0xff]   ;;  %v5286_v29 = vld [vmem:[#allocation8 + $0x48] ss:$16 sps:$4 sm:$0xff]  }
  0x6d   : > { %v5288_v30 = vld [vmem:[#allocation8 + $0x64] ss:$16 sps:$4 sm:$0xff]   ;;  %v5292_v31 = vld [vmem:[#allocation8 + $0x6c] ss:$16 sps:$4 sm:$0xff]   ;;  %v5294_v32 = vld [vmem:[#allocation8 + $0x60] ss:$16 sps:$4 sm:$0xff]  }
  0x6e   : > { %v452_v11 = vrot.slane %v416_v2, %v451_v10  ;;  %v459_v12 = vrot.slane %v445_v9, %v451_v10  ;;  %v5296_v33 = vld [vmem:[#allocation8 + $0x68] ss:$16 sps:$4 sm:$0xff]   ;;  %v5298_v34 = vld [vmem:[#allocation8 + $0x84] ss:$16 sps:$4 sm:$0xff]   ;;  %v5300_v35 = vld [vmem:[#allocation8 + $0x8c] ss:$16 sps:$4 sm:$0xff]  }
  0x6f   : > { %v5306_v36 = vld [vmem:[#allocation8 + $0x80] ss:$16 sps:$4 sm:$0xff]   ;;  %v5308_v37 = vld [vmem:[#allocation8 + $0x88] ss:$16 sps:$4 sm:$0xff]   ;;  %v5310_v38 = vld [vmem:[#allocation8 + $0xa4] ss:$16 sps:$4 sm:$0xff]  }
  0x70   : > { %v460_v13 = vcombine.high %v452_v11, %v452_v11  ;;  %v461_v14 = vcombine.high %v459_v12, %v459_v12  ;;  %v468_v15 = vsel %vm466_vm0, %v452_v11, 0  ;;  %v474_v16 = vsel %vm466_vm0, %v459_v12, 0  ;;  %v5312_v39 = vld [vmem:[#allocation8 + $0xac] ss:$16 sps:$4 sm:$0xff]   ;;  %v5318_v40 = vld [vmem:[#allocation8 + $0xa0] ss:$16 sps:$4 sm:$0xff]  }
  0x71   : > { %v5320_v41 = vld [vmem:[#allocation8 + $0xa8] ss:$16 sps:$4 sm:$0xff]   ;;  %v5322_v42 = vld [vmem:[#allocation8 + $0xc4] ss:$16 sps:$4 sm:$0xff]   ;;  %v5324_v43 = vld [vmem:[#allocation8 + $0xcc] ss:$16 sps:$4 sm:$0xff]  }
  0x72   : > { %3983 = vmatprep.subr.msk.bf16.mxu0 %vm466_vm0, %v460_v13  ;;  %3985 = vmatprep.subr.msk.bf16.mxu1 %vm466_vm0, %v461_v14  ;;  %v5330_v44 = vld [vmem:[#allocation8 + $0xc0] ss:$16 sps:$4 sm:$0xff]   ;;  %v5332_v45 = vld [vmem:[#allocation8 + $0xc8] ss:$16 sps:$4 sm:$0xff]   ;;  %v5334_v46 = vld [vmem:[#allocation8 + $0xe4] ss:$16 sps:$4 sm:$0xff]  }
  0x73   : > { %480 = vmatpush1.bf16.msra.mxu0 %v468_v15  ;;  %523 = vmatpush1.bf16.msra.mxu1 %v474_v16  ;;  %v5336_v47 = vld [vmem:[#allocation8 + $0xec] ss:$16 sps:$4 sm:$0xff]   ;;  %v5342_v48 = vld [vmem:[#allocation8 + $0xe0] ss:$16 sps:$4 sm:$0xff]   ;;  %v5344_v49 = vld [vmem:[#allocation8 + $0xe8] ss:$16 sps:$4 sm:$0xff]  }
  0x74   : > { %829 = vmatprep.subr.bf16.mxu0 %v5254_v17  ;;  %870 = vmatprep.subr.bf16.mxu1 %v5256_v18  ;;  %v595_v50 = vld [vmem:[#allocation3] sm:$0x3]  ;;  %v5356_v53 = vld [vmem:[#allocation12 + $0xc] ss:$16 sps:$4 sm:$0xff]   ;;  %v5358_v54 = vld [vmem:[#allocation12] ss:$16 sps:$4 sm:$0xff]  }
  0x75   : > { %v636_v51 = vpack.c.bf16 %v595_v50, %v595_v50  ;;  %v5354_v52 = vld [vmem:[#allocation12 + $0x4] ss:$16 sps:$4 sm:$0xff]   ;;  %v5360_v55 = vld [vmem:[#allocation12 + $0x8] ss:$16 sps:$4 sm:$0xff]   ;;  %v5365_v57 = vld [vmem:[#allocation12 + $0x2c] ss:$16 sps:$4 sm:$0xff]  }
  0x76   : > { %3984 = vmatmul.mubr.msk.bf16.vlgmr.msra.gmra.mrb[0].mxu0 %vm462_vm1, %v4332_v19  ;;  %3986 = vmatmul.mubr.msk.bf16.vlgmr.msra.gmra.mrb[0].mxu1 %vm462_vm1, %v4332_v19  ;;  %v5362_v56 = vld [vmem:[#allocation12 + $0x24] ss:$16 sps:$4 sm:$0xff]   ;;  %v5369_v58 = vld [vmem:[#allocation12 + $0x20] ss:$16 sps:$4 sm:$0xff]   ;;  %v5373_v59 = vld [vmem:[#allocation12 + $0x28] ss:$16 sps:$4 sm:$0xff]  }
  0x77   : > { %830 = vmatpush1.bf16.msra.mxu0 %v5258_v20  ;;  %871 = vmatpush1.bf16.msra.mxu1 %v5260_v21  ;;  %v5375_v60 = vld [vmem:[#allocation12 + $0x44] ss:$16 sps:$4 sm:$0xff]   ;;  %v5378_v61 = vld [vmem:[#allocation12 + $0x4c] ss:$16 sps:$4 sm:$0xff]   ;;  %v5381_v62 = vld [vmem:[#allocation12 + $0x40] ss:$16 sps:$4 sm:$0xff]  }
  0x78   : > { %831 = vmatprep.subr.bf16.mxu0 %v5262_v22  ;;  %872 = vmatprep.subr.bf16.mxu1 %v5266_v23  ;;  %v5385_v63 = vld [vmem:[#allocation12 + $0x48] ss:$16 sps:$4 sm:$0xff]   ;;  %v5387_v0 = vld [vmem:[#allocation12 + $0x64] ss:$16 sps:$4 sm:$0xff]   ;;  %v5390_v1 = vld [vmem:[#allocation12 + $0x6c] ss:$16 sps:$4 sm:$0xff]  }
  0x79   : > { %861 = vmatprep.mubr.bf16.mxu0 %v6824_v6  ;;  %902 = vmatprep.mubr.bf16.mxu1 %v6824_v6  ;;  %7150 = vst [vmem:[#allocation16_spill] sm:$0xff] %v5385_v63  ;;  %7151 = vst [vmem:[#allocation17_spill] sm:$0xff] %v5387_v0  ;;  %v5393_v2 = vld [vmem:[#allocation12 + $0x60] ss:$16 sps:$4 sm:$0xff]   ;;  %v5397_v3 = vld [vmem:[#allocation12 + $0x68] ss:$16 sps:$4 sm:$0xff]  }
  0x7a   : > { %7152 = vst [vmem:[#allocation18_spill] sm:$0xff] %v5390_v1  ;;  %7153 = vst [vmem:[#allocation19_spill] sm:$0xff] %v5393_v2  ;;  %v5402_v4 = vld [vmem:[#allocation12 + $0x84] ss:$16 sps:$4 sm:$0xff]   ;;  %v5404_v5 = vld [vmem:[#allocation12 + $0x8c] ss:$16 sps:$4 sm:$0xff]  }
  0x7b   : > { %832 = vmatpush1.bf16.msra.mxu0 %v5268_v24  ;;  %873 = vmatpush1.bf16.msra.mxu1 %v5272_v25  ;;  %7154 = vst [vmem:[#allocation20_spill] sm:$0xff] %v5397_v3  ;;  %7155 = vst [vmem:[#allocation21_spill] sm:$0xff] %v5402_v4  ;;  %v5408_v8 = vld [vmem:[#allocation12 + $0x80] ss:$16 sps:$4 sm:$0xff]   ;;  %v5410_v9 = vld [vmem:[#allocation12 + $0x88] ss:$16 sps:$4 sm:$0xff]  }
  0x7c   : > { %833 = vmatprep.subr.bf16.mxu0 %v5276_v26  ;;  %874 = vmatprep.subr.bf16.mxu1 %v5278_v27  ;;  %7156 = vst [vmem:[#allocation22_spill] sm:$0xff] %v5404_v5  ;;  %7157 = vst [vmem:[#allocation23_spill] sm:$0xff] %v5408_v8  ;;  %v5414_v10 = vld [vmem:[#allocation12 + $0xa4] ss:$16 sps:$4 sm:$0xff]   ;;  %v5416_v11 = vld [vmem:[#allocation12 + $0xac] ss:$16 sps:$4 sm:$0xff]  }
  0x7d   : > { %7158 = vst [vmem:[#allocation24_spill] sm:$0xff] %v5410_v9  ;;  %7159 = vst [vmem:[#allocation25_spill] sm:$0xff] %v5414_v10  ;;  %v5418_v12 = vld [vmem:[#allocation12 + $0xa0] ss:$16 sps:$4 sm:$0xff]   ;;  %v5420_v13 = vld [vmem:[#allocation12 + $0xa8] ss:$16 sps:$4 sm:$0xff]  }
  0x7e   : > { %7160 = vst [vmem:[#allocation26_spill] sm:$0xff] %v5416_v11  ;;  %7161 = vst [vmem:[#allocation27_spill] sm:$0xff] %v5418_v12  ;;  %v5426_v14 = vld [vmem:[#allocation12 + $0xc4] ss:$16 sps:$4 sm:$0xff]   ;;  %v5428_v15 = vld [vmem:[#allocation12 + $0xcc] ss:$16 sps:$4 sm:$0xff]  }
  0x7f   : > { %834 = vmatpush1.bf16.msra.mxu0 %v5282_v28  ;;  %875 = vmatpush1.bf16.msra.mxu1 %v5286_v29  ;;  %7162 = vst [vmem:[#allocation28_spill] sm:$0xff] %v5420_v13  ;;  %7163 = vst [vmem:[#allocation29_spill] sm:$0xff] %v5426_v14  ;;  %v5430_v16 = vld [vmem:[#allocation12 + $0xc0] ss:$16 sps:$4 sm:$0xff]   ;;  %v5432_v19 = vld [vmem:[#allocation12 + $0xc8] ss:$16 sps:$4 sm:$0xff]  }
  0x80   : > { %835 = vmatprep.subr.bf16.mxu0 %v5288_v30  ;;  %876 = vmatprep.subr.bf16.mxu1 %v5292_v31  ;;  %7164 = vst [vmem:[#allocation30_spill] sm:$0xff] %v5428_v15  ;;  %7165 = vst [vmem:[#allocation31_spill] sm:$0xff] %v5430_v16  ;;  %v5438_v50 = vld [vmem:[#allocation12 + $0xe4] ss:$16 sps:$4 sm:$0xff]  }
  0x81   : > { %7166 = vst [vmem:[#allocation32_spill] sm:$0xff] %v5432_v19  ;;  %7167 = vst [vmem:[#allocation33_spill] sm:$0xff] %v5438_v50 }
  0x83   : > { %836 = vmatpush1.bf16.msra.mxu0 %v5294_v32  ;;  %877 = vmatpush1.bf16.msra.mxu1 %v5296_v33 }
  0x84   : > { %837 = vmatprep.subr.bf16.mxu0 %v5298_v34  ;;  %878 = vmatprep.subr.bf16.mxu1 %v5300_v35 }
  0x87   : > { %838 = vmatpush1.bf16.msra.mxu0 %v5306_v36  ;;  %879 = vmatpush1.bf16.msra.mxu1 %v5308_v37 }
  0x88   : > { %839 = vmatprep.subr.bf16.mxu0 %v5310_v38  ;;  %880 = vmatprep.subr.bf16.mxu1 %v5312_v39 }
  0x8b   : > { %840 = vmatpush1.bf16.msra.mxu0 %v5318_v40  ;;  %881 = vmatpush1.bf16.msra.mxu1 %v5320_v41 }
  0x8c   : > { %841 = vmatprep.subr.bf16.mxu0 %v5322_v42  ;;  %882 = vmatprep.subr.bf16.mxu1 %v5324_v43 }
  0x8f   : > { %842 = vmatpush1.bf16.msra.mxu0 %v5330_v44  ;;  %883 = vmatpush1.bf16.msra.mxu1 %v5332_v45 }
  0x90   : > { %843 = vmatprep.subr.bf16.mxu0 %v5334_v46  ;;  %884 = vmatprep.subr.bf16.mxu1 %v5336_v47 }
  0x93   : > { %844 = vmatpush1.bf16.msra.mxu0 %v5342_v48  ;;  %885 = vmatpush1.bf16.msra.mxu1 %v5344_v49 }
  0x94   : > { %1099 = vmatprep.subr.bf16.mxu0 %v5354_v52  ;;  %1140 = vmatprep.subr.bf16.mxu1 %v5356_v53 }
  0x96   : > { %862 = vmatmul.mubr.bf16.vlgmr.msra.gmra.mrb[4].mxu0 %v636_v51  ;;  %903 = vmatmul.mubr.bf16.vlgmr.msra.gmra.mrb[4].mxu1 %v636_v51  ;;  %v5440_v51 = vld [vmem:[#allocation12 + $0xec] ss:$16 sps:$4 sm:$0xff]  }
  0x97   : > { %1131 = vmatprep.mubr.bf16.mxu0 %v6824_v6  ;;  %1172 = vmatprep.mubr.bf16.mxu1 %v6824_v6  ;;  %7168 = vst [vmem:[#allocation34_spill] sm:$0xff] %v5440_v51  ;;  %v5442_v6 = vld [vmem:[#allocation12 + $0xe0] ss:$16 sps:$4 sm:$0xff]  }
  0x98   : > { %1100 = vmatpush1.bf16.msra.mxu0 %v5358_v54  ;;  %1141 = vmatpush1.bf16.msra.mxu1 %v5360_v55  ;;  %7169 = vst [vmem:[#allocation35_spill] sm:$0xff] %v5442_v6 }
  0x99   : > { %1101 = vmatprep.subr.bf16.mxu0 %v5362_v56  ;;  %1142 = vmatprep.subr.bf16.mxu1 %v5365_v57 }
  0x9c   : > { %1102 = vmatpush1.bf16.msra.mxu0 %v5369_v58  ;;  %1143 = vmatpush1.bf16.msra.mxu1 %v5373_v59 }
  0x9d   : > { %1103 = vmatprep.subr.bf16.mxu0 %v5375_v60  ;;  %1144 = vmatprep.subr.bf16.mxu1 %v5378_v61 }
  0xa0   : > { %1104 = vmatpush1.bf16.msra.mxu0 %v5381_v62  ;;  %1145 = vmatpush1.bf16.msra.mxu1 %v5385_v63 }
  0xa1   : > { %1105 = vmatprep.subr.bf16.mxu0 %v5387_v0  ;;  %1146 = vmatprep.subr.bf16.mxu1 %v5390_v1 }
  0xa4   : > { %1106 = vmatpush1.bf16.msra.mxu0 %v5393_v2  ;;  %1147 = vmatpush1.bf16.msra.mxu1 %v5397_v3 }
  0xa5   : > { %1107 = vmatprep.subr.bf16.mxu0 %v5402_v4  ;;  %1148 = vmatprep.subr.bf16.mxu1 %v5404_v5 }
  0xa8   : > { %1108 = vmatpush1.bf16.msra.mxu0 %v5408_v8  ;;  %1149 = vmatpush1.bf16.msra.mxu1 %v5410_v9 }
  0xa9   : > { %1109 = vmatprep.subr.bf16.mxu0 %v5414_v10  ;;  %1150 = vmatprep.subr.bf16.mxu1 %v5416_v11  ;;  %v5456_v11 = vld [vmem:[#allocation10 + $0x8] ss:$16 sps:$4 sm:$0xff]   ;;  %v5524_v10 = vld [vmem:[#allocation10 + $0xcc] ss:$16 sps:$4 sm:$0xff]  }
  0xaa   : > { %7174 = vst [vmem:[#allocation40_spill] sm:$0xff] %v5456_v11  ;;  %7197 = vst [vmem:[#allocation62_spill] sm:$0xff] %v5524_v10 }
  0xac   : > { %1110 = vmatpush1.bf16.msra.mxu0 %v5418_v12  ;;  %1151 = vmatpush1.bf16.msra.mxu1 %v5420_v13  ;;  %v5444_v13 = vld [vmem:[#allocation12 + $0xe8] ss:$16 sps:$4 sm:$0xff]   ;;  %v5454_v12 = vld [vmem:[#allocation10] ss:$16 sps:$4 sm:$0xff]  }
  0xad   : > { %1111 = vmatprep.subr.bf16.mxu0 %v5426_v14  ;;  %1152 = vmatprep.subr.bf16.mxu1 %v5428_v15  ;;  %7170 = vst [vmem:[#allocation36_spill] sm:$0xff] %v5444_v13  ;;  %v5450_v15 = vld [vmem:[#allocation10 + $0x4] ss:$16 sps:$4 sm:$0xff]   ;;  %7173 = vst [vmem:[#allocation39_spill] sm:$0xff] %v5454_v12 }
  0xae   : > { %7171 = vst [vmem:[#allocation37_spill] sm:$0xff] %v5450_v15 }
  0xb0   : > { %1112 = vmatpush1.bf16.msra.mxu0 %v5430_v16  ;;  %1153 = vmatpush1.bf16.msra.mxu1 %v5432_v19  ;;  %v5452_v16 = vld [vmem:[#allocation10 + $0xc] ss:$16 sps:$4 sm:$0xff]  }
  0xb1   : > { %1113 = vmatprep.subr.bf16.mxu0 %v5438_v50  ;;  %1154 = vmatprep.subr.bf16.mxu1 %v5440_v51  ;;  %7172 = vst [vmem:[#allocation38_spill] sm:$0xff] %v5452_v16  ;;  %v597_v19 = vld [vmem:[#allocation5] sm:$0x3]  ;;  %v5466_v51 = vld [vmem:[#allocation10 + $0x20] ss:$16 sps:$4 sm:$0xff]   ;;  %v7179_v50 = vmov 0  }
  0xb2   : > { %v599_v14 = vpack.c.bf16 %v597_v19, %v597_v19  ;;  %7177 = vst [vmem:[#allocation43_spill] sm:$0xff] %v5466_v51  ;;  %v5468_v19 = vld [vmem:[#allocation10 + $0x28] ss:$16 sps:$4 sm:$0xff]  }
  0xb3   : > { %7178 = vst [vmem:[#allocation44_spill] sm:$0xff] %v5468_v19 }
  0xb4   : > { %1114 = vmatpush1.bf16.msra.mxu0 %v5442_v6  ;;  %1155 = vmatpush1.bf16.msra.mxu1 %v5444_v13  ;;  %v5462_v13 = vld [vmem:[#allocation10 + $0x24] ss:$16 sps:$4 sm:$0xff]   ;;  %v5464_v6 = vld [vmem:[#allocation10 + $0x2c] ss:$16 sps:$4 sm:$0xff]  }
  0xb5   : > { %1374 = vmatprep.subr.bf16.mxu0 %v5450_v15  ;;  %1415 = vmatprep.subr.bf16.mxu1 %v5452_v16  ;;  %7175 = vst [vmem:[#allocation41_spill] sm:$0xff] %v5462_v13  ;;  %7176 = vst [vmem:[#allocation42_spill] sm:$0xff] %v5464_v6  ;;  %v5482_v16 = vld [vmem:[#allocation10 + $0x48] ss:$16 sps:$4 sm:$0xff]   ;;  %v5508_v15 = vld [vmem:[#allocation10 + $0xa4] ss:$16 sps:$4 sm:$0xff]  }
  0xb6   : > { %7183 = vst [vmem:[#allocation48_spill] sm:$0xff] %v5482_v16  ;;  %7192 = vst [vmem:[#allocation57_spill] sm:$0xff] %v5508_v15 }
  0xb7   : > { %1132 = vmatmul.mubr.bf16.vlgmr.msra.gmra.mrb[8].mxu0 %v599_v14  ;;  %1173 = vmatmul.mubr.bf16.vlgmr.msra.gmra.mrb[8].mxu1 %v599_v14  ;;  %v5476_v14 = vld [vmem:[#allocation10 + $0x44] ss:$16 sps:$4 sm:$0xff]  }
  0xb8   : > { %1375 = vmatpush1.bf16.msra.mxu0 %v5454_v12  ;;  %1416 = vmatpush1.bf16.msra.mxu1 %v5456_v11  ;;  %7180 = vst [vmem:[#allocation45_spill] sm:$0xff] %v5476_v14  ;;  %v5478_v11 = vld [vmem:[#allocation10 + $0x4c] ss:$16 sps:$4 sm:$0xff]   ;;  %v5480_v12 = vld [vmem:[#allocation10 + $0x40] ss:$16 sps:$4 sm:$0xff]  }
  0xb9   : > { %1406 = vmatprep.mubr.bf16.mxu0 %v7179_v50  ;;  %1447 = vmatprep.mubr.bf16.mxu1 %v7179_v50  ;;  %7181 = vst [vmem:[#allocation46_spill] sm:$0xff] %v5478_v11  ;;  %7182 = vst [vmem:[#allocation47_spill] sm:$0xff] %v5480_v12 }
  0xba   : > { %1376 = vmatprep.subr.bf16.mxu0 %v5462_v13  ;;  %1417 = vmatprep.subr.bf16.mxu1 %v5464_v6  ;;  %v5488_v6 = vld [vmem:[#allocation10 + $0x64] ss:$16 sps:$4 sm:$0xff]   ;;  %v5494_v13 = vld [vmem:[#allocation10 + $0x68] ss:$16 sps:$4 sm:$0xff]  }
  0xbb   : > { %7184 = vst [vmem:[#allocation49_spill] sm:$0xff] %v5488_v6  ;;  %7187 = vst [vmem:[#allocation52_spill] sm:$0xff] %v5494_v13 }
  0xbc   : > { %1377 = vmatpush1.bf16.msra.mxu0 %v5466_v51  ;;  %1418 = vmatpush1.bf16.msra.mxu1 %v5468_v19  ;;  %v5490_v51 = vld [vmem:[#allocation10 + $0x6c] ss:$16 sps:$4 sm:$0xff]   ;;  %v5492_v19 = vld [vmem:[#allocation10 + $0x60] ss:$16 sps:$4 sm:$0xff]  }
  0xbd   : > { %1378 = vmatprep.subr.bf16.mxu0 %v5476_v14  ;;  %1419 = vmatprep.subr.bf16.mxu1 %v5478_v11  ;;  %7185 = vst [vmem:[#allocation50_spill] sm:$0xff] %v5490_v51  ;;  %7186 = vst [vmem:[#allocation51_spill] sm:$0xff] %v5492_v19  ;;  %v5500_v11 = vld [vmem:[#allocation10 + $0x84] ss:$16 sps:$4 sm:$0xff]   ;;  %v5506_v14 = vld [vmem:[#allocation10 + $0x88] ss:$16 sps:$4 sm:$0xff]  }
  0xbe   : > { %7188 = vst [vmem:[#allocation53_spill] sm:$0xff] %v5500_v11  ;;  %7191 = vst [vmem:[#allocation56_spill] sm:$0xff] %v5506_v14 }
  0xc0   : > { %1379 = vmatpush1.bf16.msra.mxu0 %v5480_v12  ;;  %1420 = vmatpush1.bf16.msra.mxu1 %v5482_v16  ;;  %v5502_v12 = vld [vmem:[#allocation10 + $0x8c] ss:$16 sps:$4 sm:$0xff]   ;;  %v5504_v16 = vld [vmem:[#allocation10 + $0x80] ss:$16 sps:$4 sm:$0xff]  }
  0xc1   : > { %1380 = vmatprep.subr.bf16.mxu0 %v5488_v6  ;;  %1421 = vmatprep.subr.bf16.mxu1 %v5490_v51  ;;  %7189 = vst [vmem:[#allocation54_spill] sm:$0xff] %v5502_v12  ;;  %7190 = vst [vmem:[#allocation55_spill] sm:$0xff] %v5504_v16  ;;  %v5512_v6 = vld [vmem:[#allocation10 + $0xac] ss:$16 sps:$4 sm:$0xff]   ;;  %v5522_v51 = vld [vmem:[#allocation10 + $0xc4] ss:$16 sps:$4 sm:$0xff]  }
  0xc2   : > { %7193 = vst [vmem:[#allocation58_spill] sm:$0xff] %v5512_v6  ;;  %7196 = vst [vmem:[#allocation61_spill] sm:$0xff] %v5522_v51 }
  0xc4   : > { %1381 = vmatpush1.bf16.msra.mxu0 %v5492_v19  ;;  %1422 = vmatpush1.bf16.msra.mxu1 %v5494_v13  ;;  %v5516_v13 = vld [vmem:[#allocation10 + $0xa0] ss:$16 sps:$4 sm:$0xff]   ;;  %v5518_v19 = vld [vmem:[#allocation10 + $0xa8] ss:$16 sps:$4 sm:$0xff]  }
  0xc5   : > { %1382 = vmatprep.subr.bf16.mxu0 %v5500_v11  ;;  %1423 = vmatprep.subr.bf16.mxu1 %v5502_v12  ;;  %7194 = vst [vmem:[#allocation59_spill] sm:$0xff] %v5516_v13  ;;  %7195 = vst [vmem:[#allocation60_spill] sm:$0xff] %v5518_v19  ;;  %v5528_v12 = vld [vmem:[#allocation10 + $0xc0] ss:$16 sps:$4 sm:$0xff]  }
  0xc6   : > { %7198 = vst [vmem:[#allocation63_spill] sm:$0xff] %v5528_v12 }
  0xc8   : > { %1383 = vmatpush1.bf16.msra.mxu0 %v5504_v16  ;;  %1424 = vmatpush1.bf16.msra.mxu1 %v5506_v14  ;;  %v5530_v16 = vld [vmem:[#allocation10 + $0xc8] ss:$16 sps:$4 sm:$0xff]   ;;  %v5534_v14 = vld [vmem:[#allocation10 + $0xe4] ss:$16 sps:$4 sm:$0xff]  }
  0xc9   : > { %1384 = vmatprep.subr.bf16.mxu0 %v5508_v15  ;;  %1425 = vmatprep.subr.bf16.mxu1 %v5512_v6  ;;  %7199 = vst [vmem:[#allocation64_spill] sm:$0xff] %v5530_v16  ;;  %7200 = vst [vmem:[#allocation65_spill] sm:$0xff] %v5534_v14  ;;  %v5536_v15 = vld [vmem:[#allocation10 + $0xec] ss:$16 sps:$4 sm:$0xff]   ;;  %v5540_v6 = vld [vmem:[#allocation10 + $0xe0] ss:$16 sps:$4 sm:$0xff]  }
  0xca   : > { %7201 = vst [vmem:[#allocation66_spill] sm:$0xff] %v5536_v15  ;;  %7202 = vst [vmem:[#allocation67_spill] sm:$0xff] %v5540_v6 }
  0xcc   : > { %1385 = vmatpush1.bf16.msra.mxu0 %v5516_v13  ;;  %1426 = vmatpush1.bf16.msra.mxu1 %v5518_v19  ;;  %v5542_v13 = vld [vmem:[#allocation10 + $0xe8] ss:$16 sps:$4 sm:$0xff]  }
  0xcd   : > { %1386 = vmatprep.subr.bf16.mxu0 %v5522_v51  ;;  %1427 = vmatprep.subr.bf16.mxu1 %v5524_v10  ;;  %7203 = vst [vmem:[#allocation68_spill] sm:$0xff] %v5542_v13  ;;  %v417_v10 = vld [vmem:[%s6814_s3] sm:$0xf] }
  0xd0   : > { %1387 = vmatpush1.bf16.msra.mxu0 %v5528_v12  ;;  %1428 = vmatpush1.bf16.msra.mxu1 %v5530_v16  ;;  %v6928_v12 = vsub.s32 0, %v5251_v7  ;;  %v6931_v16 = vsub.s32 2, %v5251_v7 }
  0xd1   : > { %1388 = vmatprep.subr.bf16.mxu0 %v5534_v14  ;;  %1429 = vmatprep.subr.bf16.mxu1 %v5536_v15  ;;  %v6934_v14 = vsub.s32 1, %v5251_v7  ;;  %v6935_v15 = vsub.s32 3, %v5251_v7 }
  0xd4   : > { %1389 = vmatpush1.bf16.msra.mxu0 %v5540_v6  ;;  %1430 = vmatpush1.bf16.msra.mxu1 %v5542_v13  ;;  %v422_v6 = vrot.slane %v417_v10, %v6928_v12  ;;  %v434_v13 = vrot.slane %v417_v10, %v6935_v15 }
  0xd5   : > { %1489 = vmatprep.subr.bf16.mxu0 %v5254_v17  ;;  %1530 = vmatprep.subr.bf16.mxu1 %v5256_v18  ;;  %v430_v17 = vrot.slane %v417_v10, %v6931_v16  ;;  %v426_v18 = vrot.slane %v417_v10, %v6934_v14 }
 0x149   : > { %v513_v51 = vpop.f32.mrb[0].mxu0  ;;  %v556_v19 = vpop.f32.mrb[0].mxu1 }
 0x14a   : > { %v514_v11 = vadd.f32 %v513_v51, %v422_v6  ;;  %v515_v9 = vpop.f32.mrb[1].mxu0  ;;  %v557_v8 = vadd.f32 %v556_v19, %v430_v17  ;;  %v558_v5 = vpop.f32.mrb[1].mxu1 }
 0x14b   : > { %v516_v4 = vadd.f32 %v515_v9, %v426_v18  ;;  %v517_v3 = vpop.f32.mrb[2].mxu0  ;;  %v559_v2 = vadd.f32 %v558_v5, %v434_v13  ;;  %v560_v1 = vpop.f32.mrb[2].mxu1 }
 0x14c   : > { %565 = vst [vmem:[#allocation2] sm:$0xff] %v514_v11  ;;  %v518_v12 = vadd.f32 %v517_v3, %v422_v6  ;;  %v519_v0 = vpop.f32.mrb[3].mxu0  ;;  %567 = vst [vmem:[#allocation2 + $0x10] sm:$0xff] %v557_v8  ;;  %v561_v16 = vadd.f32 %v560_v1, %v430_v17  ;;  %v562_v63 = vpop.f32.mrb[3].mxu1 }
 0x14d   : > { %566 = vst [vmem:[#allocation2 + $0x8] sm:$0xff] %v516_v4  ;;  %v520_v14 = vadd.f32 %v519_v0, %v426_v18  ;;  %568 = vst [vmem:[#allocation2 + $0x18] sm:$0xff] %v559_v2  ;;  %v563_v10 = vadd.f32 %v562_v63, %v434_v13 }
 0x14e   : > { %569 = vst [vmem:[#allocation2 + $0x20] sm:$0xff] %v518_v12  ;;  %571 = vst [vmem:[#allocation2 + $0x30] sm:$0xff] %v561_v16 }
 0x14f   : > { %570 = vst [vmem:[#allocation2 + $0x28] sm:$0xff] %v520_v14  ;;  %572 = vst [vmem:[#allocation2 + $0x38] sm:$0xff] %v563_v10 }
 0x153   : > { %v632_v51 = vld [vmem:[#allocation2] sm:$0x3]  ;;  %v634_v12 = vld [vmem:[#allocation2 + $0x10] sm:$0x3] }
 0x154   : > { %v633_v5 = vld [vmem:[#allocation2 + $0x8] sm:$0x3]  ;;  %v635_v63 = vld [vmem:[#allocation2 + $0x18] sm:$0x3] }
 0x169   : > { %v863_v19 = vpop.f32.mrb[4].mxu0  ;;  %v904_v9 = vpop.f32.mrb[4].mxu1 }
 0x16a   : > { %v911_v15 = vadd.f32 %v863_v19, %v632_v51  ;;  %v865_v7 = vpop.f32.mrb[5].mxu0  ;;  %v906_v11 = vpop.f32.mrb[5].mxu1  ;;  %v913_v16 = vadd.f32 %v904_v9, %v634_v12  ;;  %v596_v19 = vld [vmem:[#allocation4] sm:$0x3] }
 0x16b   : > { %v912_v6 = vadd.f32 %v865_v7, %v633_v5  ;;  %v867_v3 = vpop.f32.mrb[6].mxu0  ;;  %v908_v8 = vpop.f32.mrb[6].mxu1  ;;  %v914_v2 = vadd.f32 %v906_v11, %v635_v63  ;;  %v7227_v63 = vld [vmem:[#allocation15_spill] sm:$0xff] }
 0x16c   : > { %v4019_v1 = vmul.f32 -1.442695, %v911_v15  ;;  %v868_v17 = vpop.f32.mrb[7].mxu0  ;;  %v909_v4 = vpop.f32.mrb[7].mxu1 }
 0x16d   : > { %v4020_v0 = vmul.f32 -1.442695, %v912_v6  ;;  %v4021_v13 = vmul.f32 -1.442695, %v914_v2  ;;  %v7228_v2 = vsub.s32 0, %v7227_v63 }
 0x16e   : > { %4477 = vpow2.f32 %v4019_v1 }
 0x16f   : > { %4479 = vpow2.f32 %v4020_v0 }
 0x170   : > { %4481 = vpow2.f32 %v4021_v13  ;;  %v7230_v13 = vsub.s32 1, %v7227_v63 }
 0x171   : > { %4483 = vtanh.f32 %v913_v16 }
 0x178   : > { %v4478_v14 = vpop.eup %4477 }
 0x179   : > { %v4480_v18 = vpop.eup %4479  ;;  %v918_v10 = vadd.f32 1.0, %v4478_v14 }
 0x17a   : > { %v924_v51 = vadd.f32 1.0, %v4480_v18  ;;  %v4482_v7 = vpop.eup %4481 }
 0x17b   : > { %4485 = vrcp.f32 %v918_v10  ;;  %v4484_v15 = vpop.eup %4483  ;;  %v931_v8 = vadd.f32 1.0, %v4482_v7 }
 0x17c   : > { %4487 = vrcp.f32 %v924_v51 }
 0x17d   : > { %4489 = vrcp.f32 %v931_v8 }
 0x185   : > { %v4486_v5 = vpop.eup %4485 }
 0x186   : > { %v4488_v6 = vpop.eup %4487  ;;  %v935_v3 = vmul.f32 %v4486_v5, %v4484_v15 }
 0x187   : > { %v934_v1 = vmul.f32 %v4488_v6, %v596_v19  ;;  %v4490_v9 = vpop.eup %4489 }
 0x189   : > { %v5565_v11 = vadd.f32 %v935_v3, %v934_v1  ;;  %v7232_v1 = vsub.s32 3, %v7227_v63 }
 0x18b   : > { %4491 = vtanh.f32 %v5565_v11 }
 0x195   : > { %v4492_v17 = vpop.eup %4491 }
 0x196   : > { %v938_v4 = vmul.f32 %v4492_v17, %v4490_v9 }
 0x198   : > { %v1181_v0 = vpack.c.bf16 %v938_v4, %v938_v4 }
 0x19a   : > { %1407 = vmatmul.mubr.bf16.vlgmr.msra.gmra.mrb[8].mxu0 %v1181_v0  ;;  %1448 = vmatmul.mubr.bf16.vlgmr.msra.gmra.mrb[8].mxu1 %v1181_v0 }
 0x19b   : > { %1490 = vmatpush1.bf16.msra.mxu0 %v5258_v20  ;;  %1531 = vmatpush1.bf16.msra.mxu1 %v5260_v21  ;;  %v7204_v20 = vld [vmem:[#allocation16_spill] sm:$0xff]  ;;  %v7205_v21 = vld [vmem:[#allocation17_spill] sm:$0xff] }
 0x19c   : > { %1491 = vmatprep.subr.bf16.mxu0 %v5262_v22  ;;  %1532 = vmatprep.subr.bf16.mxu1 %v5266_v23  ;;  %v7206_v22 = vld [vmem:[#allocation18_spill] sm:$0xff]  ;;  %v7207_v23 = vld [vmem:[#allocation19_spill] sm:$0xff] }
 0x19d   : > { %1521 = vmatprep.mubr.bf16.mxu0 %v7179_v50  ;;  %1562 = vmatprep.mubr.bf16.mxu1 %v7179_v50 }
 0x19f   : > { %1492 = vmatpush1.bf16.msra.mxu0 %v5268_v24  ;;  %1533 = vmatpush1.bf16.msra.mxu1 %v5272_v25  ;;  %v7208_v24 = vld [vmem:[#allocation20_spill] sm:$0xff]  ;;  %v7209_v25 = vld [vmem:[#allocation21_spill] sm:$0xff] }
 0x1a0   : > { %1493 = vmatprep.subr.bf16.mxu0 %v5276_v26  ;;  %1534 = vmatprep.subr.bf16.mxu1 %v5278_v27  ;;  %v7210_v26 = vld [vmem:[#allocation22_spill] sm:$0xff]  ;;  %v7211_v27 = vld [vmem:[#allocation23_spill] sm:$0xff] }
 0x1a3   : > { %1494 = vmatpush1.bf16.msra.mxu0 %v5282_v28  ;;  %1535 = vmatpush1.bf16.msra.mxu1 %v5286_v29  ;;  %v7212_v28 = vld [vmem:[#allocation24_spill] sm:$0xff]  ;;  %v7213_v29 = vld [vmem:[#allocation25_spill] sm:$0xff] }
 0x1a4   : > { %1495 = vmatprep.subr.bf16.mxu0 %v5288_v30  ;;  %1536 = vmatprep.subr.bf16.mxu1 %v5292_v31  ;;  %v7214_v30 = vld [vmem:[#allocation26_spill] sm:$0xff]  ;;  %v7215_v31 = vld [vmem:[#allocation27_spill] sm:$0xff] }
 0x1a7   : > { %1496 = vmatpush1.bf16.msra.mxu0 %v5294_v32  ;;  %1537 = vmatpush1.bf16.msra.mxu1 %v5296_v33  ;;  %v7216_v32 = vld [vmem:[#allocation28_spill] sm:$0xff]  ;;  %v7217_v33 = vld [vmem:[#allocation29_spill] sm:$0xff] }
 0x1a8   : > { %1497 = vmatprep.subr.bf16.mxu0 %v5298_v34  ;;  %1538 = vmatprep.subr.bf16.mxu1 %v5300_v35  ;;  %v7218_v34 = vld [vmem:[#allocation30_spill] sm:$0xff]  ;;  %v7219_v35 = vld [vmem:[#allocation31_spill] sm:$0xff] }
 0x1ab   : > { %1498 = vmatpush1.bf16.msra.mxu0 %v5306_v36  ;;  %1539 = vmatpush1.bf16.msra.mxu1 %v5308_v37  ;;  %v7220_v36 = vld [vmem:[#allocation32_spill] sm:$0xff]  ;;  %v7221_v37 = vld [vmem:[#allocation33_spill] sm:$0xff] }
 0x1ac   : > { %1499 = vmatprep.subr.bf16.mxu0 %v5310_v38  ;;  %1540 = vmatprep.subr.bf16.mxu1 %v5312_v39  ;;  %v7222_v38 = vld [vmem:[#allocation34_spill] sm:$0xff]  ;;  %v7223_v39 = vld [vmem:[#allocation35_spill] sm:$0xff] }
 0x1af   : > { %1500 = vmatpush1.bf16.msra.mxu0 %v5318_v40  ;;  %1541 = vmatpush1.bf16.msra.mxu1 %v5320_v41  ;;  %v7224_v40 = vld [vmem:[#allocation36_spill] sm:$0xff]  ;;  %v7225_v41 = vld [vmem:[#allocation37_spill] sm:$0xff] }
 0x1b0   : > { %1501 = vmatprep.subr.bf16.mxu0 %v5322_v42  ;;  %1542 = vmatprep.subr.bf16.mxu1 %v5324_v43  ;;  %v7226_v42 = vld [vmem:[#allocation38_spill] sm:$0xff] }
 0x1b1   : > { %v573_v43 = vld [vmem:[%s6817_s6] sm:$0xf] }
 0x1b2   : > { %v5641_v12 = vrot.slane %v573_v43, %v7228_v2  ;;  %v5645_v16 = vrot.slane %v573_v43, %v7230_v13  ;;  %v5651_v9 = vrot.slane %v573_v43, %v7232_v1 }
 0x1b3   : > { %1502 = vmatpush1.bf16.msra.mxu0 %v5330_v44  ;;  %1543 = vmatpush1.bf16.msra.mxu1 %v5332_v45 }
 0x1b4   : > { %1503 = vmatprep.subr.bf16.mxu0 %v5334_v46  ;;  %1544 = vmatprep.subr.bf16.mxu1 %v5336_v47  ;;  %7229 = vst [vmem:[#allocation16_spill] sm:$0xff] %v5641_v12  ;;  %7231 = vst [vmem:[#allocation17_spill] sm:$0xff] %v5645_v16 }
 0x1b5   : > { %7233 = vst [vmem:[#allocation18_spill] sm:$0xff] %v5651_v9 }
 0x1b7   : > { %1504 = vmatpush1.bf16.msra.mxu0 %v5342_v48  ;;  %1545 = vmatpush1.bf16.msra.mxu1 %v5344_v49 }
 0x1b8   : > { %1614 = vmatprep.subr.bf16.mxu0 %v5354_v52  ;;  %1655 = vmatprep.subr.bf16.mxu1 %v5356_v53 }
 0x1ba   : > { %1522 = vmatmul.mubr.bf16.vlgmr.msra.gmra.mrb[12].mxu0 %v1181_v0  ;;  %1563 = vmatmul.mubr.bf16.vlgmr.msra.gmra.mrb[12].mxu1 %v1181_v0  ;;  %v7234_v0 = vsub.s32 2, %v7227_v63 }
 0x1bb   : > { %1615 = vmatpush1.bf16.msra.mxu0 %v5358_v54  ;;  %1656 = vmatpush1.bf16.msra.mxu1 %v5360_v55 }
 0x1bc   : > { %1616 = vmatprep.subr.bf16.mxu0 %v5362_v56  ;;  %1657 = vmatprep.subr.bf16.mxu1 %v5365_v57  ;;  %v5656_v2 = vrot.slane %v573_v43, %v7234_v0 }
 0x1bd   : > { %1646 = vmatprep.mubr.bf16.mxu0 %v7179_v50  ;;  %1687 = vmatprep.mubr.bf16.mxu1 %v7179_v50 }
 0x1be   : > { %7235 = vst [vmem:[#allocation19_spill] sm:$0xff] %v5656_v2 }
 0x1bf   : > { %1617 = vmatpush1.bf16.msra.mxu0 %v5369_v58  ;;  %1658 = vmatpush1.bf16.msra.mxu1 %v5373_v59 }
 0x1c0   : > { %1618 = vmatprep.subr.bf16.mxu0 %v5375_v60  ;;  %1659 = vmatprep.subr.bf16.mxu1 %v5378_v61 }
 0x1c3   : > { %1619 = vmatpush1.bf16.msra.mxu0 %v5381_v62  ;;  %1660 = vmatpush1.bf16.msra.mxu1 %v7204_v20 }
 0x1c4   : > { %1620 = vmatprep.subr.bf16.mxu0 %v7205_v21  ;;  %1661 = vmatprep.subr.bf16.mxu1 %v7206_v22 }
 0x1c7   : > { %1621 = vmatpush1.bf16.msra.mxu0 %v7207_v23  ;;  %1662 = vmatpush1.bf16.msra.mxu1 %v7208_v24 }
 0x1c8   : > { %1622 = vmatprep.subr.bf16.mxu0 %v7209_v25  ;;  %1663 = vmatprep.subr.bf16.mxu1 %v7210_v26 }
 0x1cb   : > { %1623 = vmatpush1.bf16.msra.mxu0 %v7211_v27  ;;  %1664 = vmatpush1.bf16.msra.mxu1 %v7212_v28 }
 0x1cc   : > { %1624 = vmatprep.subr.bf16.mxu0 %v7213_v29  ;;  %1665 = vmatprep.subr.bf16.mxu1 %v7214_v30 }
 0x1cf   : > { %1625 = vmatpush1.bf16.msra.mxu0 %v7215_v31  ;;  %1666 = vmatpush1.bf16.msra.mxu1 %v7216_v32 }
 0x1d0   : > { %1626 = vmatprep.subr.bf16.mxu0 %v7217_v33  ;;  %1667 = vmatprep.subr.bf16.mxu1 %v7218_v34 }
 0x1d3   : > { %1627 = vmatpush1.bf16.msra.mxu0 %v7219_v35  ;;  %1668 = vmatpush1.bf16.msra.mxu1 %v7220_v36 }
 0x1d4   : > { %1628 = vmatprep.subr.bf16.mxu0 %v7221_v37  ;;  %1669 = vmatprep.subr.bf16.mxu1 %v7222_v38 }
 0x1d7   : > { %1629 = vmatpush1.bf16.msra.mxu0 %v7223_v39  ;;  %1670 = vmatpush1.bf16.msra.mxu1 %v7224_v40 }
 0x1d8   : > { %1700 = vmatprep.subr.bf16.mxu0 %v7225_v41  ;;  %1741 = vmatprep.subr.bf16.mxu1 %v7226_v42 }
 0x26d   : > { %v1408_v14 = vpop.f32.mrb[8].mxu0  ;;  %v1449_v18 = vpop.f32.mrb[8].mxu1 }
 0x26e   : > { %v4173_v10 = vadd.f32 %v1408_v14, %v5641_v12  ;;  %v1410_v51 = vpop.f32.mrb[9].mxu0  ;;  %v1451_v7 = vpop.f32.mrb[9].mxu1  ;;  %v4175_v14 = vadd.f32 %v1449_v18, %v5656_v2 }
 0x26f   : > { %v4174_v15 = vadd.f32 %v1410_v51, %v5645_v16  ;;  %v1412_v19 = vpop.f32.mrb[10].mxu0  ;;  %v1453_v5 = vpop.f32.mrb[10].mxu1  ;;  %v4176_v4 = vadd.f32 %v1451_v7, %v5651_v9  ;;  %v1486_v9 = vld [vmem:[#allocation2 + $0x8] sm:$0xc] }
 0x270   : > { %v4086_v6 = vmul.f32 -1.442695, %v4173_v10  ;;  %v1413_v3 = vpop.f32.mrb[11].mxu0  ;;  %v1454_v8 = vpop.f32.mrb[11].mxu1 }
 0x271   : > { %v4087_v17 = vmul.f32 -1.442695, %v4174_v15  ;;  %v4088_v13 = vmul.f32 -1.442695, %v4176_v4  ;;  %v598_v3 = vld [vmem:[#allocation6] sm:$0x3] }
 0x272   : > { %4493 = vpow2.f32 %v4086_v6 }
 0x273   : > { %4495 = vpow2.f32 %v4087_v17 }
 0x274   : > { %4497 = vpow2.f32 %v4088_v13 }
 0x275   : > { %4499 = vtanh.f32 %v4175_v14  ;;  %v1485_v14 = vld [vmem:[#allocation2] sm:$0xc] }
 0x27c   : > { %v4494_v51 = vpop.eup %4493 }
 0x27d   : > { %v4496_v10 = vpop.eup %4495  ;;  %v1463_v19 = vadd.f32 1.0, %v4494_v51 }
 0x27e   : > { %v1469_v5 = vadd.f32 1.0, %v4496_v10  ;;  %v4498_v15 = vpop.eup %4497 }
 0x27f   : > { %4501 = vrcp.f32 %v1463_v19  ;;  %v4500_v6 = vpop.eup %4499  ;;  %v1476_v63 = vadd.f32 1.0, %v4498_v15 }
 0x280   : > { %4503 = vrcp.f32 %v1469_v5 }
 0x281   : > { %4505 = vrcp.f32 %v1476_v63 }
 0x289   : > { %v4502_v8 = vpop.eup %4501 }
 0x28a   : > { %v4504_v7 = vpop.eup %4503  ;;  %v1480_v1 = vmul.f32 %v4502_v8, %v4500_v6 }
 0x28b   : > { %v1479_v43 = vmul.f32 %v4504_v7, %v598_v3 }
 0x28d   : > { %v5659_v17 = vadd.f32 %v1480_v1, %v1479_v43  ;;  %v1523_v4 = vpop.f32.mrb[12].mxu0  ;;  %v1564_v18 = vpop.f32.mrb[12].mxu1  ;;  %v1488_v1 = vld [vmem:[#allocation2 + $0x18] sm:$0xc] }
 0x28e   : > { %v1575_v0 = vrot.slane %v1523_v4, 6  ;;  %v1525_v51 = vpop.f32.mrb[13].mxu0  ;;  %v1566_v13 = vpop.f32.mrb[13].mxu1  ;;  %v1577_v4 = vrot.slane %v1564_v18, 6  ;;  %v7240_v18 = vld [vmem:[#allocation42_spill] sm:$0xff] }
 0x28f   : > { %7236 = vst [vmem:[#allocation20_spill] sm:$0xff] %v5659_v17  ;;  %v1576_v10 = vrot.slane %v1525_v51, 6  ;;  %v1527_v19 = vpop.f32.mrb[14].mxu0  ;;  %v1568_v5 = vpop.f32.mrb[14].mxu1  ;;  %4507 = vtanh.f32 %v5659_v17  ;;  %v1578_v7 = vrot.slane %v1566_v13, 6  ;;  %v7238_v13 = vld [vmem:[#allocation40_spill] sm:$0xff] }
 0x290   : > { %v1583_v2 = vadd.f32 %v1575_v0, %v1485_v14  ;;  %v1528_v16 = vpop.f32.mrb[15].mxu0  ;;  %v1569_v6 = vpop.f32.mrb[15].mxu1  ;;  %v1487_v19 = vld [vmem:[#allocation2 + $0x10] sm:$0xc] }
 0x291   : > { %v1584_v15 = vadd.f32 %v1576_v10, %v1486_v9  ;;  %v1586_v63 = vadd.f32 %v1578_v7, %v1488_v1  ;;  %v4506_v43 = vpop.eup %4505  ;;  %v1585_v42 = vadd.f32 %v1577_v4, %v1487_v19  ;;  %v7239_v10 = vld [vmem:[#allocation41_spill] sm:$0xff]  ;;  %v7248_v7 = vld [vmem:[#allocation50_spill] sm:$0xff]  ;;  %v1607_v4 = vrot.slane %v5565_v11, 6  ;;  %v7250_v19 = vld [vmem:[#allocation52_spill] sm:$0xff] }
 0x292   : > { %v4089_v3 = vmul.f32 -1.442695, %v1583_v2  ;;  %v7237_v2 = vld [vmem:[#allocation39_spill] sm:$0xff]  ;;  %v7243_v6 = vld [vmem:[#allocation45_spill] sm:$0xff] }
 0x293   : > { %v4090_v8 = vmul.f32 -1.442695, %v1584_v15  ;;  %v4091_v5 = vmul.f32 -1.442695, %v1586_v63  ;;  %v7244_v15 = vld [vmem:[#allocation46_spill] sm:$0xff]  ;;  %v7255_v11 = vld [vmem:[#allocation57_spill] sm:$0xff] }
 0x294   : > { %4509 = vpow2.f32 %v4089_v3  ;;  %v7246_v3 = vld [vmem:[#allocation48_spill] sm:$0xff] }
 0x295   : > { %4511 = vpow2.f32 %v4090_v8  ;;  %v7247_v8 = vld [vmem:[#allocation49_spill] sm:$0xff] }
 0x296   : > { %4513 = vpow2.f32 %v4091_v5 }
 0x297   : > { %4515 = vtanh.f32 %v1585_v42  ;;  %v7245_v42 = vld [vmem:[#allocation47_spill] sm:$0xff] }
 0x299   : > { %v4508_v12 = vpop.eup %4507 }
 0x29a   : > { %v1483_v51 = vmul.f32 %v4508_v12, %v4506_v43  ;;  %v7241_v12 = vld [vmem:[#allocation43_spill] sm:$0xff] }
 0x29c   : > { %v1484_v17 = vpack.c.bf16 %v1483_v51, %v1483_v51  ;;  %v7249_v51 = vld [vmem:[#allocation51_spill] sm:$0xff] }
 0x29e   : > { %v4510_v0 = vpop.eup %4509  ;;  %1647 = vmatmul.mubr.bf16.vlgmr.msra.gmra.mrb[16].mxu0 %v1484_v17  ;;  %1688 = vmatmul.mubr.bf16.vlgmr.msra.gmra.mrb[16].mxu1 %v1484_v17  ;;  %v7242_v17 = vld [vmem:[#allocation44_spill] sm:$0xff] }
 0x29f   : > { %v4512_v16 = vpop.eup %4511  ;;  %v1590_v9 = vadd.f32 1.0, %v4510_v0  ;;  %1701 = vmatpush1.bf16.msra.mxu0 %v7237_v2  ;;  %1742 = vmatpush1.bf16.msra.mxu1 %v7238_v13 }
 0x2a0   : > { %v1596_v14 = vadd.f32 1.0, %v4512_v16  ;;  %1702 = vmatprep.subr.bf16.mxu0 %v7239_v10  ;;  %1743 = vmatprep.subr.bf16.mxu1 %v7240_v18  ;;  %v4514_v1 = vpop.eup %4513 }
 0x2a1   : > { %4517 = vrcp.f32 %v1590_v9  ;;  %1732 = vmatprep.mubr.bf16.mxu0 %v7179_v50  ;;  %1773 = vmatprep.mubr.bf16.mxu1 %v7179_v50  ;;  %v4516_v63 = vpop.eup %4515  ;;  %v1603_v16 = vadd.f32 1.0, %v4514_v1  ;;  %v7251_v9 = vld [vmem:[#allocation53_spill] sm:$0xff]  ;;  %v7258_v1 = vld [vmem:[#allocation60_spill] sm:$0xff] }
 0x2a2   : > { %4519 = vrcp.f32 %v1596_v14  ;;  %v7252_v14 = vld [vmem:[#allocation54_spill] sm:$0xff] }
 0x2a3   : > { %1703 = vmatpush1.bf16.msra.mxu0 %v7241_v12  ;;  %1744 = vmatpush1.bf16.msra.mxu1 %v7242_v17  ;;  %4521 = vrcp.f32 %v1603_v16  ;;  %v7264_v16 = vld [vmem:[#allocation66_spill] sm:$0xff] }
 0x2a4   : > { %1704 = vmatprep.subr.bf16.mxu0 %v7243_v6  ;;  %1745 = vmatprep.subr.bf16.mxu1 %v7244_v15 }
 0x2a7   : > { %1705 = vmatpush1.bf16.msra.mxu0 %v7245_v42  ;;  %1746 = vmatpush1.bf16.msra.mxu1 %v7246_v3  ;;  %v7254_v42 = vld [vmem:[#allocation56_spill] sm:$0xff] }
 0x2a8   : > { %1706 = vmatprep.subr.bf16.mxu0 %v7247_v8  ;;  %1747 = vmatprep.subr.bf16.mxu1 %v7248_v7  ;;  %v7253_v7 = vld [vmem:[#allocation55_spill] sm:$0xff] }
 0x2ab   : > { %v4518_v43 = vpop.eup %4517  ;;  %1707 = vmatpush1.bf16.msra.mxu0 %v7249_v51  ;;  %1748 = vmatpush1.bf16.msra.mxu1 %v7250_v19  ;;  %v7256_v51 = vld [vmem:[#allocation58_spill] sm:$0xff] }
 0x2ac   : > { %v4520_v5 = vpop.eup %4519  ;;  %v1610_v0 = vmul.f32 %v4518_v43, %v4516_v63  ;;  %1708 = vmatprep.subr.bf16.mxu0 %v7251_v9  ;;  %1749 = vmatprep.subr.bf16.mxu1 %v7252_v14  ;;  %v7257_v63 = vld [vmem:[#allocation59_spill] sm:$0xff]  ;;  %v7259_v43 = vld [vmem:[#allocation61_spill] sm:$0xff] }
 0x2ad   : > { %v1609_v3 = vmul.f32 %v4520_v5, %v1607_v4  ;;  %v7260_v4 = vld [vmem:[#allocation62_spill] sm:$0xff]  ;;  %v7262_v5 = vld [vmem:[#allocation64_spill] sm:$0xff] }
 0x2af   : > { %v5681_v8 = vadd.f32 %v1610_v0, %v1609_v3  ;;  %1709 = vmatpush1.bf16.msra.mxu0 %v7253_v7  ;;  %1750 = vmatpush1.bf16.msra.mxu1 %v7254_v42  ;;  %v7261_v3 = vld [vmem:[#allocation63_spill] sm:$0xff]  ;;  %v7263_v0 = vld [vmem:[#allocation65_spill] sm:$0xff]  ;;  %v7266_v7 = vld [vmem:[#allocation68_spill] sm:$0xff] }
 0x2b0   : > { %1710 = vmatprep.subr.bf16.mxu0 %v7255_v11  ;;  %1751 = vmatprep.subr.bf16.mxu1 %v7256_v51  ;;  %v4522_v11 = vpop.eup %4521  ;;  %v7265_v42 = vld [vmem:[#allocation67_spill] sm:$0xff] }
 0x2b1   : > { %4523 = vtanh.f32 %v5681_v8 }
 0x2b3   : > { %1711 = vmatpush1.bf16.msra.mxu0 %v7257_v63  ;;  %1752 = vmatpush1.bf16.msra.mxu1 %v7258_v1  ;;  %v5698_v63 = vld [vmem:[#allocation8 + $0x4] ss:$16 sps:$4 sm:$0xff]  }
 0x2b4   : > { %1712 = vmatprep.subr.bf16.mxu0 %v7259_v43  ;;  %1753 = vmatprep.subr.bf16.mxu1 %v7260_v4  ;;  %7267 = vst [vmem:[#allocation21_spill] sm:$0xff] %v5698_v63  ;;  %v5701_v43 = vld [vmem:[#allocation8 + $0xc] ss:$16 sps:$4 sm:$0xff]  }
 0x2b7   : > { %1713 = vmatpush1.bf16.msra.mxu0 %v7261_v3  ;;  %1754 = vmatpush1.bf16.msra.mxu1 %v7262_v5 }
 0x2b8   : > { %1714 = vmatprep.subr.bf16.mxu0 %v7263_v0  ;;  %1755 = vmatprep.subr.bf16.mxu1 %v7264_v16  ;;  %v5704_v16 = vld [vmem:[#allocation8] ss:$16 sps:$4 sm:$0xff]  }
 0x2bb   : > { %v4524_v51 = vpop.eup %4523  ;;  %1715 = vmatpush1.bf16.msra.mxu0 %v7265_v42  ;;  %1756 = vmatpush1.bf16.msra.mxu1 %v7266_v7  ;;  %v5707_v42 = vld [vmem:[#allocation8 + $0x8] ss:$16 sps:$4 sm:$0xff]   ;;  %v5710_v7 = vld [vmem:[#allocation8 + $0x24] ss:$16 sps:$4 sm:$0xff]  }
 0x2bc   : > { %1815 = vmatprep.subr.bf16.mxu0 %v5698_v63  ;;  %1856 = vmatprep.subr.bf16.mxu1 %v5701_v43  ;;  %v1613_v3 = vmul.f32 %v4524_v51, %v4522_v11  ;;  %7268 = vst [vmem:[#allocation22_spill] sm:$0xff] %v5710_v7  ;;  %v5713_v63 = vld [vmem:[#allocation8 + $0x2c] ss:$16 sps:$4 sm:$0xff]   ;;  %v5718_v51 = vld [vmem:[#allocation8 + $0x20] ss:$16 sps:$4 sm:$0xff]  }
 0x2bd   : > { %7269 = vst [vmem:[#allocation23_spill] sm:$0xff] %v5713_v63  ;;  %7270 = vst [vmem:[#allocation24_spill] sm:$0xff] %v5718_v51  ;;  %v5721_v11 = vld [vmem:[#allocation8 + $0x28] ss:$16 sps:$4 sm:$0xff]  }
 0x2be   : > { %v1696_v5 = vpack.c.bf16 %v1613_v3, %v1613_v3  ;;  %7271 = vst [vmem:[#allocation25_spill] sm:$0xff] %v5721_v11  ;;  %v5724_v3 = vld [vmem:[#allocation8 + $0x44] ss:$16 sps:$4 sm:$0xff]  }
 0x2bf   : > { %7272 = vst [vmem:[#allocation26_spill] sm:$0xff] %v5724_v3 }
 0x2c0   : > { %v1698_v4 = vrot.slane %v1696_v5, 1  ;;  %v5727_v5 = vld [vmem:[#allocation8 + $0x4c] ss:$16 sps:$4 sm:$0xff]  }
 0x2c1   : > { %7273 = vst [vmem:[#allocation27_spill] sm:$0xff] %v5727_v5 }
 0x2c2   : > { %1733 = vmatmul.mubr.bf16.vlgmr.msra.gmra.mrb[16].mxu0 %v1698_v4  ;;  %1774 = vmatmul.mubr.bf16.vlgmr.msra.gmra.mrb[16].mxu1 %v1698_v4 }
 0x2c3   : > { %1816 = vmatpush1.bf16.msra.mxu0 %v5704_v16  ;;  %1857 = vmatpush1.bf16.msra.mxu1 %v5707_v42 }
 0x2c4   : > { %1817 = vmatprep.subr.bf16.mxu0 %v5710_v7  ;;  %1858 = vmatprep.subr.bf16.mxu1 %v5713_v63  ;;  %v5730_v63 = vld [vmem:[#allocation8 + $0x40] ss:$16 sps:$4 sm:$0xff]   ;;  %v5733_v7 = vld [vmem:[#allocation8 + $0x48] ss:$16 sps:$4 sm:$0xff]  }
 0x2c5   : > { %1847 = vmatprep.mubr.bf16.mxu0 %v7179_v50  ;;  %1888 = vmatprep.mubr.bf16.mxu1 %v7179_v50  ;;  %7274 = vst [vmem:[#allocation28_spill] sm:$0xff] %v5730_v63  ;;  %7275 = vst [vmem:[#allocation29_spill] sm:$0xff] %v5733_v7 }
 0x2c7   : > { %1818 = vmatpush1.bf16.msra.mxu0 %v5718_v51  ;;  %1859 = vmatpush1.bf16.msra.mxu1 %v5721_v11  ;;  %v5736_v51 = vld [vmem:[#allocation8 + $0x64] ss:$16 sps:$4 sm:$0xff]   ;;  %v5739_v11 = vld [vmem:[#allocation8 + $0x6c] ss:$16 sps:$4 sm:$0xff]  }
 0x2c8   : > { %1819 = vmatprep.subr.bf16.mxu0 %v5724_v3  ;;  %1860 = vmatprep.subr.bf16.mxu1 %v5727_v5  ;;  %7276 = vst [vmem:[#allocation30_spill] sm:$0xff] %v5736_v51  ;;  %7277 = vst [vmem:[#allocation31_spill] sm:$0xff] %v5739_v11  ;;  %v5742_v3 = vld [vmem:[#allocation8 + $0x60] ss:$16 sps:$4 sm:$0xff]   ;;  %v5745_v5 = vld [vmem:[#allocation8 + $0x68] ss:$16 sps:$4 sm:$0xff]  }
 0x2c9   : > { %7278 = vst [vmem:[#allocation32_spill] sm:$0xff] %v5742_v3  ;;  %7279 = vst [vmem:[#allocation33_spill] sm:$0xff] %v5745_v5 }
 0x2cb   : > { %1820 = vmatpush1.bf16.msra.mxu0 %v5730_v63  ;;  %1861 = vmatpush1.bf16.msra.mxu1 %v5733_v7  ;;  %v5748_v63 = vld [vmem:[#allocation8 + $0x84] ss:$16 sps:$4 sm:$0xff]   ;;  %v5751_v7 = vld [vmem:[#allocation8 + $0x8c] ss:$16 sps:$4 sm:$0xff]  }
 0x2cc   : > { %1821 = vmatprep.subr.bf16.mxu0 %v5736_v51  ;;  %1862 = vmatprep.subr.bf16.mxu1 %v5739_v11  ;;  %7280 = vst [vmem:[#allocation34_spill] sm:$0xff] %v5748_v63  ;;  %7281 = vst [vmem:[#allocation35_spill] sm:$0xff] %v5751_v7  ;;  %v5754_v51 = vld [vmem:[#allocation8 + $0x80] ss:$16 sps:$4 sm:$0xff]   ;;  %v5757_v11 = vld [vmem:[#allocation8 + $0x88] ss:$16 sps:$4 sm:$0xff]  }
 0x2cd   : > { %7282 = vst [vmem:[#allocation36_spill] sm:$0xff] %v5754_v51  ;;  %7283 = vst [vmem:[#allocation37_spill] sm:$0xff] %v5757_v11 }
 0x2cf   : > { %1822 = vmatpush1.bf16.msra.mxu0 %v5742_v3  ;;  %1863 = vmatpush1.bf16.msra.mxu1 %v5745_v5  ;;  %v5760_v3 = vld [vmem:[#allocation8 + $0xa4] ss:$16 sps:$4 sm:$0xff]   ;;  %v5763_v5 = vld [vmem:[#allocation8 + $0xac] ss:$16 sps:$4 sm:$0xff]  }
 0x2d0   : > { %1823 = vmatprep.subr.bf16.mxu0 %v5748_v63  ;;  %1864 = vmatprep.subr.bf16.mxu1 %v5751_v7  ;;  %v5766_v63 = vld [vmem:[#allocation8 + $0xa0] ss:$16 sps:$4 sm:$0xff]   ;;  %v5769_v7 = vld [vmem:[#allocation8 + $0xa8] ss:$16 sps:$4 sm:$0xff]  }
 0x2d3   : > { %1824 = vmatpush1.bf16.msra.mxu0 %v5754_v51  ;;  %1865 = vmatpush1.bf16.msra.mxu1 %v5757_v11  ;;  %v5772_v51 = vld [vmem:[#allocation8 + $0xc4] ss:$16 sps:$4 sm:$0xff]   ;;  %v5775_v11 = vld [vmem:[#allocation8 + $0xcc] ss:$16 sps:$4 sm:$0xff]  }
 0x2d4   : > { %1825 = vmatprep.subr.bf16.mxu0 %v5760_v3  ;;  %1866 = vmatprep.subr.bf16.mxu1 %v5763_v5 }
 0x2d7   : > { %1826 = vmatpush1.bf16.msra.mxu0 %v5766_v63  ;;  %1867 = vmatpush1.bf16.msra.mxu1 %v5769_v7 }
 0x2d8   : > { %1827 = vmatprep.subr.bf16.mxu0 %v5772_v51  ;;  %1868 = vmatprep.subr.bf16.mxu1 %v5775_v11 }
 0x2db   : > { %1828 = vmatpush1.bf16.msra.mxu0 %v5330_v44  ;;  %1869 = vmatpush1.bf16.msra.mxu1 %v5332_v45  ;;  %v7284_v44 = vld [vmem:[#allocation38_spill] sm:$0xff] }
 0x2dc   : > { %1829 = vmatprep.subr.bf16.mxu0 %v5334_v46  ;;  %1870 = vmatprep.subr.bf16.mxu1 %v5336_v47  ;;  %v7285_v47 = vld [vmem:[#allocation16_spill] sm:$0xff] }
 0x2df   : > { %1830 = vmatpush1.bf16.msra.mxu0 %v5342_v48  ;;  %1871 = vmatpush1.bf16.msra.mxu1 %v5344_v49 }
 0x2e0   : > { %1940 = vmatprep.subr.bf16.mxu0 %v5354_v52  ;;  %1981 = vmatprep.subr.bf16.mxu1 %v5356_v53  ;;  %v7286_v53 = vld [vmem:[#allocation17_spill] sm:$0xff] }
 0x2e2   : > { %1848 = vmatmul.mubr.bf16.vlgmr.msra.gmra.mrb[20].mxu0 %v1698_v4  ;;  %1889 = vmatmul.mubr.bf16.vlgmr.msra.gmra.mrb[20].mxu1 %v1698_v4 }
 0x2e3   : > { %1941 = vmatpush1.bf16.msra.mxu0 %v5358_v54  ;;  %1982 = vmatpush1.bf16.msra.mxu1 %v5360_v55 }
 0x2e4   : > { %1942 = vmatprep.subr.bf16.mxu0 %v5362_v56  ;;  %1983 = vmatprep.subr.bf16.mxu1 %v5365_v57 }
 0x2e5   : > { %1972 = vmatprep.mubr.bf16.mxu0 %v7179_v50  ;;  %2013 = vmatprep.mubr.bf16.mxu1 %v7179_v50 }
 0x2e7   : > { %1943 = vmatpush1.bf16.msra.mxu0 %v5369_v58  ;;  %1984 = vmatpush1.bf16.msra.mxu1 %v5373_v59 }
 0x2e8   : > { %1944 = vmatprep.subr.bf16.mxu0 %v5375_v60  ;;  %1985 = vmatprep.subr.bf16.mxu1 %v5378_v61  ;;  %v7287_v61 = vld [vmem:[#allocation18_spill] sm:$0xff] }
 0x2eb   : > { %1945 = vmatpush1.bf16.msra.mxu0 %v5381_v62  ;;  %1986 = vmatpush1.bf16.msra.mxu1 %v7204_v20 }
 0x2ec   : > { %1946 = vmatprep.subr.bf16.mxu0 %v7205_v21  ;;  %1987 = vmatprep.subr.bf16.mxu1 %v7206_v22  ;;  %v7288_v21 = vld [vmem:[#allocation19_spill] sm:$0xff] }
 0x2ef   : > { %1947 = vmatpush1.bf16.msra.mxu0 %v7207_v23  ;;  %1988 = vmatpush1.bf16.msra.mxu1 %v7208_v24 }
 0x2f0   : > { %1948 = vmatprep.subr.bf16.mxu0 %v7209_v25  ;;  %1989 = vmatprep.subr.bf16.mxu1 %v7210_v26 }
 0x2f3   : > { %1949 = vmatpush1.bf16.msra.mxu0 %v7211_v27  ;;  %1990 = vmatpush1.bf16.msra.mxu1 %v7212_v28 }
 0x2f4   : > { %1950 = vmatprep.subr.bf16.mxu0 %v7213_v29  ;;  %1991 = vmatprep.subr.bf16.mxu1 %v7214_v30 }
 0x2f7   : > { %1951 = vmatpush1.bf16.msra.mxu0 %v7215_v31  ;;  %1992 = vmatpush1.bf16.msra.mxu1 %v7216_v32 }
 0x2f8   : > { %1952 = vmatprep.subr.bf16.mxu0 %v7217_v33  ;;  %1993 = vmatprep.subr.bf16.mxu1 %v7218_v34  ;;  %v7289_v33 = vld [vmem:[#allocation20_spill] sm:$0xff] }
 0x2fb   : > { %1953 = vmatpush1.bf16.msra.mxu0 %v7219_v35  ;;  %1994 = vmatpush1.bf16.msra.mxu1 %v7220_v36 }
 0x2fc   : > { %1954 = vmatprep.subr.bf16.mxu0 %v7221_v37  ;;  %1995 = vmatprep.subr.bf16.mxu1 %v7222_v38 }
 0x2ff   : > { %1955 = vmatpush1.bf16.msra.mxu0 %v7223_v39  ;;  %1996 = vmatpush1.bf16.msra.mxu1 %v7224_v40 }
 0x300   : > { %2026 = vmatprep.subr.bf16.mxu0 %v7225_v41  ;;  %2067 = vmatprep.subr.bf16.mxu1 %v7284_v44  ;;  %v1811_v41 = vld [vmem:[#allocation2] sm:$0x30] }
 0x395   : > { %v1734_v45 = vpop.f32.mrb[16].mxu0  ;;  %v1775_v46 = vpop.f32.mrb[16].mxu1 }
 0x396   : > { %v4177_v48 = vadd.f32 %v1734_v45, %v7285_v47  ;;  %v1736_v49 = vpop.f32.mrb[17].mxu0  ;;  %v1777_v52 = vpop.f32.mrb[17].mxu1  ;;  %v4179_v22 = vadd.f32 %v1775_v46, %v7288_v21 }
 0x397   : > { %v4178_v54 = vadd.f32 %v1736_v49, %v7286_v53  ;;  %v1738_v55 = vpop.f32.mrb[18].mxu0  ;;  %v1779_v56 = vpop.f32.mrb[18].mxu1  ;;  %v4180_v62 = vadd.f32 %v1777_v52, %v7287_v61 }
 0x398   : > { %v4092_v57 = vmul.f32 -1.442695, %v4177_v48  ;;  %v1739_v58 = vpop.f32.mrb[19].mxu0  ;;  %v1780_v59 = vpop.f32.mrb[19].mxu1  ;;  %v1812_v48 = vld [vmem:[#allocation2 + $0x8] sm:$0x30] }
 0x399   : > { %v4093_v60 = vmul.f32 -1.442695, %v4178_v54  ;;  %v4094_v20 = vmul.f32 -1.442695, %v4180_v62  ;;  %v1814_v58 = vld [vmem:[#allocation2 + $0x18] sm:$0x30] }
 0x39a   : > { %4525 = vpow2.f32 %v4092_v57 }
 0x39b   : > { %4527 = vpow2.f32 %v4093_v60 }
 0x39c   : > { %4529 = vpow2.f32 %v4094_v20 }
 0x39d   : > { %4531 = vtanh.f32 %v4179_v22 }
 0x3a4   : > { %v4526_v23 = vpop.eup %4525 }
 0x3a5   : > { %v4528_v24 = vpop.eup %4527  ;;  %v1789_v25 = vadd.f32 1.0, %v4526_v23  ;;  %v1813_v23 = vld [vmem:[#allocation2 + $0x10] sm:$0x30] }
 0x3a6   : > { %v1795_v26 = vadd.f32 1.0, %v4528_v24  ;;  %v4530_v27 = vpop.eup %4529 }
 0x3a7   : > { %4533 = vrcp.f32 %v1789_v25  ;;  %v4532_v28 = vpop.eup %4531  ;;  %v1802_v32 = vadd.f32 1.0, %v4530_v27 }
 0x3a8   : > { %4535 = vrcp.f32 %v1795_v26 }
 0x3a9   : > { %4537 = vrcp.f32 %v1802_v32 }
 0x3b1   : > { %v4534_v29 = vpop.eup %4533 }
 0x3b2   : > { %v4536_v30 = vpop.eup %4535  ;;  %v1806_v31 = vmul.f32 %v4534_v29, %v4532_v28 }
 0x3b3   : > { %v1805_v34 = vmul.f32 %v4536_v30, %v7289_v33  ;;  %v4538_v60 = vpop.eup %4537 }
 0x3b5   : > { %v5825_v35 = vadd.f32 %v1806_v31, %v1805_v34  ;;  %v1849_v36 = vpop.f32.mrb[20].mxu0  ;;  %v1890_v37 = vpop.f32.mrb[20].mxu1  ;;  %v1933_v34 = vrot.slane %v5681_v8, 6  ;;  %v7297_v8 = vld [vmem:[#allocation57_spill] sm:$0xff] }
 0x3b6   : > { %v1901_v38 = vrot.slane %v1849_v36, 4  ;;  %v1851_v39 = vpop.f32.mrb[21].mxu0  ;;  %v1892_v40 = vpop.f32.mrb[21].mxu1  ;;  %v1903_v62 = vrot.slane %v1890_v37, 4 }
 0x3b7   : > { %v1902_v4 = vrot.slane %v1851_v39, 4  ;;  %v1853_v44 = vpop.f32.mrb[22].mxu0  ;;  %v1894_v45 = vpop.f32.mrb[22].mxu1  ;;  %4539 = vtanh.f32 %v5825_v35  ;;  %v1904_v57 = vrot.slane %v1892_v40, 4  ;;  %v7296_v39 = vld [vmem:[#allocation56_spill] sm:$0xff]  ;;  %v7298_v40 = vld [vmem:[#allocation58_spill] sm:$0xff] }
 0x3b8   : > { %v1909_v46 = vadd.f32 %v1901_v38, %v1811_v41  ;;  %v1854_v49 = vpop.f32.mrb[23].mxu0  ;;  %v1895_v52 = vpop.f32.mrb[23].mxu1  ;;  %v1911_v25 = vadd.f32 %v1903_v62, %v1813_v23  ;;  %v7295_v38 = vld [vmem:[#allocation55_spill] sm:$0xff]  ;;  %v7304_v44 = vld [vmem:[#allocation66_spill] sm:$0xff]  ;;  %v7314_v62 = vld [vmem:[#allocation28_spill] sm:$0xff] }
 0x3b9   : > { %v1910_v54 = vadd.f32 %v1902_v4, %v1812_v48  ;;  %v1912_v59 = vadd.f32 %v1904_v57, %v1814_v58  ;;  %v7302_v41 = vld [vmem:[#allocation63_spill] sm:$0xff]  ;;  %v7303_v4 = vld [vmem:[#allocation64_spill] sm:$0xff]  ;;  %v7307_v52 = vld [vmem:[#allocation21_spill] sm:$0xff] }
 0x3ba   : > { %v4095_v55 = vmul.f32 -1.442695, %v1909_v46  ;;  %v7305_v48 = vld [vmem:[#allocation67_spill] sm:$0xff]  ;;  %v7306_v49 = vld [vmem:[#allocation68_spill] sm:$0xff]  ;;  %v7311_v58 = vld [vmem:[#allocation25_spill] sm:$0xff] }
 0x3bb   : > { %v4096_v56 = vmul.f32 -1.442695, %v1910_v54  ;;  %v4097_v24 = vmul.f32 -1.442695, %v1912_v59  ;;  %v7310_v57 = vld [vmem:[#allocation24_spill] sm:$0xff]  ;;  %v7312_v59 = vld [vmem:[#allocation26_spill] sm:$0xff] }
 0x3bc   : > { %4541 = vpow2.f32 %v4095_v55  ;;  %v7317_v23 = vld [vmem:[#allocation31_spill] sm:$0xff] }
 0x3bd   : > { %4543 = vpow2.f32 %v4096_v56  ;;  %v7309_v56 = vld [vmem:[#allocation23_spill] sm:$0xff] }
 0x3be   : > { %4545 = vpow2.f32 %v4097_v24  ;;  %v7318_v24 = vld [vmem:[#allocation32_spill] sm:$0xff] }
 0x3bf   : > { %4547 = vtanh.f32 %v1911_v25  ;;  %v7319_v25 = vld [vmem:[#allocation33_spill] sm:$0xff] }
 0x3c1   : > { %v4540_v20 = vpop.eup %4539 }
 0x3c2   : > { %v1809_v22 = vmul.f32 %v4540_v20, %v4538_v60  ;;  %v7313_v60 = vld [vmem:[#allocation27_spill] sm:$0xff]  ;;  %v7315_v20 = vld [vmem:[#allocation29_spill] sm:$0xff] }
 0x3c4   : > { %v1810_v26 = vpack.c.bf16 %v1809_v22, %v1809_v22  ;;  %v7316_v22 = vld [vmem:[#allocation30_spill] sm:$0xff] }
 0x3c6   : > { %v4542_v27 = vpop.eup %4541  ;;  %1973 = vmatmul.mubr.bf16.vlgmr.msra.gmra.mrb[24].mxu0 %v1810_v26  ;;  %2014 = vmatmul.mubr.bf16.vlgmr.msra.gmra.mrb[24].mxu1 %v1810_v26  ;;  %v7320_v26 = vld [vmem:[#allocation34_spill] sm:$0xff] }
 0x3c7   : > { %v4544_v28 = vpop.eup %4543  ;;  %v1916_v29 = vadd.f32 1.0, %v4542_v27  ;;  %2027 = vmatpush1.bf16.msra.mxu0 %v7237_v2  ;;  %2068 = vmatpush1.bf16.msra.mxu1 %v7238_v13  ;;  %v7290_v2 = vld [vmem:[#allocation47_spill] sm:$0xff]  ;;  %v7291_v13 = vld [vmem:[#allocation48_spill] sm:$0xff] }
 0x3c8   : > { %v1922_v30 = vadd.f32 1.0, %v4544_v28  ;;  %2028 = vmatprep.subr.bf16.mxu0 %v7239_v10  ;;  %2069 = vmatprep.subr.bf16.mxu1 %v7240_v18  ;;  %v7292_v10 = vld [vmem:[#allocation49_spill] sm:$0xff]  ;;  %v7293_v18 = vld [vmem:[#allocation50_spill] sm:$0xff]  ;;  %v4546_v31 = vpop.eup %4545  ;;  %v7321_v27 = vld [vmem:[#allocation35_spill] sm:$0xff] }
 0x3c9   : > { %4549 = vrcp.f32 %v1916_v29  ;;  %2058 = vmatprep.mubr.bf16.mxu0 %v7179_v50  ;;  %2099 = vmatprep.mubr.bf16.mxu1 %v7179_v50  ;;  %v4548_v32 = vpop.eup %4547  ;;  %v7322_v28 = vld [vmem:[#allocation36_spill] sm:$0xff]  ;;  %v7323_v29 = vld [vmem:[#allocation37_spill] sm:$0xff] }
 0x3ca   : > { %4551 = vrcp.f32 %v1922_v30  ;;  %v5892_v30 = vld [vmem:[#allocation8 + $0xc0] ss:$16 sps:$4 sm:$0xff]  }
 0x3cb   : > { %2029 = vmatpush1.bf16.msra.mxu0 %v7241_v12  ;;  %2070 = vmatpush1.bf16.msra.mxu1 %v7242_v17  ;;  %v7294_v12 = vld [vmem:[#allocation51_spill] sm:$0xff] }
 0x3cc   : > { %2030 = vmatprep.subr.bf16.mxu0 %v7243_v6  ;;  %2071 = vmatprep.subr.bf16.mxu1 %v7244_v15  ;;  %v1929_v15 = vadd.f32 1.0, %v4546_v31  ;;  %v5907_v31 = vld [vmem:[#allocation8 + $0xe8] ss:$16 sps:$4 sm:$0xff]  }
 0x3ce   : > { %4553 = vrcp.f32 %v1929_v15  ;;  %v5930_v15 = vld [vmem:[#allocation12 + $0x20] ss:$16 sps:$4 sm:$0xff]  }
 0x3cf   : > { %2031 = vmatpush1.bf16.msra.mxu0 %v7290_v2  ;;  %2072 = vmatpush1.bf16.msra.mxu1 %v7291_v13  ;;  %v5895_v2 = vld [vmem:[#allocation8 + $0xc8] ss:$16 sps:$4 sm:$0xff]   ;;  %v5898_v13 = vld [vmem:[#allocation8 + $0xe4] ss:$16 sps:$4 sm:$0xff]  }
 0x3d0   : > { %2032 = vmatprep.subr.bf16.mxu0 %v7292_v10  ;;  %2073 = vmatprep.subr.bf16.mxu1 %v7293_v18  ;;  %v5901_v10 = vld [vmem:[#allocation8 + $0xec] ss:$16 sps:$4 sm:$0xff]   ;;  %v5904_v18 = vld [vmem:[#allocation8 + $0xe0] ss:$16 sps:$4 sm:$0xff]  }
 0x3d3   : > { %v4550_v33 = vpop.eup %4549  ;;  %2033 = vmatpush1.bf16.msra.mxu0 %v7294_v12  ;;  %2074 = vmatpush1.bf16.msra.mxu1 %v7250_v19  ;;  %v7299_v19 = vld [vmem:[#allocation59_spill] sm:$0xff]  ;;  %v5919_v12 = vld [vmem:[#allocation12 + $0x8] ss:$16 sps:$4 sm:$0xff]  }
 0x3d4   : > { %v4552_v17 = vpop.eup %4551  ;;  %v1936_v6 = vmul.f32 %v4550_v33, %v4548_v32  ;;  %2034 = vmatprep.subr.bf16.mxu0 %v7251_v9  ;;  %2075 = vmatprep.subr.bf16.mxu1 %v7252_v14  ;;  %v7300_v9 = vld [vmem:[#allocation61_spill] sm:$0xff]  ;;  %v7301_v14 = vld [vmem:[#allocation62_spill] sm:$0xff] }
 0x3d5   : > { %v1935_v36 = vmul.f32 %v4552_v17, %v1933_v34  ;;  %v5910_v32 = vld [vmem:[#allocation12 + $0x4] ss:$16 sps:$4 sm:$0xff]   ;;  %v5913_v33 = vld [vmem:[#allocation12 + $0xc] ss:$16 sps:$4 sm:$0xff]   ;;  %v5916_v34 = vld [vmem:[#allocation12] ss:$16 sps:$4 sm:$0xff]  }
 0x3d6   : > { %v5922_v17 = vld [vmem:[#allocation12 + $0x24] ss:$16 sps:$4 sm:$0xff]  }
 0x3d7   : > { %v5847_v37 = vadd.f32 %v1936_v6, %v1935_v36  ;;  %2035 = vmatpush1.bf16.msra.mxu0 %v7295_v38  ;;  %2076 = vmatpush1.bf16.msra.mxu1 %v7296_v39  ;;  %v5925_v6 = vld [vmem:[#allocation12 + $0x2c] ss:$16 sps:$4 sm:$0xff]   ;;  %v5933_v36 = vld [vmem:[#allocation12 + $0x28] ss:$16 sps:$4 sm:$0xff]   ;;  %v5936_v38 = vld [vmem:[#allocation12 + $0x44] ss:$16 sps:$4 sm:$0xff]  }
 0x3d8   : > { %2036 = vmatprep.subr.bf16.mxu0 %v7297_v8  ;;  %2077 = vmatprep.subr.bf16.mxu1 %v7298_v40  ;;  %v4554_v45 = vpop.eup %4553  ;;  %7324 = vst [vmem:[#allocation15_spill] sm:$0xff] %v5933_v36  ;;  %7325 = vst [vmem:[#allocation39_spill] sm:$0xff] %v5936_v38  ;;  %v5939_v39 = vld [vmem:[#allocation12 + $0x4c] ss:$16 sps:$4 sm:$0xff]   ;;  %v5942_v8 = vld [vmem:[#allocation12 + $0x40] ss:$16 sps:$4 sm:$0xff]  }
 0x3d9   : > { %4555 = vtanh.f32 %v5847_v37  ;;  %7326 = vst [vmem:[#allocation40_spill] sm:$0xff] %v5939_v39  ;;  %7327 = vst [vmem:[#allocation41_spill] sm:$0xff] %v5942_v8  ;;  %v5945_v40 = vld [vmem:[#allocation12 + $0x48] ss:$16 sps:$4 sm:$0xff]  }
 0x3da   : > { %7328 = vst [vmem:[#allocation42_spill] sm:$0xff] %v5945_v40 }
 0x3db   : > { %2037 = vmatpush1.bf16.msra.mxu0 %v7299_v19  ;;  %2078 = vmatpush1.bf16.msra.mxu1 %v7258_v1  ;;  %v5948_v19 = vld [vmem:[#allocation12 + $0x64] ss:$16 sps:$4 sm:$0xff]  }
 0x3dc   : > { %2038 = vmatprep.subr.bf16.mxu0 %v7300_v9  ;;  %2079 = vmatprep.subr.bf16.mxu1 %v7301_v14  ;;  %7329 = vst [vmem:[#allocation43_spill] sm:$0xff] %v5948_v19  ;;  %v5951_v9 = vld [vmem:[#allocation12 + $0x6c] ss:$16 sps:$4 sm:$0xff]   ;;  %v5954_v14 = vld [vmem:[#allocation12 + $0x60] ss:$16 sps:$4 sm:$0xff]  }
 0x3dd   : > { %7330 = vst [vmem:[#allocation44_spill] sm:$0xff] %v5951_v9  ;;  %7331 = vst [vmem:[#allocation45_spill] sm:$0xff] %v5954_v14 }
 0x3df   : > { %2039 = vmatpush1.bf16.msra.mxu0 %v7302_v41  ;;  %2080 = vmatpush1.bf16.msra.mxu1 %v7303_v4  ;;  %v5957_v41 = vld [vmem:[#allocation12 + $0x68] ss:$16 sps:$4 sm:$0xff]   ;;  %v5960_v4 = vld [vmem:[#allocation12 + $0x84] ss:$16 sps:$4 sm:$0xff]  }
 0x3e0   : > { %2040 = vmatprep.subr.bf16.mxu0 %v7263_v0  ;;  %2081 = vmatprep.subr.bf16.mxu1 %v7304_v44  ;;  %v7308_v0 = vld [vmem:[#allocation22_spill] sm:$0xff]  ;;  %7332 = vst [vmem:[#allocation46_spill] sm:$0xff] %v5957_v41  ;;  %7333 = vst [vmem:[#allocation52_spill] sm:$0xff] %v5960_v4 }
 0x3e1   : > { %v5963_v44 = vld [vmem:[#allocation12 + $0x8c] ss:$16 sps:$4 sm:$0xff]  }
 0x3e2   : > { %7334 = vst [vmem:[#allocation53_spill] sm:$0xff] %v5963_v44 }
 0x3e3   : > { %v4556_v46 = vpop.eup %4555  ;;  %2041 = vmatpush1.bf16.msra.mxu0 %v7305_v48  ;;  %2082 = vmatpush1.bf16.msra.mxu1 %v7306_v49  ;;  %v5972_v48 = vld [vmem:[#allocation12 + $0xa4] ss:$16 sps:$4 sm:$0xff]   ;;  %v5975_v49 = vld [vmem:[#allocation12 + $0xac] ss:$16 sps:$4 sm:$0xff]  }
 0x3e4   : > { %2141 = vmatprep.subr.bf16.mxu0 %v7307_v52  ;;  %2182 = vmatprep.subr.bf16.mxu1 %v5701_v43  ;;  %v1939_v1 = vmul.f32 %v4556_v46, %v4554_v45  ;;  %v5966_v45 = vld [vmem:[#allocation12 + $0x80] ss:$16 sps:$4 sm:$0xff]   ;;  %v5969_v46 = vld [vmem:[#allocation12 + $0x88] ss:$16 sps:$4 sm:$0xff]   ;;  %7337 = vst [vmem:[#allocation65_spill] sm:$0xff] %v5972_v48  ;;  %7338 = vst [vmem:[#allocation38_spill] sm:$0xff] %v5975_v49 }
 0x3e5   : > { %7335 = vst [vmem:[#allocation54_spill] sm:$0xff] %v5966_v45  ;;  %7336 = vst [vmem:[#allocation60_spill] sm:$0xff] %v5969_v46 }
 0x3e6   : > { %v2022_v54 = vpack.c.bf16 %v1939_v1, %v1939_v1  ;;  %v5978_v1 = vld [vmem:[#allocation12 + $0xa0] ss:$16 sps:$4 sm:$0xff]  }
 0x3e7   : > { %7339 = vst [vmem:[#allocation20_spill] sm:$0xff] %v5978_v1 }
 0x3e8   : > { %v2024_v55 = vrot.slane %v2022_v54, 2  ;;  %v5981_v54 = vld [vmem:[#allocation12 + $0xa8] ss:$16 sps:$4 sm:$0xff]  }
 0x3e9   : > { %7340 = vst [vmem:[#allocation47_spill] sm:$0xff] %v5981_v54 }
 0x3ea   : > { %2059 = vmatmul.mubr.bf16.vlgmr.msra.gmra.mrb[24].mxu0 %v2024_v55  ;;  %2100 = vmatmul.mubr.bf16.vlgmr.msra.gmra.mrb[24].mxu1 %v2024_v55 }
 0x3eb   : > { %2142 = vmatpush1.bf16.msra.mxu0 %v5704_v16  ;;  %2183 = vmatpush1.bf16.msra.mxu1 %v5707_v42 }
 0x3ec   : > { %2143 = vmatprep.subr.bf16.mxu0 %v7308_v0  ;;  %2184 = vmatprep.subr.bf16.mxu1 %v7309_v56 }
 0x3ed   : > { %2173 = vmatprep.mubr.bf16.mxu0 %v7179_v50  ;;  %2214 = vmatprep.mubr.bf16.mxu1 %v7179_v50 }
 0x3ef   : > { %2144 = vmatpush1.bf16.msra.mxu0 %v7310_v57  ;;  %2185 = vmatpush1.bf16.msra.mxu1 %v7311_v58 }
 0x3f0   : > { %2145 = vmatprep.subr.bf16.mxu0 %v7312_v59  ;;  %2186 = vmatprep.subr.bf16.mxu1 %v7313_v60 }
 0x3f3   : > { %2146 = vmatpush1.bf16.msra.mxu0 %v7314_v62  ;;  %2187 = vmatpush1.bf16.msra.mxu1 %v7315_v20 }
 0x3f4   : > { %2147 = vmatprep.subr.bf16.mxu0 %v7316_v22  ;;  %2188 = vmatprep.subr.bf16.mxu1 %v7317_v23 }
 0x3f7   : > { %2148 = vmatpush1.bf16.msra.mxu0 %v7318_v24  ;;  %2189 = vmatpush1.bf16.msra.mxu1 %v7319_v25 }
 0x3f8   : > { %2149 = vmatprep.subr.bf16.mxu0 %v7320_v26  ;;  %2190 = vmatprep.subr.bf16.mxu1 %v7321_v27 }
 0x3fb   : > { %2150 = vmatpush1.bf16.msra.mxu0 %v7322_v28  ;;  %2191 = vmatpush1.bf16.msra.mxu1 %v7323_v29 }
 0x3fc   : > { %2151 = vmatprep.subr.bf16.mxu0 %v5760_v3  ;;  %2192 = vmatprep.subr.bf16.mxu1 %v5763_v5 }
 0x3ff   : > { %2152 = vmatpush1.bf16.msra.mxu0 %v5766_v63  ;;  %2193 = vmatpush1.bf16.msra.mxu1 %v5769_v7 }
 0x400   : > { %2153 = vmatprep.subr.bf16.mxu0 %v5772_v51  ;;  %2194 = vmatprep.subr.bf16.mxu1 %v5775_v11 }
 0x403   : > { %2154 = vmatpush1.bf16.msra.mxu0 %v5892_v30  ;;  %2195 = vmatpush1.bf16.msra.mxu1 %v5895_v2 }
 0x404   : > { %2155 = vmatprep.subr.bf16.mxu0 %v5898_v13  ;;  %2196 = vmatprep.subr.bf16.mxu1 %v5901_v10 }
 0x407   : > { %2156 = vmatpush1.bf16.msra.mxu0 %v5904_v18  ;;  %2197 = vmatpush1.bf16.msra.mxu1 %v5907_v31 }
 0x408   : > { %2266 = vmatprep.subr.bf16.mxu0 %v5910_v32  ;;  %2307 = vmatprep.subr.bf16.mxu1 %v5913_v33 }
 0x40a   : > { %2174 = vmatmul.mubr.bf16.vlgmr.msra.gmra.mrb[28].mxu0 %v2024_v55  ;;  %2215 = vmatmul.mubr.bf16.vlgmr.msra.gmra.mrb[28].mxu1 %v2024_v55  ;;  %v5984_v55 = vld [vmem:[#allocation12 + $0xc4] ss:$16 sps:$4 sm:$0xff]  }
 0x40b   : > { %2267 = vmatpush1.bf16.msra.mxu0 %v5916_v34  ;;  %2308 = vmatpush1.bf16.msra.mxu1 %v5919_v12  ;;  %7341 = vst [vmem:[#allocation48_spill] sm:$0xff] %v5984_v55 }
 0x40c   : > { %2268 = vmatprep.subr.bf16.mxu0 %v5922_v17  ;;  %2309 = vmatprep.subr.bf16.mxu1 %v5925_v6 }
 0x40d   : > { %2298 = vmatprep.mubr.bf16.mxu0 %v7179_v50  ;;  %2339 = vmatprep.mubr.bf16.mxu1 %v7179_v50 }
 0x40f   : > { %2269 = vmatpush1.bf16.msra.mxu0 %v5930_v15  ;;  %2310 = vmatpush1.bf16.msra.mxu1 %v5933_v36 }
 0x410   : > { %2270 = vmatprep.subr.bf16.mxu0 %v5936_v38  ;;  %2311 = vmatprep.subr.bf16.mxu1 %v5939_v39 }
 0x413   : > { %2271 = vmatpush1.bf16.msra.mxu0 %v5942_v8  ;;  %2312 = vmatpush1.bf16.msra.mxu1 %v5945_v40 }
 0x414   : > { %2272 = vmatprep.subr.bf16.mxu0 %v5948_v19  ;;  %2313 = vmatprep.subr.bf16.mxu1 %v5951_v9 }
 0x417   : > { %2273 = vmatpush1.bf16.msra.mxu0 %v5954_v14  ;;  %2314 = vmatpush1.bf16.msra.mxu1 %v5957_v41 }
 0x418   : > { %2274 = vmatprep.subr.bf16.mxu0 %v5960_v4  ;;  %2315 = vmatprep.subr.bf16.mxu1 %v5963_v44 }
 0x41b   : > { %2275 = vmatpush1.bf16.msra.mxu0 %v5966_v45  ;;  %2316 = vmatpush1.bf16.msra.mxu1 %v5969_v46  ;;  %v5987_v46 = vld [vmem:[#allocation12 + $0xcc] ss:$16 sps:$4 sm:$0xff]  }
 0x41c   : > { %2276 = vmatprep.subr.bf16.mxu0 %v5972_v48  ;;  %2317 = vmatprep.subr.bf16.mxu1 %v5975_v49  ;;  %7342 = vst [vmem:[#allocation49_spill] sm:$0xff] %v5987_v46  ;;  %v5990_v48 = vld [vmem:[#allocation12 + $0xc0] ss:$16 sps:$4 sm:$0xff]   ;;  %v5993_v49 = vld [vmem:[#allocation12 + $0xc8] ss:$16 sps:$4 sm:$0xff]  }
 0x41d   : > { %7343 = vst [vmem:[#allocation50_spill] sm:$0xff] %v5990_v48  ;;  %7344 = vst [vmem:[#allocation51_spill] sm:$0xff] %v5993_v49 }
 0x41f   : > { %2277 = vmatpush1.bf16.msra.mxu0 %v5978_v1  ;;  %2318 = vmatpush1.bf16.msra.mxu1 %v5981_v54  ;;  %v5996_v1 = vld [vmem:[#allocation12 + $0xe4] ss:$16 sps:$4 sm:$0xff]   ;;  %v5999_v54 = vld [vmem:[#allocation12 + $0xec] ss:$16 sps:$4 sm:$0xff]  }
 0x420   : > { %2278 = vmatprep.subr.bf16.mxu0 %v5984_v55  ;;  %2319 = vmatprep.subr.bf16.mxu1 %v5987_v46  ;;  %7345 = vst [vmem:[#allocation55_spill] sm:$0xff] %v5996_v1  ;;  %7346 = vst [vmem:[#allocation56_spill] sm:$0xff] %v5999_v54  ;;  %v6002_v55 = vld [vmem:[#allocation12 + $0xe0] ss:$16 sps:$4 sm:$0xff]   ;;  %v6005_v46 = vld [vmem:[#allocation12 + $0xe8] ss:$16 sps:$4 sm:$0xff]  }
 0x421   : > { %7347 = vst [vmem:[#allocation57_spill] sm:$0xff] %v6002_v55  ;;  %7348 = vst [vmem:[#allocation58_spill] sm:$0xff] %v6005_v46 }
 0x423   : > { %2279 = vmatpush1.bf16.msra.mxu0 %v5990_v48  ;;  %2320 = vmatpush1.bf16.msra.mxu1 %v5993_v49  ;;  %v6008_v48 = vld [vmem:[#allocation10 + $0x4] ss:$16 sps:$4 sm:$0xff]   ;;  %v6011_v49 = vld [vmem:[#allocation10 + $0xc] ss:$16 sps:$4 sm:$0xff]  }
 0x424   : > { %2280 = vmatprep.subr.bf16.mxu0 %v5996_v1  ;;  %2321 = vmatprep.subr.bf16.mxu1 %v5999_v54  ;;  %7349 = vst [vmem:[#allocation59_spill] sm:$0xff] %v6008_v48  ;;  %7350 = vst [vmem:[#allocation61_spill] sm:$0xff] %v6011_v49 }
 0x427   : > { %2281 = vmatpush1.bf16.msra.mxu0 %v6002_v55  ;;  %2322 = vmatpush1.bf16.msra.mxu1 %v6005_v46 }
 0x428   : > { %2352 = vmatprep.subr.bf16.mxu0 %v6008_v48  ;;  %2393 = vmatprep.subr.bf16.mxu1 %v6011_v49 }
 0x4bd   : > { %v2060_v1 = vpop.f32.mrb[24].mxu0  ;;  %v2101_v45 = vpop.f32.mrb[24].mxu1 }
 0x4be   : > { %v4181_v54 = vadd.f32 %v2060_v1, %v7285_v47  ;;  %v2062_v44 = vpop.f32.mrb[25].mxu0  ;;  %v2103_v4 = vpop.f32.mrb[25].mxu1  ;;  %v4183_v49 = vadd.f32 %v2101_v45, %v7288_v21  ;;  %v2138_v21 = vld [vmem:[#allocation2 + $0x8] sm:$0xc0] }
 0x4bf   : > { %v4182_v55 = vadd.f32 %v2062_v44, %v7286_v53  ;;  %v2064_v41 = vpop.f32.mrb[26].mxu0  ;;  %v2105_v14 = vpop.f32.mrb[26].mxu1  ;;  %v4184_v48 = vadd.f32 %v2103_v4, %v7287_v61 }
 0x4c0   : > { %v4098_v9 = vmul.f32 -1.442695, %v4181_v54  ;;  %v2065_v46 = vpop.f32.mrb[27].mxu0  ;;  %v2106_v19 = vpop.f32.mrb[27].mxu1 }
 0x4c1   : > { %v4099_v40 = vmul.f32 -1.442695, %v4182_v55  ;;  %v4100_v8 = vmul.f32 -1.442695, %v4184_v48 }
 0x4c2   : > { %4557 = vpow2.f32 %v4098_v9 }
 0x4c3   : > { %4559 = vpow2.f32 %v4099_v40 }
 0x4c4   : > { %4561 = vpow2.f32 %v4100_v8 }
 0x4c5   : > { %4563 = vtanh.f32 %v4183_v49  ;;  %v2137_v49 = vld [vmem:[#allocation2] sm:$0xc0] }
 0x4cc   : > { %v4558_v39 = vpop.eup %4557 }
 0x4cd   : > { %v4560_v38 = vpop.eup %4559  ;;  %v2115_v1 = vadd.f32 1.0, %v4558_v39 }
 0x4ce   : > { %v2121_v47 = vadd.f32 1.0, %v4560_v38  ;;  %v4562_v14 = vpop.eup %4561 }
 0x4cf   : > { %4565 = vrcp.f32 %v2115_v1  ;;  %v4564_v41 = vpop.eup %4563  ;;  %v2128_v9 = vadd.f32 1.0, %v4562_v14 }
 0x4d0   : > { %4567 = vrcp.f32 %v2121_v47 }
 0x4d1   : > { %4569 = vrcp.f32 %v2128_v9  ;;  %v2140_v9 = vld [vmem:[#allocation2 + $0x18] sm:$0xc0] }
 0x4d9   : > { %v4566_v44 = vpop.eup %4565 }
 0x4da   : > { %v4568_v19 = vpop.eup %4567  ;;  %v2132_v46 = vmul.f32 %v4566_v44, %v4564_v41 }
 0x4db   : > { %v2131_v40 = vmul.f32 %v4568_v19, %v5825_v35 }
 0x4dd   : > { %v6019_v4 = vadd.f32 %v2132_v46, %v2131_v40  ;;  %v2175_v48 = vpop.f32.mrb[28].mxu0  ;;  %v2216_v45 = vpop.f32.mrb[28].mxu1 }
 0x4de   : > { %v2227_v54 = vrot.slane %v2175_v48, 2  ;;  %v2177_v39 = vpop.f32.mrb[29].mxu0  ;;  %v2218_v8 = vpop.f32.mrb[29].mxu1  ;;  %v2229_v61 = vrot.slane %v2216_v45, 2  ;;  %v6028_v45 = vld [vmem:[#allocation10 + $0x24] ss:$16 sps:$4 sm:$0xff]  }
 0x4df   : > { %7351 = vst [vmem:[#allocation62_spill] sm:$0xff] %v6019_v4  ;;  %v2228_v38 = vrot.slane %v2177_v39, 2  ;;  %v2179_v55 = vpop.f32.mrb[30].mxu0  ;;  %v2220_v47 = vpop.f32.mrb[30].mxu1  ;;  %4571 = vtanh.f32 %v6019_v4  ;;  %v2230_v46 = vrot.slane %v2218_v8, 2 }
 0x4e0   : > { %v2235_v1 = vadd.f32 %v2227_v54, %v2137_v49  ;;  %v2180_v41 = vpop.f32.mrb[31].mxu0  ;;  %v2221_v14 = vpop.f32.mrb[31].mxu1  ;;  %v2139_v55 = vld [vmem:[#allocation2 + $0x10] sm:$0xc0]  ;;  %v6025_v8 = vld [vmem:[#allocation10 + $0x8] ss:$16 sps:$4 sm:$0xff]  }
 0x4e1   : > { %v2236_v44 = vadd.f32 %v2228_v38, %v2138_v21  ;;  %v2238_v40 = vadd.f32 %v2230_v46, %v2140_v9  ;;  %v4570_v48 = vpop.eup %4569  ;;  %v2237_v36 = vadd.f32 %v2229_v61, %v2139_v55  ;;  %v6022_v38 = vld [vmem:[#allocation10] ss:$16 sps:$4 sm:$0xff]   ;;  %v6031_v61 = vld [vmem:[#allocation10 + $0x2c] ss:$16 sps:$4 sm:$0xff]   ;;  %v6064_v55 = vld [vmem:[#allocation10 + $0x68] ss:$16 sps:$4 sm:$0xff]  }
 0x4e2   : > { %v4101_v35 = vmul.f32 -1.442695, %v2235_v1  ;;  %v6042_v1 = vld [vmem:[#allocation10 + $0x44] ss:$16 sps:$4 sm:$0xff]   ;;  %v6045_v41 = vld [vmem:[#allocation10 + $0x4c] ss:$16 sps:$4 sm:$0xff]  }
 0x4e3   : > { %v4102_v19 = vmul.f32 -1.442695, %v2236_v44  ;;  %v4103_v47 = vmul.f32 -1.442695, %v2238_v40  ;;  %v6048_v14 = vld [vmem:[#allocation10 + $0x40] ss:$16 sps:$4 sm:$0xff]  }
 0x4e4   : > { %4573 = vpow2.f32 %v4101_v35  ;;  %v6051_v44 = vld [vmem:[#allocation10 + $0x48] ss:$16 sps:$4 sm:$0xff]   ;;  %v6054_v35 = vld [vmem:[#allocation10 + $0x64] ss:$16 sps:$4 sm:$0xff]  }
 0x4e5   : > { %4575 = vpow2.f32 %v4102_v19  ;;  %7352 = vst [vmem:[#allocation63_spill] sm:$0xff] %v6054_v35  ;;  %v6057_v19 = vld [vmem:[#allocation10 + $0x6c] ss:$16 sps:$4 sm:$0xff]  }
 0x4e6   : > { %4577 = vpow2.f32 %v4103_v47  ;;  %7353 = vst [vmem:[#allocation64_spill] sm:$0xff] %v6057_v19 }
 0x4e7   : > { %4579 = vtanh.f32 %v2237_v36  ;;  %v6039_v36 = vld [vmem:[#allocation10 + $0x28] ss:$16 sps:$4 sm:$0xff]  }
 0x4e9   : > { %v4572_v53 = vpop.eup %4571 }
 0x4ea   : > { %v2135_v39 = vmul.f32 %v4572_v53, %v4570_v48  ;;  %v2259_v48 = vrot.slane %v5847_v37, 6 }
 0x4ec   : > { %v2136_v4 = vpack.c.bf16 %v2135_v39, %v2135_v39  ;;  %v6061_v39 = vld [vmem:[#allocation10 + $0x60] ss:$16 sps:$4 sm:$0xff]  }
 0x4ed   : > { %7354 = vst [vmem:[#allocation66_spill] sm:$0xff] %v6061_v39 }
 0x4ee   : > { %v4574_v54 = vpop.eup %4573  ;;  %2299 = vmatmul.mubr.bf16.vlgmr.msra.gmra.mrb[32].mxu0 %v2136_v4  ;;  %2340 = vmatmul.mubr.bf16.vlgmr.msra.gmra.mrb[32].mxu1 %v2136_v4  ;;  %v6036_v4 = vld [vmem:[#allocation10 + $0x20] ss:$16 sps:$4 sm:$0xff]  }
 0x4ef   : > { %v4576_v49 = vpop.eup %4575  ;;  %v2242_v21 = vadd.f32 1.0, %v4574_v54  ;;  %2353 = vmatpush1.bf16.msra.mxu0 %v6022_v38  ;;  %2394 = vmatpush1.bf16.msra.mxu1 %v6025_v8 }
 0x4f0   : > { %v2248_v53 = vadd.f32 1.0, %v4576_v49  ;;  %2354 = vmatprep.subr.bf16.mxu0 %v6028_v45  ;;  %2395 = vmatprep.subr.bf16.mxu1 %v6031_v61  ;;  %v4578_v46 = vpop.eup %4577 }
 0x4f1   : > { %4581 = vrcp.f32 %v2242_v21  ;;  %2384 = vmatprep.mubr.bf16.mxu0 %v7179_v50  ;;  %2425 = vmatprep.mubr.bf16.mxu1 %v7179_v50  ;;  %v4580_v9 = vpop.eup %4579  ;;  %v2255_v49 = vadd.f32 1.0, %v4578_v46  ;;  %v6067_v21 = vld [vmem:[#allocation10 + $0x84] ss:$16 sps:$4 sm:$0xff]  }
 0x4f2   : > { %4583 = vrcp.f32 %v2248_v53  ;;  %v6070_v53 = vld [vmem:[#allocation10 + $0x8c] ss:$16 sps:$4 sm:$0xff]   ;;  %v6081_v46 = vld [vmem:[#allocation10 + $0xa4] ss:$16 sps:$4 sm:$0xff]  }
 0x4f3   : > { %2355 = vmatpush1.bf16.msra.mxu0 %v6036_v4  ;;  %2396 = vmatpush1.bf16.msra.mxu1 %v6039_v36  ;;  %4585 = vrcp.f32 %v2255_v49  ;;  %7355 = vst [vmem:[#allocation67_spill] sm:$0xff] %v6081_v46  ;;  %v6100_v49 = vld [vmem:[#allocation10 + $0xc0] ss:$16 sps:$4 sm:$0xff]  }
 0x4f4   : > { %2356 = vmatprep.subr.bf16.mxu0 %v6042_v1  ;;  %2397 = vmatprep.subr.bf16.mxu1 %v6045_v41  ;;  %7361 = vst [vmem:[#allocation25_spill] sm:$0xff] %v6100_v49 }
 0x4f7   : > { %2357 = vmatpush1.bf16.msra.mxu0 %v6048_v14  ;;  %2398 = vmatpush1.bf16.msra.mxu1 %v6051_v44 }
 0x4f8   : > { %2358 = vmatprep.subr.bf16.mxu0 %v6054_v35  ;;  %2399 = vmatprep.subr.bf16.mxu1 %v6057_v19  ;;  %v6075_v35 = vld [vmem:[#allocation10 + $0x80] ss:$16 sps:$4 sm:$0xff]  }
 0x4fb   : > { %v4582_v40 = vpop.eup %4581  ;;  %2359 = vmatpush1.bf16.msra.mxu0 %v6061_v39  ;;  %2400 = vmatpush1.bf16.msra.mxu1 %v6064_v55  ;;  %v6078_v39 = vld [vmem:[#allocation10 + $0x88] ss:$16 sps:$4 sm:$0xff]  }
 0x4fc   : > { %v4584_v47 = vpop.eup %4583  ;;  %v2262_v54 = vmul.f32 %v4582_v40, %v4580_v9  ;;  %2360 = vmatprep.subr.bf16.mxu0 %v6067_v21  ;;  %2401 = vmatprep.subr.bf16.mxu1 %v6070_v53  ;;  %v6084_v9 = vld [vmem:[#allocation10 + $0xac] ss:$16 sps:$4 sm:$0xff]   ;;  %v6088_v40 = vld [vmem:[#allocation10 + $0xa0] ss:$16 sps:$4 sm:$0xff]  }
 0x4fd   : > { %v2261_v37 = vmul.f32 %v4584_v47, %v2259_v48  ;;  %7356 = vst [vmem:[#allocation68_spill] sm:$0xff] %v6084_v9  ;;  %7357 = vst [vmem:[#allocation21_spill] sm:$0xff] %v6088_v40  ;;  %v6091_v48 = vld [vmem:[#allocation10 + $0xa8] ss:$16 sps:$4 sm:$0xff]   ;;  %v6094_v47 = vld [vmem:[#allocation10 + $0xc4] ss:$16 sps:$4 sm:$0xff]  }
 0x4fe   : > { %7358 = vst [vmem:[#allocation22_spill] sm:$0xff] %v6091_v48  ;;  %7359 = vst [vmem:[#allocation23_spill] sm:$0xff] %v6094_v47 }
 0x4ff   : > { %v6073_v19 = vadd.f32 %v2262_v54, %v2261_v37  ;;  %2361 = vmatpush1.bf16.msra.mxu0 %v6075_v35  ;;  %2402 = vmatpush1.bf16.msra.mxu1 %v6078_v39  ;;  %v6097_v54 = vld [vmem:[#allocation10 + $0xcc] ss:$16 sps:$4 sm:$0xff]   ;;  %v6103_v37 = vld [vmem:[#allocation10 + $0xc8] ss:$16 sps:$4 sm:$0xff]  }
 0x500   : > { %2362 = vmatprep.subr.bf16.mxu0 %v6081_v46  ;;  %2403 = vmatprep.subr.bf16.mxu1 %v6084_v9  ;;  %7360 = vst [vmem:[#allocation24_spill] sm:$0xff] %v6097_v54  ;;  %7362 = vst [vmem:[#allocation26_spill] sm:$0xff] %v6103_v37  ;;  %v6112_v46 = vld [vmem:[#allocation10 + $0xe0] ss:$16 sps:$4 sm:$0xff]  }
 0x501   : > { %4587 = vtanh.f32 %v6073_v19 }
 0x503   : > { %2363 = vmatpush1.bf16.msra.mxu0 %v6088_v40  ;;  %2404 = vmatpush1.bf16.msra.mxu1 %v6091_v48  ;;  %v6106_v40 = vld [vmem:[#allocation10 + $0xe4] ss:$16 sps:$4 sm:$0xff]   ;;  %v6109_v48 = vld [vmem:[#allocation10 + $0xec] ss:$16 sps:$4 sm:$0xff]  }
 0x504   : > { %2364 = vmatprep.subr.bf16.mxu0 %v6094_v47  ;;  %2405 = vmatprep.subr.bf16.mxu1 %v6097_v54  ;;  %7363 = vst [vmem:[#allocation27_spill] sm:$0xff] %v6106_v40  ;;  %v4586_v47 = vpop.eup %4585  ;;  %v6115_v54 = vld [vmem:[#allocation10 + $0xe8] ss:$16 sps:$4 sm:$0xff]  }
 0x507   : > { %2365 = vmatpush1.bf16.msra.mxu0 %v6100_v49  ;;  %2406 = vmatpush1.bf16.msra.mxu1 %v6103_v37 }
 0x508   : > { %2366 = vmatprep.subr.bf16.mxu0 %v6106_v40  ;;  %2407 = vmatprep.subr.bf16.mxu1 %v6109_v48 }
 0x50b   : > { %v4588_v9 = vpop.eup %4587  ;;  %2367 = vmatpush1.bf16.msra.mxu0 %v6112_v46  ;;  %2408 = vmatpush1.bf16.msra.mxu1 %v6115_v54 }
 0x50c   : > { %2467 = vmatprep.subr.bf16.mxu0 %v7307_v52  ;;  %2508 = vmatprep.subr.bf16.mxu1 %v5701_v43  ;;  %v2265_v37 = vmul.f32 %v4588_v9, %v4586_v47  ;;  %v7367_v43 = vld [vmem:[#allocation41_spill] sm:$0xff]  ;;  %v7373_v52 = vld [vmem:[#allocation52_spill] sm:$0xff] }
 0x50d   : > { %v7390_v9 = vld [vmem:[#allocation61_spill] sm:$0xff] }
 0x50e   : > { %v2348_v40 = vpack.c.bf16 %v2265_v37, %v2265_v37 }
 0x510   : > { %v2350_v49 = vrot.slane %v2348_v40, 3 }
 0x512   : > { %2385 = vmatmul.mubr.bf16.vlgmr.msra.gmra.mrb[32].mxu0 %v2350_v49  ;;  %2426 = vmatmul.mubr.bf16.vlgmr.msra.gmra.mrb[32].mxu1 %v2350_v49 }
 0x513   : > { %2468 = vmatpush1.bf16.msra.mxu0 %v5704_v16  ;;  %2509 = vmatpush1.bf16.msra.mxu1 %v5707_v42  ;;  %v7364_v42 = vld [vmem:[#allocation15_spill] sm:$0xff]  ;;  %v7368_v16 = vld [vmem:[#allocation42_spill] sm:$0xff] }
 0x514   : > { %2469 = vmatprep.subr.bf16.mxu0 %v7308_v0  ;;  %2510 = vmatprep.subr.bf16.mxu1 %v7309_v56  ;;  %v7374_v0 = vld [vmem:[#allocation53_spill] sm:$0xff]  ;;  %v7375_v56 = vld [vmem:[#allocation54_spill] sm:$0xff] }
 0x515   : > { %2499 = vmatprep.mubr.bf16.mxu0 %v7179_v50  ;;  %2540 = vmatprep.mubr.bf16.mxu1 %v7179_v50 }
 0x517   : > { %2470 = vmatpush1.bf16.msra.mxu0 %v7310_v57  ;;  %2511 = vmatpush1.bf16.msra.mxu1 %v7311_v58  ;;  %v7376_v57 = vld [vmem:[#allocation60_spill] sm:$0xff]  ;;  %v7377_v58 = vld [vmem:[#allocation65_spill] sm:$0xff] }
 0x518   : > { %2471 = vmatprep.subr.bf16.mxu0 %v7312_v59  ;;  %2512 = vmatprep.subr.bf16.mxu1 %v7313_v60  ;;  %v7378_v59 = vld [vmem:[#allocation38_spill] sm:$0xff]  ;;  %v7379_v60 = vld [vmem:[#allocation20_spill] sm:$0xff] }
 0x51b   : > { %2472 = vmatpush1.bf16.msra.mxu0 %v7314_v62  ;;  %2513 = vmatpush1.bf16.msra.mxu1 %v7315_v20  ;;  %v7380_v62 = vld [vmem:[#allocation47_spill] sm:$0xff]  ;;  %v7381_v20 = vld [vmem:[#allocation48_spill] sm:$0xff] }
 0x51c   : > { %2473 = vmatprep.subr.bf16.mxu0 %v7316_v22  ;;  %2514 = vmatprep.subr.bf16.mxu1 %v7317_v23  ;;  %v7382_v22 = vld [vmem:[#allocation49_spill] sm:$0xff]  ;;  %v7383_v23 = vld [vmem:[#allocation50_spill] sm:$0xff] }
 0x51f   : > { %2474 = vmatpush1.bf16.msra.mxu0 %v7318_v24  ;;  %2515 = vmatpush1.bf16.msra.mxu1 %v7319_v25  ;;  %v7384_v24 = vld [vmem:[#allocation51_spill] sm:$0xff] }
 0x520   : > { %2475 = vmatprep.subr.bf16.mxu0 %v7320_v26  ;;  %2516 = vmatprep.subr.bf16.mxu1 %v7321_v27  ;;  %v7385_v25 = vld [vmem:[#allocation55_spill] sm:$0xff]  ;;  %v7386_v26 = vld [vmem:[#allocation56_spill] sm:$0xff]  ;;  %v7387_v27 = vld [vmem:[#allocation57_spill] sm:$0xff] }
 0x523   : > { %2476 = vmatpush1.bf16.msra.mxu0 %v7322_v28  ;;  %2517 = vmatpush1.bf16.msra.mxu1 %v7323_v29  ;;  %v7388_v28 = vld [vmem:[#allocation58_spill] sm:$0xff]  ;;  %v7389_v29 = vld [vmem:[#allocation59_spill] sm:$0xff] }
 0x524   : > { %2477 = vmatprep.subr.bf16.mxu0 %v5760_v3  ;;  %2518 = vmatprep.subr.bf16.mxu1 %v5763_v5  ;;  %v7371_v3 = vld [vmem:[#allocation45_spill] sm:$0xff]  ;;  %v7372_v5 = vld [vmem:[#allocation46_spill] sm:$0xff] }
 0x527   : > { %2478 = vmatpush1.bf16.msra.mxu0 %v5766_v63  ;;  %2519 = vmatpush1.bf16.msra.mxu1 %v5769_v7  ;;  %v7365_v7 = vld [vmem:[#allocation39_spill] sm:$0xff]  ;;  %v7366_v63 = vld [vmem:[#allocation40_spill] sm:$0xff] }
 0x528   : > { %2479 = vmatprep.subr.bf16.mxu0 %v5772_v51  ;;  %2520 = vmatprep.subr.bf16.mxu1 %v5775_v11  ;;  %v7369_v51 = vld [vmem:[#allocation43_spill] sm:$0xff]  ;;  %v7370_v11 = vld [vmem:[#allocation44_spill] sm:$0xff] }
 0x52b   : > { %2480 = vmatpush1.bf16.msra.mxu0 %v5892_v30  ;;  %2521 = vmatpush1.bf16.msra.mxu1 %v5895_v2 }
 0x52c   : > { %2481 = vmatprep.subr.bf16.mxu0 %v5898_v13  ;;  %2522 = vmatprep.subr.bf16.mxu1 %v5901_v10 }
 0x52f   : > { %2482 = vmatpush1.bf16.msra.mxu0 %v5904_v18  ;;  %2523 = vmatpush1.bf16.msra.mxu1 %v5907_v31 }
 0x530   : > { %2580 = vmatprep.subr.bf16.mxu0 %v5910_v32  ;;  %2621 = vmatprep.subr.bf16.mxu1 %v5913_v33 }
 0x532   : > { %2500 = vmatmul.mubr.bf16.vlgmr.msra.gmra.mrb[36].mxu0 %v2350_v49  ;;  %2541 = vmatmul.mubr.bf16.vlgmr.msra.gmra.mrb[36].mxu1 %v2350_v49  ;;  %v7391_v49 = vld [vmem:[#allocation16_spill] sm:$0xff] }
 0x533   : > { %2581 = vmatpush1.bf16.msra.mxu0 %v5916_v34  ;;  %2622 = vmatpush1.bf16.msra.mxu1 %v5919_v12 }
 0x534   : > { %2582 = vmatprep.subr.bf16.mxu0 %v5922_v17  ;;  %2623 = vmatprep.subr.bf16.mxu1 %v5925_v6 }
 0x535   : > { %2612 = vmatprep.mubr.bf16.mxu0 %v7179_v50  ;;  %2653 = vmatprep.mubr.bf16.mxu1 %v7179_v50 }
 0x537   : > { %2583 = vmatpush1.bf16.msra.mxu0 %v5930_v15  ;;  %2624 = vmatpush1.bf16.msra.mxu1 %v7364_v42 }
 0x538   : > { %2584 = vmatprep.subr.bf16.mxu0 %v7365_v7  ;;  %2625 = vmatprep.subr.bf16.mxu1 %v7366_v63 }
 0x53b   : > { %2585 = vmatpush1.bf16.msra.mxu0 %v7367_v43  ;;  %2626 = vmatpush1.bf16.msra.mxu1 %v7368_v16 }
 0x53c   : > { %2586 = vmatprep.subr.bf16.mxu0 %v7369_v51  ;;  %2627 = vmatprep.subr.bf16.mxu1 %v7370_v11 }
 0x53f   : > { %2587 = vmatpush1.bf16.msra.mxu0 %v7371_v3  ;;  %2628 = vmatpush1.bf16.msra.mxu1 %v7372_v5 }
 0x540   : > { %2588 = vmatprep.subr.bf16.mxu0 %v7373_v52  ;;  %2629 = vmatprep.subr.bf16.mxu1 %v7374_v0 }
 0x543   : > { %2589 = vmatpush1.bf16.msra.mxu0 %v7375_v56  ;;  %2630 = vmatpush1.bf16.msra.mxu1 %v7376_v57 }
 0x544   : > { %2590 = vmatprep.subr.bf16.mxu0 %v7377_v58  ;;  %2631 = vmatprep.subr.bf16.mxu1 %v7378_v59 }
 0x547   : > { %2591 = vmatpush1.bf16.msra.mxu0 %v7379_v60  ;;  %2632 = vmatpush1.bf16.msra.mxu1 %v7380_v62 }
 0x548   : > { %2592 = vmatprep.subr.bf16.mxu0 %v7381_v20  ;;  %2633 = vmatprep.subr.bf16.mxu1 %v7382_v22  ;;  %v7392_v20 = vld [vmem:[#allocation17_spill] sm:$0xff] }
 0x54b   : > { %2593 = vmatpush1.bf16.msra.mxu0 %v7383_v23  ;;  %2634 = vmatpush1.bf16.msra.mxu1 %v7384_v24 }
 0x54c   : > { %2594 = vmatprep.subr.bf16.mxu0 %v7385_v25  ;;  %2635 = vmatprep.subr.bf16.mxu1 %v7386_v26 }
 0x54f   : > { %2595 = vmatpush1.bf16.msra.mxu0 %v7387_v27  ;;  %2636 = vmatpush1.bf16.msra.mxu1 %v7388_v28  ;;  %v7393_v28 = vld [vmem:[#allocation18_spill] sm:$0xff] }
 0x550   : > { %2663 = vmatprep.subr.bf16.mxu0 %v7389_v29  ;;  %2704 = vmatprep.subr.bf16.mxu1 %v7390_v9  ;;  %v7394_v9 = vld [vmem:[#allocation19_spill] sm:$0xff] }
 0x5e5   : > { %v2386_v40 = vpop.f32.mrb[32].mxu0  ;;  %v2427_v47 = vpop.f32.mrb[32].mxu1 }
 0x5e6   : > { %v4185_v37 = vadd.f32 %v2386_v40, %v7391_v49  ;;  %v2388_v22 = vpop.f32.mrb[33].mxu0  ;;  %v2429_v23 = vpop.f32.mrb[33].mxu1  ;;  %v4187_v57 = vadd.f32 %v2427_v47, %v7394_v9 }
 0x5e7   : > { %v4186_v24 = vadd.f32 %v2388_v22, %v7392_v20  ;;  %v2390_v62 = vpop.f32.mrb[34].mxu0  ;;  %v2431_v25 = vpop.f32.mrb[34].mxu1  ;;  %v4188_v29 = vadd.f32 %v2429_v23, %v7393_v28 }
 0x5e8   : > { %v4104_v60 = vmul.f32 -1.442695, %v4185_v37  ;;  %v2391_v26 = vpop.f32.mrb[35].mxu0  ;;  %v2432_v59 = vpop.f32.mrb[35].mxu1 }
 0x5e9   : > { %v4105_v27 = vmul.f32 -1.442695, %v4186_v24  ;;  %v4106_v58 = vmul.f32 -1.442695, %v4188_v29  ;;  %v7395_v26 = vld [vmem:[#allocation62_spill] sm:$0xff] }
 0x5ea   : > { %4589 = vpow2.f32 %v4104_v60  ;;  %v2463_v29 = vld [vmem:[#allocation2 + $0x20] sm:$0x3] }
 0x5eb   : > { %4591 = vpow2.f32 %v4105_v27 }
 0x5ec   : > { %4593 = vpow2.f32 %v4106_v58  ;;  %v2464_v58 = vld [vmem:[#allocation2 + $0x28] sm:$0x3] }
 0x5ed   : > { %4595 = vtanh.f32 %v4187_v57 }
 0x5f4   : > { %v4590_v56 = vpop.eup %4589 }
 0x5f5   : > { %v4592_v0 = vpop.eup %4591  ;;  %v2441_v40 = vadd.f32 1.0, %v4590_v56 }
 0x5f6   : > { %v2447_v49 = vadd.f32 1.0, %v4592_v0  ;;  %v4594_v62 = vpop.eup %4593 }
 0x5f7   : > { %4597 = vrcp.f32 %v2441_v40  ;;  %v4596_v22 = vpop.eup %4595  ;;  %v2454_v60 = vadd.f32 1.0, %v4594_v62 }
 0x5f8   : > { %4599 = vrcp.f32 %v2447_v49 }
 0x5f9   : > { %4601 = vrcp.f32 %v2454_v60  ;;  %v2465_v60 = vld [vmem:[#allocation2 + $0x30] sm:$0x3] }
 0x601   : > { %v4598_v25 = vpop.eup %4597 }
 0x602   : > { %v4600_v59 = vpop.eup %4599  ;;  %v2458_v24 = vmul.f32 %v4598_v25, %v4596_v22 }
 0x603   : > { %v2457_v27 = vmul.f32 %v4600_v59, %v7395_v26  ;;  %v2466_v59 = vld [vmem:[#allocation2 + $0x38] sm:$0x3]  ;;  %v4602_v26 = vpop.eup %4601 }
 0x605   : > { %v6193_v23 = vadd.f32 %v2458_v24, %v2457_v27  ;;  %v2501_v47 = vpop.f32.mrb[36].mxu0  ;;  %v2542_v37 = vpop.f32.mrb[36].mxu1 }
 0x606   : > { %v2549_v56 = vadd.f32 %v2501_v47, %v2463_v29  ;;  %v2503_v57 = vpop.f32.mrb[37].mxu0  ;;  %v2544_v0 = vpop.f32.mrb[37].mxu1  ;;  %v2551_v47 = vadd.f32 %v2542_v37, %v2465_v60  ;;  %v7397_v37 = vld [vmem:[#allocation64_spill] sm:$0xff]  ;;  %v7402_v60 = vld [vmem:[#allocation22_spill] sm:$0xff] }
 0x607   : > { %v2550_v40 = vadd.f32 %v2503_v57, %v2464_v58  ;;  %v2505_v49 = vpop.f32.mrb[38].mxu0  ;;  %v2546_v9 = vpop.f32.mrb[38].mxu1  ;;  %4603 = vtanh.f32 %v6193_v23  ;;  %v2552_v24 = vadd.f32 %v2544_v0, %v2466_v59  ;;  %v7398_v59 = vld [vmem:[#allocation66_spill] sm:$0xff] }
 0x608   : > { %v4107_v28 = vmul.f32 -1.442695, %v2549_v56  ;;  %v2506_v22 = vpop.f32.mrb[39].mxu0  ;;  %v2547_v62 = vpop.f32.mrb[39].mxu1 }
 0x609   : > { %v4108_v25 = vmul.f32 -1.442695, %v2550_v40  ;;  %v4109_v29 = vmul.f32 -1.442695, %v2552_v24  ;;  %v2573_v40 = vrot.slane %v6073_v19, 6  ;;  %v7399_v19 = vld [vmem:[#allocation67_spill] sm:$0xff] }
 0x60a   : > { %4605 = vpow2.f32 %v4107_v28  ;;  %v7396_v28 = vld [vmem:[#allocation63_spill] sm:$0xff] }
 0x60b   : > { %4607 = vpow2.f32 %v4108_v25 }
 0x60c   : > { %4609 = vpow2.f32 %v4109_v29  ;;  %v7403_v29 = vld [vmem:[#allocation23_spill] sm:$0xff] }
 0x60d   : > { %4611 = vtanh.f32 %v2551_v47  ;;  %v7404_v47 = vld [vmem:[#allocation24_spill] sm:$0xff] }
 0x611   : > { %v4604_v27 = vpop.eup %4603 }
 0x612   : > { %v2461_v20 = vmul.f32 %v4604_v27, %v4602_v26  ;;  %v7400_v26 = vld [vmem:[#allocation68_spill] sm:$0xff]  ;;  %v7401_v27 = vld [vmem:[#allocation21_spill] sm:$0xff] }
 0x614   : > { %v4606_v52 = vpop.eup %4605  ;;  %v2462_v58 = vpack.c.bf16 %v2461_v20, %v2461_v20 }
 0x615   : > { %v4608_v57 = vpop.eup %4607  ;;  %v2556_v9 = vadd.f32 1.0, %v4606_v52 }
 0x616   : > { %v2562_v56 = vadd.f32 1.0, %v4608_v57  ;;  %2613 = vmatmul.mubr.bf16.vlgmr.msra.gmra.mrb[40].mxu0 %v2462_v58  ;;  %2654 = vmatmul.mubr.bf16.vlgmr.msra.gmra.mrb[40].mxu1 %v2462_v58  ;;  %v4610_v52 = vpop.eup %4609  ;;  %v7405_v58 = vld [vmem:[#allocation25_spill] sm:$0xff]  ;;  %v7406_v57 = vld [vmem:[#allocation26_spill] sm:$0xff] }
 0x617   : > { %4613 = vrcp.f32 %v2556_v9  ;;  %2664 = vmatpush1.bf16.msra.mxu0 %v6022_v38  ;;  %2705 = vmatpush1.bf16.msra.mxu1 %v6025_v8  ;;  %v4612_v20 = vpop.eup %4611  ;;  %v2569_v62 = vadd.f32 1.0, %v4610_v52 }
 0x618   : > { %4615 = vrcp.f32 %v2562_v56  ;;  %2665 = vmatprep.subr.bf16.mxu0 %v6028_v45  ;;  %2706 = vmatprep.subr.bf16.mxu1 %v6031_v61  ;;  %v7407_v56 = vld [vmem:[#allocation27_spill] sm:$0xff] }
 0x619   : > { %2695 = vmatprep.mubr.bf16.mxu0 %v7179_v50  ;;  %2736 = vmatprep.mubr.bf16.mxu1 %v7179_v50  ;;  %4617 = vrcp.f32 %v2569_v62  ;;  %v6245_v62 = vld [vmem:[#allocation8 + $0x8] ss:$16 sps:$4 sm:$0xff]  }
 0x61a   : > { %7409 = vst [vmem:[#allocation29_spill] sm:$0xff] %v6245_v62 }
 0x61b   : > { %2666 = vmatpush1.bf16.msra.mxu0 %v6036_v4  ;;  %2707 = vmatpush1.bf16.msra.mxu1 %v6039_v36 }
 0x61c   : > { %2667 = vmatprep.subr.bf16.mxu0 %v6042_v1  ;;  %2708 = vmatprep.subr.bf16.mxu1 %v6045_v41 }
 0x61f   : > { %2668 = vmatpush1.bf16.msra.mxu0 %v6048_v14  ;;  %2709 = vmatpush1.bf16.msra.mxu1 %v6051_v44 }
 0x620   : > { %2669 = vmatprep.subr.bf16.mxu0 %v7396_v28  ;;  %2710 = vmatprep.subr.bf16.mxu1 %v7397_v37 }
 0x621   : > { %v4614_v0 = vpop.eup %4613 }
 0x622   : > { %v4616_v49 = vpop.eup %4615  ;;  %v2576_v22 = vmul.f32 %v4614_v0, %v4612_v20 }
 0x623   : > { %v2575_v25 = vmul.f32 %v4616_v49, %v2573_v40  ;;  %2670 = vmatpush1.bf16.msra.mxu0 %v7398_v59  ;;  %2711 = vmatpush1.bf16.msra.mxu1 %v6064_v55  ;;  %v4618_v9 = vpop.eup %4617  ;;  %v6234_v40 = vld [vmem:[#allocation8 + $0x4] ss:$16 sps:$4 sm:$0xff]   ;;  %v6237_v49 = vld [vmem:[#allocation8 + $0xc] ss:$16 sps:$4 sm:$0xff]  }
 0x624   : > { %2671 = vmatprep.subr.bf16.mxu0 %v6067_v21  ;;  %2712 = vmatprep.subr.bf16.mxu1 %v6070_v53 }
 0x625   : > { %v6215_v24 = vadd.f32 %v2576_v22, %v2575_v25  ;;  %v6242_v22 = vld [vmem:[#allocation8] ss:$16 sps:$4 sm:$0xff]   ;;  %v6248_v25 = vld [vmem:[#allocation8 + $0x24] ss:$16 sps:$4 sm:$0xff]  }
 0x626   : > { %7408 = vst [vmem:[#allocation28_spill] sm:$0xff] %v6242_v22  ;;  %7410 = vst [vmem:[#allocation30_spill] sm:$0xff] %v6248_v25 }
 0x627   : > { %2672 = vmatpush1.bf16.msra.mxu0 %v6075_v35  ;;  %2713 = vmatpush1.bf16.msra.mxu1 %v6078_v39  ;;  %4619 = vtanh.f32 %v6215_v24 }
 0x628   : > { %2673 = vmatprep.subr.bf16.mxu0 %v7399_v19  ;;  %2714 = vmatprep.subr.bf16.mxu1 %v7400_v26 }
 0x62b   : > { %2674 = vmatpush1.bf16.msra.mxu0 %v7401_v27  ;;  %2715 = vmatpush1.bf16.msra.mxu1 %v7402_v60 }
 0x62c   : > { %2675 = vmatprep.subr.bf16.mxu0 %v7403_v29  ;;  %2716 = vmatprep.subr.bf16.mxu1 %v7404_v47 }
 0x62f   : > { %2676 = vmatpush1.bf16.msra.mxu0 %v7405_v58  ;;  %2717 = vmatpush1.bf16.msra.mxu1 %v7406_v57 }
 0x630   : > { %2677 = vmatprep.subr.bf16.mxu0 %v7407_v56  ;;  %2718 = vmatprep.subr.bf16.mxu1 %v6109_v48 }
 0x631   : > { %v4620_v52 = vpop.eup %4619 }
 0x632   : > { %v2579_v20 = vmul.f32 %v4620_v52, %v4618_v9  ;;  %v6251_v9 = vld [vmem:[#allocation8 + $0x2c] ss:$16 sps:$4 sm:$0xff]   ;;  %v6256_v52 = vld [vmem:[#allocation8 + $0x20] ss:$16 sps:$4 sm:$0xff]  }
 0x633   : > { %2678 = vmatpush1.bf16.msra.mxu0 %v6112_v46  ;;  %2719 = vmatpush1.bf16.msra.mxu1 %v6115_v54  ;;  %7411 = vst [vmem:[#allocation31_spill] sm:$0xff] %v6251_v9  ;;  %7412 = vst [vmem:[#allocation32_spill] sm:$0xff] %v6256_v52 }
 0x634   : > { %v6232_v0 = vpack.c.bf16 %v2579_v20, %v2579_v20  ;;  %2778 = vmatprep.subr.bf16.mxu0 %v6234_v40  ;;  %2819 = vmatprep.subr.bf16.mxu1 %v6237_v49  ;;  %v6259_v20 = vld [vmem:[#allocation8 + $0x28] ss:$16 sps:$4 sm:$0xff]  }
 0x635   : > { %7413 = vst [vmem:[#allocation33_spill] sm:$0xff] %v6259_v20 }
 0x636   : > { %2696 = vmatmul.mubr.bf16.vlgmr.msra.gmra.mrb[40].mxu0 %v6232_v0  ;;  %2737 = vmatmul.mubr.bf16.vlgmr.msra.gmra.mrb[40].mxu1 %v6232_v0 }
 0x637   : > { %2779 = vmatpush1.bf16.msra.mxu0 %v6242_v22  ;;  %2820 = vmatpush1.bf16.msra.mxu1 %v6245_v62  ;;  %v6262_v62 = vld [vmem:[#allocation8 + $0x44] ss:$16 sps:$4 sm:$0xff]   ;;  %v6271_v22 = vld [vmem:[#allocation8 + $0x48] ss:$16 sps:$4 sm:$0xff]  }
 0x638   : > { %2780 = vmatprep.subr.bf16.mxu0 %v6248_v25  ;;  %2821 = vmatprep.subr.bf16.mxu1 %v6251_v9  ;;  %7414 = vst [vmem:[#allocation34_spill] sm:$0xff] %v6262_v62  ;;  %v6265_v25 = vld [vmem:[#allocation8 + $0x4c] ss:$16 sps:$4 sm:$0xff]   ;;  %v6268_v9 = vld [vmem:[#allocation8 + $0x40] ss:$16 sps:$4 sm:$0xff]   ;;  %7417 = vst [vmem:[#allocation37_spill] sm:$0xff] %v6271_v22 }
 0x639   : > { %2810 = vmatprep.mubr.bf16.mxu0 %v7179_v50  ;;  %2851 = vmatprep.mubr.bf16.mxu1 %v7179_v50  ;;  %7415 = vst [vmem:[#allocation35_spill] sm:$0xff] %v6265_v25  ;;  %7416 = vst [vmem:[#allocation36_spill] sm:$0xff] %v6268_v9 }
 0x63b   : > { %2781 = vmatpush1.bf16.msra.mxu0 %v6256_v52  ;;  %2822 = vmatpush1.bf16.msra.mxu1 %v6259_v20  ;;  %v6274_v52 = vld [vmem:[#allocation8 + $0x64] ss:$16 sps:$4 sm:$0xff]   ;;  %v6277_v20 = vld [vmem:[#allocation8 + $0x6c] ss:$16 sps:$4 sm:$0xff]  }
 0x63c   : > { %2782 = vmatprep.subr.bf16.mxu0 %v6262_v62  ;;  %2823 = vmatprep.subr.bf16.mxu1 %v6265_v25  ;;  %7418 = vst [vmem:[#allocation15_spill] sm:$0xff] %v6274_v52  ;;  %7419 = vst [vmem:[#allocation39_spill] sm:$0xff] %v6277_v20  ;;  %v6280_v62 = vld [vmem:[#allocation8 + $0x60] ss:$16 sps:$4 sm:$0xff]   ;;  %v6283_v25 = vld [vmem:[#allocation8 + $0x68] ss:$16 sps:$4 sm:$0xff]  }
 0x63d   : > { %7420 = vst [vmem:[#allocation40_spill] sm:$0xff] %v6280_v62  ;;  %7421 = vst [vmem:[#allocation41_spill] sm:$0xff] %v6283_v25 }
 0x63f   : > { %2783 = vmatpush1.bf16.msra.mxu0 %v6268_v9  ;;  %2824 = vmatpush1.bf16.msra.mxu1 %v6271_v22  ;;  %v6286_v9 = vld [vmem:[#allocation8 + $0x84] ss:$16 sps:$4 sm:$0xff]   ;;  %v6289_v22 = vld [vmem:[#allocation8 + $0x8c] ss:$16 sps:$4 sm:$0xff]  }
 0x640   : > { %2784 = vmatprep.subr.bf16.mxu0 %v6274_v52  ;;  %2825 = vmatprep.subr.bf16.mxu1 %v6277_v20  ;;  %7422 = vst [vmem:[#allocation42_spill] sm:$0xff] %v6286_v9  ;;  %7423 = vst [vmem:[#allocation43_spill] sm:$0xff] %v6289_v22  ;;  %v6292_v52 = vld [vmem:[#allocation8 + $0x80] ss:$16 sps:$4 sm:$0xff]   ;;  %v6295_v20 = vld [vmem:[#allocation8 + $0x88] ss:$16 sps:$4 sm:$0xff]  }
 0x641   : > { %7424 = vst [vmem:[#allocation44_spill] sm:$0xff] %v6292_v52  ;;  %7425 = vst [vmem:[#allocation45_spill] sm:$0xff] %v6295_v20 }
 0x643   : > { %2785 = vmatpush1.bf16.msra.mxu0 %v6280_v62  ;;  %2826 = vmatpush1.bf16.msra.mxu1 %v6283_v25  ;;  %v6298_v62 = vld [vmem:[#allocation8 + $0xa4] ss:$16 sps:$4 sm:$0xff]   ;;  %v6301_v25 = vld [vmem:[#allocation8 + $0xac] ss:$16 sps:$4 sm:$0xff]  }
 0x644   : > { %2786 = vmatprep.subr.bf16.mxu0 %v6286_v9  ;;  %2827 = vmatprep.subr.bf16.mxu1 %v6289_v22  ;;  %v6304_v9 = vld [vmem:[#allocation8 + $0xa0] ss:$16 sps:$4 sm:$0xff]   ;;  %v6307_v22 = vld [vmem:[#allocation8 + $0xa8] ss:$16 sps:$4 sm:$0xff]  }
 0x647   : > { %2787 = vmatpush1.bf16.msra.mxu0 %v6292_v52  ;;  %2828 = vmatpush1.bf16.msra.mxu1 %v6295_v20  ;;  %v6310_v52 = vld [vmem:[#allocation8 + $0xc4] ss:$16 sps:$4 sm:$0xff]   ;;  %v6313_v20 = vld [vmem:[#allocation8 + $0xcc] ss:$16 sps:$4 sm:$0xff]  }
 0x648   : > { %2788 = vmatprep.subr.bf16.mxu0 %v6298_v62  ;;  %2829 = vmatprep.subr.bf16.mxu1 %v6301_v25 }
 0x64b   : > { %2789 = vmatpush1.bf16.msra.mxu0 %v6304_v9  ;;  %2830 = vmatpush1.bf16.msra.mxu1 %v6307_v22 }
 0x64c   : > { %2790 = vmatprep.subr.bf16.mxu0 %v6310_v52  ;;  %2831 = vmatprep.subr.bf16.mxu1 %v6313_v20 }
 0x64f   : > { %2791 = vmatpush1.bf16.msra.mxu0 %v5892_v30  ;;  %2832 = vmatpush1.bf16.msra.mxu1 %v5895_v2  ;;  %v7426_v30 = vld [vmem:[#allocation52_spill] sm:$0xff]  ;;  %v7427_v2 = vld [vmem:[#allocation53_spill] sm:$0xff] }
 0x650   : > { %2792 = vmatprep.subr.bf16.mxu0 %v5898_v13  ;;  %2833 = vmatprep.subr.bf16.mxu1 %v5901_v10  ;;  %v7428_v13 = vld [vmem:[#allocation54_spill] sm:$0xff]  ;;  %v7429_v10 = vld [vmem:[#allocation60_spill] sm:$0xff] }
 0x653   : > { %2793 = vmatpush1.bf16.msra.mxu0 %v5904_v18  ;;  %2834 = vmatpush1.bf16.msra.mxu1 %v5907_v31  ;;  %v7430_v18 = vld [vmem:[#allocation65_spill] sm:$0xff]  ;;  %v7431_v31 = vld [vmem:[#allocation38_spill] sm:$0xff] }
 0x654   : > { %2903 = vmatprep.subr.bf16.mxu0 %v5910_v32  ;;  %2944 = vmatprep.subr.bf16.mxu1 %v5913_v33  ;;  %v7432_v32 = vld [vmem:[#allocation20_spill] sm:$0xff]  ;;  %v7433_v33 = vld [vmem:[#allocation47_spill] sm:$0xff] }
 0x656   : > { %2811 = vmatmul.mubr.bf16.vlgmr.msra.gmra.mrb[44].mxu0 %v6232_v0  ;;  %2852 = vmatmul.mubr.bf16.vlgmr.msra.gmra.mrb[44].mxu1 %v6232_v0 }
 0x657   : > { %2904 = vmatpush1.bf16.msra.mxu0 %v5916_v34  ;;  %2945 = vmatpush1.bf16.msra.mxu1 %v5919_v12  ;;  %v7434_v34 = vld [vmem:[#allocation48_spill] sm:$0xff]  ;;  %v7435_v12 = vld [vmem:[#allocation49_spill] sm:$0xff] }
 0x658   : > { %2905 = vmatprep.subr.bf16.mxu0 %v5922_v17  ;;  %2946 = vmatprep.subr.bf16.mxu1 %v5925_v6  ;;  %v7436_v17 = vld [vmem:[#allocation50_spill] sm:$0xff]  ;;  %v7437_v6 = vld [vmem:[#allocation51_spill] sm:$0xff] }
 0x659   : > { %2935 = vmatprep.mubr.bf16.mxu0 %v7179_v50  ;;  %2976 = vmatprep.mubr.bf16.mxu1 %v7179_v50 }
 0x65b   : > { %2906 = vmatpush1.bf16.msra.mxu0 %v5930_v15  ;;  %2947 = vmatpush1.bf16.msra.mxu1 %v7364_v42  ;;  %v7438_v15 = vld [vmem:[#allocation55_spill] sm:$0xff]  ;;  %v7439_v42 = vld [vmem:[#allocation56_spill] sm:$0xff] }
 0x65c   : > { %2907 = vmatprep.subr.bf16.mxu0 %v7365_v7  ;;  %2948 = vmatprep.subr.bf16.mxu1 %v7366_v63  ;;  %v7440_v7 = vld [vmem:[#allocation57_spill] sm:$0xff]  ;;  %v7441_v63 = vld [vmem:[#allocation58_spill] sm:$0xff] }
 0x65f   : > { %2908 = vmatpush1.bf16.msra.mxu0 %v7367_v43  ;;  %2949 = vmatpush1.bf16.msra.mxu1 %v7368_v16  ;;  %v7442_v43 = vld [vmem:[#allocation59_spill] sm:$0xff]  ;;  %v7443_v16 = vld [vmem:[#allocation61_spill] sm:$0xff] }
 0x660   : > { %2909 = vmatprep.subr.bf16.mxu0 %v7369_v51  ;;  %2950 = vmatprep.subr.bf16.mxu1 %v7370_v11 }
 0x663   : > { %2910 = vmatpush1.bf16.msra.mxu0 %v7371_v3  ;;  %2951 = vmatpush1.bf16.msra.mxu1 %v7372_v5  ;;  %v7444_v3 = vld [vmem:[#allocation16_spill] sm:$0xff] }
 0x664   : > { %2911 = vmatprep.subr.bf16.mxu0 %v7426_v30  ;;  %2952 = vmatprep.subr.bf16.mxu1 %v7427_v2  ;;  %v7445_v2 = vld [vmem:[#allocation17_spill] sm:$0xff] }
 0x667   : > { %2912 = vmatpush1.bf16.msra.mxu0 %v7428_v13  ;;  %2953 = vmatpush1.bf16.msra.mxu1 %v7429_v10 }
 0x668   : > { %2913 = vmatprep.subr.bf16.mxu0 %v7430_v18  ;;  %2954 = vmatprep.subr.bf16.mxu1 %v7431_v31 }
 0x66b   : > { %2914 = vmatpush1.bf16.msra.mxu0 %v7432_v32  ;;  %2955 = vmatpush1.bf16.msra.mxu1 %v7433_v33 }
 0x66c   : > { %2915 = vmatprep.subr.bf16.mxu0 %v7434_v34  ;;  %2956 = vmatprep.subr.bf16.mxu1 %v7435_v12  ;;  %v7446_v12 = vld [vmem:[#allocation18_spill] sm:$0xff] }
 0x66f   : > { %2916 = vmatpush1.bf16.msra.mxu0 %v7436_v17  ;;  %2957 = vmatpush1.bf16.msra.mxu1 %v7437_v6 }
 0x670   : > { %2917 = vmatprep.subr.bf16.mxu0 %v7438_v15  ;;  %2958 = vmatprep.subr.bf16.mxu1 %v7439_v42  ;;  %v7447_v15 = vld [vmem:[#allocation19_spill] sm:$0xff] }
 0x673   : > { %2918 = vmatpush1.bf16.msra.mxu0 %v7440_v7  ;;  %2959 = vmatpush1.bf16.msra.mxu1 %v7441_v63 }
 0x674   : > { %2989 = vmatprep.subr.bf16.mxu0 %v7442_v43  ;;  %3030 = vmatprep.subr.bf16.mxu1 %v7443_v16 }
 0x709   : > { %v2697_v51 = vpop.f32.mrb[40].mxu0  ;;  %v2738_v11 = vpop.f32.mrb[40].mxu1 }
 0x70a   : > { %v4189_v5 = vadd.f32 %v2697_v51, %v7444_v3  ;;  %v2699_v0 = vpop.f32.mrb[41].mxu0  ;;  %v2740_v30 = vpop.f32.mrb[41].mxu1  ;;  %v4191_v42 = vadd.f32 %v2738_v11, %v7447_v15 }
 0x70b   : > { %v4190_v13 = vadd.f32 %v2699_v0, %v7445_v2  ;;  %v2701_v10 = vpop.f32.mrb[42].mxu0  ;;  %v2742_v18 = vpop.f32.mrb[42].mxu1  ;;  %v4192_v17 = vadd.f32 %v2740_v30, %v7446_v12 }
 0x70c   : > { %v4110_v31 = vmul.f32 -1.442695, %v4189_v5  ;;  %v2702_v32 = vpop.f32.mrb[43].mxu0  ;;  %v2743_v33 = vpop.f32.mrb[43].mxu1 }
 0x70d   : > { %v4111_v34 = vmul.f32 -1.442695, %v4190_v13  ;;  %v4112_v6 = vmul.f32 -1.442695, %v4192_v17 }
 0x70e   : > { %4621 = vpow2.f32 %v4110_v31 }
 0x70f   : > { %4623 = vpow2.f32 %v4111_v34 }
 0x710   : > { %4625 = vpow2.f32 %v4112_v6  ;;  %v2774_v6 = vld [vmem:[#allocation2 + $0x20] sm:$0xc] }
 0x711   : > { %4627 = vtanh.f32 %v4191_v42 }
 0x718   : > { %v4622_v7 = vpop.eup %4621 }
 0x719   : > { %v4624_v63 = vpop.eup %4623  ;;  %v2752_v43 = vadd.f32 1.0, %v4622_v7 }
 0x71a   : > { %v2758_v16 = vadd.f32 1.0, %v4624_v63  ;;  %v4626_v51 = vpop.eup %4625 }
 0x71b   : > { %4629 = vrcp.f32 %v2752_v43  ;;  %v4628_v5 = vpop.eup %4627  ;;  %v2765_v18 = vadd.f32 1.0, %v4626_v51 }
 0x71c   : > { %4631 = vrcp.f32 %v2758_v16  ;;  %v2775_v16 = vld [vmem:[#allocation2 + $0x28] sm:$0xc] }
 0x71d   : > { %4633 = vrcp.f32 %v2765_v18  ;;  %v2777_v18 = vld [vmem:[#allocation2 + $0x38] sm:$0xc] }
 0x725   : > { %v4630_v0 = vpop.eup %4629 }
 0x726   : > { %v4632_v10 = vpop.eup %4631  ;;  %v2769_v13 = vmul.f32 %v4630_v0, %v4628_v5 }
 0x727   : > { %v2768_v31 = vmul.f32 %v4632_v10, %v6193_v23 }
 0x729   : > { %v6365_v30 = vadd.f32 %v2769_v13, %v2768_v31  ;;  %v2812_v32 = vpop.f32.mrb[44].mxu0  ;;  %v2853_v11 = vpop.f32.mrb[44].mxu1 }
 0x72a   : > { %v2864_v33 = vrot.slane %v2812_v32, 6  ;;  %v2814_v34 = vpop.f32.mrb[45].mxu0  ;;  %v2855_v17 = vpop.f32.mrb[45].mxu1  ;;  %v2866_v15 = vrot.slane %v2853_v11, 6  ;;  %v6441_v11 = vld [vmem:[#allocation8 + $0xec] ss:$16 sps:$4 sm:$0xff]  }
 0x72b   : > { %7448 = vst [vmem:[#allocation46_spill] sm:$0xff] %v6365_v30  ;;  %v2865_v42 = vrot.slane %v2814_v34, 6  ;;  %v2816_v7 = vpop.f32.mrb[46].mxu0  ;;  %v2857_v63 = vpop.f32.mrb[46].mxu1  ;;  %4635 = vtanh.f32 %v6365_v30  ;;  %v2867_v13 = vrot.slane %v2855_v17, 6 }
 0x72c   : > { %v2872_v43 = vadd.f32 %v2864_v33, %v2774_v6  ;;  %v2817_v5 = vpop.f32.mrb[47].mxu0  ;;  %v2858_v51 = vpop.f32.mrb[47].mxu1  ;;  %v2776_v7 = vld [vmem:[#allocation2 + $0x30] sm:$0xc] }
 0x72d   : > { %v2873_v0 = vadd.f32 %v2865_v42, %v2775_v16  ;;  %v2875_v31 = vadd.f32 %v2867_v13, %v2777_v18  ;;  %v4634_v32 = vpop.eup %4633  ;;  %v2874_v2 = vadd.f32 %v2866_v15, %v2776_v7  ;;  %v6435_v15 = vld [vmem:[#allocation8 + $0xc8] ss:$16 sps:$4 sm:$0xff]   ;;  %v6450_v5 = vld [vmem:[#allocation12 + $0x4] ss:$16 sps:$4 sm:$0xff]   ;;  %v6453_v51 = vld [vmem:[#allocation12 + $0xc] ss:$16 sps:$4 sm:$0xff]  }
 0x72e   : > { %v4113_v23 = vmul.f32 -1.442695, %v2872_v43  ;;  %v6444_v43 = vld [vmem:[#allocation8 + $0xe0] ss:$16 sps:$4 sm:$0xff]   ;;  %v6447_v16 = vld [vmem:[#allocation8 + $0xe8] ss:$16 sps:$4 sm:$0xff]  }
 0x72f   : > { %v4114_v10 = vmul.f32 -1.442695, %v2873_v0  ;;  %v4115_v63 = vmul.f32 -1.442695, %v2875_v31  ;;  %v6456_v0 = vld [vmem:[#allocation12] ss:$16 sps:$4 sm:$0xff]  }
 0x730   : > { %4637 = vpow2.f32 %v4113_v23  ;;  %v6459_v23 = vld [vmem:[#allocation12 + $0x8] ss:$16 sps:$4 sm:$0xff]   ;;  %v6465_v13 = vld [vmem:[#allocation12 + $0x2c] ss:$16 sps:$4 sm:$0xff]   ;;  %v6470_v18 = vld [vmem:[#allocation12 + $0x20] ss:$16 sps:$4 sm:$0xff]  }
 0x731   : > { %4639 = vpow2.f32 %v4114_v10  ;;  %v6462_v10 = vld [vmem:[#allocation12 + $0x24] ss:$16 sps:$4 sm:$0xff]   ;;  %v6473_v31 = vld [vmem:[#allocation12 + $0x28] ss:$16 sps:$4 sm:$0xff]   ;;  %v6482_v7 = vld [vmem:[#allocation12 + $0x40] ss:$16 sps:$4 sm:$0xff]  }
 0x732   : > { %4641 = vpow2.f32 %v4115_v63  ;;  %7467 = vst [vmem:[#allocation62_spill] sm:$0xff] %v6473_v31  ;;  %7470 = vst [vmem:[#allocation66_spill] sm:$0xff] %v6482_v7  ;;  %v6485_v63 = vld [vmem:[#allocation12 + $0x48] ss:$16 sps:$4 sm:$0xff]  }
 0x733   : > { %4643 = vtanh.f32 %v2874_v2  ;;  %v7466_v2 = vld [vmem:[#allocation45_spill] sm:$0xff]  ;;  %7471 = vst [vmem:[#allocation67_spill] sm:$0xff] %v6485_v63 }
 0x735   : > { %v4636_v12 = vpop.eup %4635 }
 0x736   : > { %v2772_v34 = vmul.f32 %v4636_v12, %v4634_v32  ;;  %v6432_v12 = vld [vmem:[#allocation8 + $0xc0] ss:$16 sps:$4 sm:$0xff]   ;;  %v6476_v32 = vld [vmem:[#allocation12 + $0x44] ss:$16 sps:$4 sm:$0xff]  }
 0x737   : > { %7468 = vst [vmem:[#allocation63_spill] sm:$0xff] %v6476_v32 }
 0x738   : > { %v2773_v30 = vpack.c.bf16 %v2772_v34, %v2772_v34  ;;  %v6479_v34 = vld [vmem:[#allocation12 + $0x4c] ss:$16 sps:$4 sm:$0xff]  }
 0x739   : > { %7469 = vst [vmem:[#allocation64_spill] sm:$0xff] %v6479_v34 }
 0x73a   : > { %v4638_v33 = vpop.eup %4637  ;;  %2936 = vmatmul.mubr.bf16.vlgmr.msra.gmra.mrb[48].mxu0 %v2773_v30  ;;  %2977 = vmatmul.mubr.bf16.vlgmr.msra.gmra.mrb[48].mxu1 %v2773_v30  ;;  %v6438_v30 = vld [vmem:[#allocation8 + $0xe4] ss:$16 sps:$4 sm:$0xff]  }
 0x73b   : > { %v4640_v6 = vpop.eup %4639  ;;  %v2879_v42 = vadd.f32 1.0, %v4638_v33  ;;  %2990 = vmatpush1.bf16.msra.mxu0 %v6022_v38  ;;  %3031 = vmatpush1.bf16.msra.mxu1 %v6025_v8  ;;  %v6488_v33 = vld [vmem:[#allocation12 + $0x64] ss:$16 sps:$4 sm:$0xff]  }
 0x73c   : > { %v2885_v17 = vadd.f32 1.0, %v4640_v6  ;;  %2991 = vmatprep.subr.bf16.mxu0 %v6028_v45  ;;  %3032 = vmatprep.subr.bf16.mxu1 %v6031_v61  ;;  %v4642_v38 = vpop.eup %4641  ;;  %v2896_v61 = vrot.slane %v6215_v24, 6  ;;  %v7456_v24 = vld [vmem:[#allocation35_spill] sm:$0xff]  ;;  %7472 = vst [vmem:[#allocation68_spill] sm:$0xff] %v6488_v33  ;;  %v6491_v6 = vld [vmem:[#allocation12 + $0x6c] ss:$16 sps:$4 sm:$0xff]  }
 0x73d   : > { %4645 = vrcp.f32 %v2879_v42  ;;  %3021 = vmatprep.mubr.bf16.mxu0 %v7179_v50  ;;  %3062 = vmatprep.mubr.bf16.mxu1 %v7179_v50  ;;  %v4644_v8 = vpop.eup %4643  ;;  %7473 = vst [vmem:[#allocation21_spill] sm:$0xff] %v6491_v6  ;;  %v6494_v42 = vld [vmem:[#allocation12 + $0x60] ss:$16 sps:$4 sm:$0xff]  }
 0x73e   : > { %4647 = vrcp.f32 %v2885_v17  ;;  %7474 = vst [vmem:[#allocation22_spill] sm:$0xff] %v6494_v42  ;;  %v6497_v17 = vld [vmem:[#allocation12 + $0x68] ss:$16 sps:$4 sm:$0xff]  }
 0x73f   : > { %2992 = vmatpush1.bf16.msra.mxu0 %v6036_v4  ;;  %3033 = vmatpush1.bf16.msra.mxu1 %v6039_v36  ;;  %7475 = vst [vmem:[#allocation23_spill] sm:$0xff] %v6497_v17 }
 0x740   : > { %2993 = vmatprep.subr.bf16.mxu0 %v6042_v1  ;;  %3034 = vmatprep.subr.bf16.mxu1 %v6045_v41  ;;  %v2892_v1 = vadd.f32 1.0, %v4642_v38  ;;  %v6500_v38 = vld [vmem:[#allocation12 + $0x84] ss:$16 sps:$4 sm:$0xff]  }
 0x741   : > { %7476 = vst [vmem:[#allocation24_spill] sm:$0xff] %v6500_v38 }
 0x742   : > { %4649 = vrcp.f32 %v2892_v1  ;;  %v6518_v1 = vld [vmem:[#allocation12 + $0xa0] ss:$16 sps:$4 sm:$0xff]  }
 0x743   : > { %2994 = vmatpush1.bf16.msra.mxu0 %v6048_v14  ;;  %3035 = vmatpush1.bf16.msra.mxu1 %v6051_v44  ;;  %7482 = vst [vmem:[#allocation54_spill] sm:$0xff] %v6518_v1 }
 0x744   : > { %2995 = vmatprep.subr.bf16.mxu0 %v7396_v28  ;;  %3036 = vmatprep.subr.bf16.mxu1 %v7397_v37  ;;  %v7450_v28 = vld [vmem:[#allocation29_spill] sm:$0xff]  ;;  %v7452_v37 = vld [vmem:[#allocation31_spill] sm:$0xff] }
 0x747   : > { %v4646_v45 = vpop.eup %4645  ;;  %2996 = vmatpush1.bf16.msra.mxu0 %v7398_v59  ;;  %3037 = vmatpush1.bf16.msra.mxu1 %v6064_v55  ;;  %v7455_v59 = vld [vmem:[#allocation34_spill] sm:$0xff] }
 0x748   : > { %v4648_v4 = vpop.eup %4647  ;;  %v2899_v36 = vmul.f32 %v4646_v45, %v4644_v8  ;;  %2997 = vmatprep.subr.bf16.mxu0 %v6067_v21  ;;  %3038 = vmatprep.subr.bf16.mxu1 %v6070_v53  ;;  %v7449_v53 = vld [vmem:[#allocation28_spill] sm:$0xff]  ;;  %v6506_v45 = vld [vmem:[#allocation12 + $0x80] ss:$16 sps:$4 sm:$0xff]  }
 0x749   : > { %v2898_v41 = vmul.f32 %v4648_v4, %v2896_v61  ;;  %v6503_v8 = vld [vmem:[#allocation12 + $0x8c] ss:$16 sps:$4 sm:$0xff]   ;;  %7478 = vst [vmem:[#allocation26_spill] sm:$0xff] %v6506_v45  ;;  %v6509_v61 = vld [vmem:[#allocation12 + $0x88] ss:$16 sps:$4 sm:$0xff]  }
 0x74a   : > { %7477 = vst [vmem:[#allocation25_spill] sm:$0xff] %v6503_v8  ;;  %7479 = vst [vmem:[#allocation27_spill] sm:$0xff] %v6509_v61  ;;  %v6512_v4 = vld [vmem:[#allocation12 + $0xa4] ss:$16 sps:$4 sm:$0xff]  }
 0x74b   : > { %v6387_v14 = vadd.f32 %v2899_v36, %v2898_v41  ;;  %2998 = vmatpush1.bf16.msra.mxu0 %v6075_v35  ;;  %3039 = vmatpush1.bf16.msra.mxu1 %v6078_v39  ;;  %7480 = vst [vmem:[#allocation52_spill] sm:$0xff] %v6512_v4  ;;  %v6515_v36 = vld [vmem:[#allocation12 + $0xac] ss:$16 sps:$4 sm:$0xff]   ;;  %v6521_v41 = vld [vmem:[#allocation12 + $0xa8] ss:$16 sps:$4 sm:$0xff]  }
 0x74c   : > { %2999 = vmatprep.subr.bf16.mxu0 %v7399_v19  ;;  %3040 = vmatprep.subr.bf16.mxu1 %v7400_v26  ;;  %v4650_v44 = vpop.eup %4649  ;;  %v7457_v19 = vld [vmem:[#allocation36_spill] sm:$0xff]  ;;  %v7458_v26 = vld [vmem:[#allocation37_spill] sm:$0xff]  ;;  %7481 = vst [vmem:[#allocation53_spill] sm:$0xff] %v6515_v36  ;;  %7483 = vst [vmem:[#allocation60_spill] sm:$0xff] %v6521_v41 }
 0x74d   : > { %4651 = vtanh.f32 %v6387_v14 }
 0x74f   : > { %3000 = vmatpush1.bf16.msra.mxu0 %v7401_v27  ;;  %3041 = vmatpush1.bf16.msra.mxu1 %v7402_v60  ;;  %v7459_v27 = vld [vmem:[#allocation15_spill] sm:$0xff] }
 0x750   : > { %3001 = vmatprep.subr.bf16.mxu0 %v7403_v29  ;;  %3042 = vmatprep.subr.bf16.mxu1 %v7404_v47  ;;  %v7460_v60 = vld [vmem:[#allocation39_spill] sm:$0xff]  ;;  %v7461_v29 = vld [vmem:[#allocation40_spill] sm:$0xff]  ;;  %v7462_v47 = vld [vmem:[#allocation41_spill] sm:$0xff] }
 0x753   : > { %3002 = vmatpush1.bf16.msra.mxu0 %v7405_v58  ;;  %3043 = vmatpush1.bf16.msra.mxu1 %v7406_v57  ;;  %v7463_v58 = vld [vmem:[#allocation42_spill] sm:$0xff]  ;;  %v7464_v57 = vld [vmem:[#allocation43_spill] sm:$0xff] }
 0x754   : > { %3003 = vmatprep.subr.bf16.mxu0 %v7407_v56  ;;  %3044 = vmatprep.subr.bf16.mxu1 %v6109_v48  ;;  %v7451_v48 = vld [vmem:[#allocation30_spill] sm:$0xff]  ;;  %v7465_v56 = vld [vmem:[#allocation44_spill] sm:$0xff] }
 0x757   : > { %v4652_v35 = vpop.eup %4651  ;;  %3004 = vmatpush1.bf16.msra.mxu0 %v6112_v46  ;;  %3045 = vmatpush1.bf16.msra.mxu1 %v6115_v54  ;;  %v7453_v46 = vld [vmem:[#allocation32_spill] sm:$0xff]  ;;  %v7454_v54 = vld [vmem:[#allocation33_spill] sm:$0xff] }
 0x758   : > { %3104 = vmatprep.subr.bf16.mxu0 %v6234_v40  ;;  %3145 = vmatprep.subr.bf16.mxu1 %v6237_v49  ;;  %v2902_v39 = vmul.f32 %v4652_v35, %v4650_v44  ;;  %v6524_v44 = vld [vmem:[#allocation12 + $0xc4] ss:$16 sps:$4 sm:$0xff]   ;;  %v6527_v35 = vld [vmem:[#allocation12 + $0xcc] ss:$16 sps:$4 sm:$0xff]  }
 0x759   : > { %7484 = vst [vmem:[#allocation65_spill] sm:$0xff] %v6524_v44  ;;  %7485 = vst [vmem:[#allocation38_spill] sm:$0xff] %v6527_v35 }
 0x75a   : > { %v2985_v55 = vpack.c.bf16 %v2902_v39, %v2902_v39  ;;  %v6530_v39 = vld [vmem:[#allocation12 + $0xc0] ss:$16 sps:$4 sm:$0xff]  }
 0x75b   : > { %7486 = vst [vmem:[#allocation20_spill] sm:$0xff] %v6530_v39 }
 0x75c   : > { %v2987_v21 = vrot.slane %v2985_v55, 1  ;;  %v6533_v55 = vld [vmem:[#allocation12 + $0xc8] ss:$16 sps:$4 sm:$0xff]  }
 0x75d   : > { %7487 = vst [vmem:[#allocation47_spill] sm:$0xff] %v6533_v55 }
 0x75e   : > { %3022 = vmatmul.mubr.bf16.vlgmr.msra.gmra.mrb[48].mxu0 %v2987_v21  ;;  %3063 = vmatmul.mubr.bf16.vlgmr.msra.gmra.mrb[48].mxu1 %v2987_v21 }
 0x75f   : > { %3105 = vmatpush1.bf16.msra.mxu0 %v7449_v53  ;;  %3146 = vmatpush1.bf16.msra.mxu1 %v7450_v28 }
 0x760   : > { %3106 = vmatprep.subr.bf16.mxu0 %v7451_v48  ;;  %3147 = vmatprep.subr.bf16.mxu1 %v7452_v37 }
 0x761   : > { %3136 = vmatprep.mubr.bf16.mxu0 %v7179_v50  ;;  %3177 = vmatprep.mubr.bf16.mxu1 %v7179_v50 }
 0x763   : > { %3107 = vmatpush1.bf16.msra.mxu0 %v7453_v46  ;;  %3148 = vmatpush1.bf16.msra.mxu1 %v7454_v54 }
 0x764   : > { %3108 = vmatprep.subr.bf16.mxu0 %v7455_v59  ;;  %3149 = vmatprep.subr.bf16.mxu1 %v7456_v24 }
 0x767   : > { %3109 = vmatpush1.bf16.msra.mxu0 %v7457_v19  ;;  %3150 = vmatpush1.bf16.msra.mxu1 %v7458_v26 }
 0x768   : > { %3110 = vmatprep.subr.bf16.mxu0 %v7459_v27  ;;  %3151 = vmatprep.subr.bf16.mxu1 %v7460_v60 }
 0x76b   : > { %3111 = vmatpush1.bf16.msra.mxu0 %v7461_v29  ;;  %3152 = vmatpush1.bf16.msra.mxu1 %v7462_v47 }
 0x76c   : > { %3112 = vmatprep.subr.bf16.mxu0 %v7463_v58  ;;  %3153 = vmatprep.subr.bf16.mxu1 %v7464_v57 }
 0x76f   : > { %3113 = vmatpush1.bf16.msra.mxu0 %v7465_v56  ;;  %3154 = vmatpush1.bf16.msra.mxu1 %v7466_v2 }
 0x770   : > { %3114 = vmatprep.subr.bf16.mxu0 %v6298_v62  ;;  %3155 = vmatprep.subr.bf16.mxu1 %v6301_v25 }
 0x773   : > { %3115 = vmatpush1.bf16.msra.mxu0 %v6304_v9  ;;  %3156 = vmatpush1.bf16.msra.mxu1 %v6307_v22 }
 0x774   : > { %3116 = vmatprep.subr.bf16.mxu0 %v6310_v52  ;;  %3157 = vmatprep.subr.bf16.mxu1 %v6313_v20 }
 0x777   : > { %3117 = vmatpush1.bf16.msra.mxu0 %v6432_v12  ;;  %3158 = vmatpush1.bf16.msra.mxu1 %v6435_v15 }
 0x778   : > { %3118 = vmatprep.subr.bf16.mxu0 %v6438_v30  ;;  %3159 = vmatprep.subr.bf16.mxu1 %v6441_v11 }
 0x77b   : > { %3119 = vmatpush1.bf16.msra.mxu0 %v6444_v43  ;;  %3160 = vmatpush1.bf16.msra.mxu1 %v6447_v16 }
 0x77c   : > { %3229 = vmatprep.subr.bf16.mxu0 %v6450_v5  ;;  %3270 = vmatprep.subr.bf16.mxu1 %v6453_v51 }
 0x77e   : > { %3137 = vmatmul.mubr.bf16.vlgmr.msra.gmra.mrb[52].mxu0 %v2987_v21  ;;  %3178 = vmatmul.mubr.bf16.vlgmr.msra.gmra.mrb[52].mxu1 %v2987_v21  ;;  %v6536_v21 = vld [vmem:[#allocation12 + $0xe4] ss:$16 sps:$4 sm:$0xff]  }
 0x77f   : > { %3230 = vmatpush1.bf16.msra.mxu0 %v6456_v0  ;;  %3271 = vmatpush1.bf16.msra.mxu1 %v6459_v23  ;;  %7488 = vst [vmem:[#allocation48_spill] sm:$0xff] %v6536_v21 }
 0x780   : > { %3231 = vmatprep.subr.bf16.mxu0 %v6462_v10  ;;  %3272 = vmatprep.subr.bf16.mxu1 %v6465_v13 }
 0x781   : > { %3261 = vmatprep.mubr.bf16.mxu0 %v7179_v50  ;;  %3302 = vmatprep.mubr.bf16.mxu1 %v7179_v50 }
 0x783   : > { %3232 = vmatpush1.bf16.msra.mxu0 %v6470_v18  ;;  %3273 = vmatpush1.bf16.msra.mxu1 %v6473_v31 }
 0x784   : > { %3233 = vmatprep.subr.bf16.mxu0 %v6476_v32  ;;  %3274 = vmatprep.subr.bf16.mxu1 %v6479_v34 }
 0x787   : > { %3234 = vmatpush1.bf16.msra.mxu0 %v6482_v7  ;;  %3275 = vmatpush1.bf16.msra.mxu1 %v6485_v63 }
 0x788   : > { %3235 = vmatprep.subr.bf16.mxu0 %v6488_v33  ;;  %3276 = vmatprep.subr.bf16.mxu1 %v6491_v6 }
 0x78b   : > { %3236 = vmatpush1.bf16.msra.mxu0 %v6494_v42  ;;  %3277 = vmatpush1.bf16.msra.mxu1 %v6497_v17 }
 0x78c   : > { %3237 = vmatprep.subr.bf16.mxu0 %v6500_v38  ;;  %3278 = vmatprep.subr.bf16.mxu1 %v6503_v8 }
 0x78f   : > { %3238 = vmatpush1.bf16.msra.mxu0 %v6506_v45  ;;  %3279 = vmatpush1.bf16.msra.mxu1 %v6509_v61  ;;  %v7494_v61 = vld [vmem:[#allocation17_spill] sm:$0xff] }
 0x790   : > { %3239 = vmatprep.subr.bf16.mxu0 %v6512_v4  ;;  %3280 = vmatprep.subr.bf16.mxu1 %v6515_v36 }
 0x793   : > { %3240 = vmatpush1.bf16.msra.mxu0 %v6518_v1  ;;  %3281 = vmatpush1.bf16.msra.mxu1 %v6521_v41  ;;  %v6539_v41 = vld [vmem:[#allocation12 + $0xec] ss:$16 sps:$4 sm:$0xff]  }
 0x794   : > { %3241 = vmatprep.subr.bf16.mxu0 %v6524_v44  ;;  %3282 = vmatprep.subr.bf16.mxu1 %v6527_v35  ;;  %7489 = vst [vmem:[#allocation49_spill] sm:$0xff] %v6539_v41  ;;  %v6542_v44 = vld [vmem:[#allocation12 + $0xe0] ss:$16 sps:$4 sm:$0xff]   ;;  %v6545_v35 = vld [vmem:[#allocation12 + $0xe8] ss:$16 sps:$4 sm:$0xff]  }
 0x795   : > { %7490 = vst [vmem:[#allocation50_spill] sm:$0xff] %v6542_v44  ;;  %7491 = vst [vmem:[#allocation51_spill] sm:$0xff] %v6545_v35 }
 0x797   : > { %3242 = vmatpush1.bf16.msra.mxu0 %v6530_v39  ;;  %3283 = vmatpush1.bf16.msra.mxu1 %v6533_v55  ;;  %v6548_v39 = vld [vmem:[#allocation10 + $0x4] ss:$16 sps:$4 sm:$0xff]   ;;  %v6551_v55 = vld [vmem:[#allocation10 + $0xc] ss:$16 sps:$4 sm:$0xff]  }
 0x798   : > { %3243 = vmatprep.subr.bf16.mxu0 %v6536_v21  ;;  %3284 = vmatprep.subr.bf16.mxu1 %v6539_v41  ;;  %7492 = vst [vmem:[#allocation55_spill] sm:$0xff] %v6548_v39  ;;  %7493 = vst [vmem:[#allocation56_spill] sm:$0xff] %v6551_v55 }
 0x79b   : > { %3244 = vmatpush1.bf16.msra.mxu0 %v6542_v44  ;;  %3285 = vmatpush1.bf16.msra.mxu1 %v6545_v35 }
 0x79c   : > { %3315 = vmatprep.subr.bf16.mxu0 %v6548_v39  ;;  %3356 = vmatprep.subr.bf16.mxu1 %v6551_v55  ;;  %v7495_v39 = vld [vmem:[#allocation18_spill] sm:$0xff]  ;;  %v7496_v55 = vld [vmem:[#allocation19_spill] sm:$0xff] }
 0x831   : > { %v3023_v21 = vpop.f32.mrb[48].mxu0  ;;  %v3064_v1 = vpop.f32.mrb[48].mxu1 }
 0x832   : > { %v4193_v41 = vadd.f32 %v3023_v21, %v7444_v3  ;;  %v3025_v36 = vpop.f32.mrb[49].mxu0  ;;  %v3066_v4 = vpop.f32.mrb[49].mxu1  ;;  %v4195_v63 = vadd.f32 %v3064_v1, %v7496_v55 }
 0x833   : > { %v4194_v44 = vadd.f32 %v3025_v36, %v7494_v61  ;;  %v3027_v45 = vpop.f32.mrb[50].mxu0  ;;  %v3068_v8 = vpop.f32.mrb[50].mxu1  ;;  %v4196_v6 = vadd.f32 %v3066_v4, %v7495_v39  ;;  %v3101_v39 = vld [vmem:[#allocation2 + $0x28] sm:$0x30] }
 0x834   : > { %v4116_v38 = vmul.f32 -1.442695, %v4193_v41  ;;  %v3028_v35 = vpop.f32.mrb[51].mxu0  ;;  %v3069_v17 = vpop.f32.mrb[51].mxu1 }
 0x835   : > { %v4117_v42 = vmul.f32 -1.442695, %v4194_v44  ;;  %v4118_v33 = vmul.f32 -1.442695, %v4196_v6 }
 0x836   : > { %4653 = vpow2.f32 %v4116_v38 }
 0x837   : > { %4655 = vpow2.f32 %v4117_v42  ;;  %v7497_v42 = vld [vmem:[#allocation46_spill] sm:$0xff] }
 0x838   : > { %4657 = vpow2.f32 %v4118_v33 }
 0x839   : > { %4659 = vtanh.f32 %v4195_v63  ;;  %v3100_v63 = vld [vmem:[#allocation2 + $0x20] sm:$0x30] }
 0x840   : > { %v4654_v7 = vpop.eup %4653 }
 0x841   : > { %v4656_v34 = vpop.eup %4655  ;;  %v3078_v21 = vadd.f32 1.0, %v4654_v7 }
 0x842   : > { %v3084_v3 = vadd.f32 1.0, %v4656_v34  ;;  %v4658_v8 = vpop.eup %4657 }
 0x843   : > { %4661 = vrcp.f32 %v3078_v21  ;;  %v4660_v45 = vpop.eup %4659  ;;  %v3091_v38 = vadd.f32 1.0, %v4658_v8 }
 0x844   : > { %4663 = vrcp.f32 %v3084_v3 }
 0x845   : > { %4665 = vrcp.f32 %v3091_v38  ;;  %v3103_v38 = vld [vmem:[#allocation2 + $0x38] sm:$0x30] }
 0x84d   : > { %v4662_v36 = vpop.eup %4661 }
 0x84e   : > { %v4664_v17 = vpop.eup %4663  ;;  %v3095_v41 = vmul.f32 %v4662_v36, %v4660_v45 }
 0x84f   : > { %v3094_v44 = vmul.f32 %v4664_v17, %v7497_v42 }
 0x851   : > { %v6559_v4 = vadd.f32 %v3095_v41, %v3094_v44  ;;  %v3138_v6 = vpop.f32.mrb[52].mxu0  ;;  %v3179_v1 = vpop.f32.mrb[52].mxu1 }
 0x852   : > { %v3190_v35 = vrot.slane %v3138_v6, 4  ;;  %v3140_v7 = vpop.f32.mrb[53].mxu0  ;;  %v3181_v33 = vpop.f32.mrb[53].mxu1  ;;  %v3192_v61 = vrot.slane %v3179_v1, 4  ;;  %v6568_v1 = vld [vmem:[#allocation10 + $0x24] ss:$16 sps:$4 sm:$0xff]  }
 0x853   : > { %7498 = vst [vmem:[#allocation57_spill] sm:$0xff] %v6559_v4  ;;  %v3191_v34 = vrot.slane %v3140_v7, 4  ;;  %v3142_v21 = vpop.f32.mrb[54].mxu0  ;;  %v3183_v3 = vpop.f32.mrb[54].mxu1  ;;  %4667 = vtanh.f32 %v6559_v4  ;;  %v3193_v42 = vrot.slane %v3181_v33, 4 }
 0x854   : > { %v3198_v55 = vadd.f32 %v3190_v35, %v3100_v63  ;;  %v3143_v45 = vpop.f32.mrb[55].mxu0  ;;  %v3184_v8 = vpop.f32.mrb[55].mxu1  ;;  %v3102_v21 = vld [vmem:[#allocation2 + $0x30] sm:$0x30] }
 0x855   : > { %v3199_v36 = vadd.f32 %v3191_v34, %v3101_v39  ;;  %v3201_v44 = vadd.f32 %v3193_v42, %v3103_v38  ;;  %v4666_v6 = vpop.eup %4665  ;;  %v3200_v31 = vadd.f32 %v3192_v61, %v3102_v21  ;;  %v6565_v33 = vld [vmem:[#allocation10 + $0x8] ss:$16 sps:$4 sm:$0xff]   ;;  %v6571_v61 = vld [vmem:[#allocation10 + $0x2c] ss:$16 sps:$4 sm:$0xff]   ;;  %v6582_v34 = vld [vmem:[#allocation10 + $0x44] ss:$16 sps:$4 sm:$0xff]  }
 0x856   : > { %v4119_v17 = vmul.f32 -1.442695, %v3198_v55  ;;  %v6562_v55 = vld [vmem:[#allocation10] ss:$16 sps:$4 sm:$0xff]   ;;  %v6585_v45 = vld [vmem:[#allocation10 + $0x4c] ss:$16 sps:$4 sm:$0xff]  }
 0x857   : > { %v4120_v41 = vmul.f32 -1.442695, %v3199_v36  ;;  %v4121_v3 = vmul.f32 -1.442695, %v3201_v44  ;;  %v6588_v8 = vld [vmem:[#allocation10 + $0x40] ss:$16 sps:$4 sm:$0xff]  }
 0x858   : > { %4669 = vpow2.f32 %v4119_v17  ;;  %v6591_v36 = vld [vmem:[#allocation10 + $0x48] ss:$16 sps:$4 sm:$0xff]   ;;  %v6594_v17 = vld [vmem:[#allocation10 + $0x64] ss:$16 sps:$4 sm:$0xff]  }
 0x859   : > { %4671 = vpow2.f32 %v4120_v41  ;;  %7499 = vst [vmem:[#allocation58_spill] sm:$0xff] %v6594_v17  ;;  %v6597_v41 = vld [vmem:[#allocation10 + $0x6c] ss:$16 sps:$4 sm:$0xff]   ;;  %v6604_v21 = vld [vmem:[#allocation10 + $0x68] ss:$16 sps:$4 sm:$0xff]  }
 0x85a   : > { %4673 = vpow2.f32 %v4121_v3  ;;  %7500 = vst [vmem:[#allocation59_spill] sm:$0xff] %v6597_v41 }
 0x85b   : > { %4675 = vtanh.f32 %v3200_v31  ;;  %v6579_v31 = vld [vmem:[#allocation10 + $0x28] ss:$16 sps:$4 sm:$0xff]  }
 0x85d   : > { %v4668_v32 = vpop.eup %4667 }
 0x85e   : > { %v3098_v7 = vmul.f32 %v4668_v32, %v4666_v6  ;;  %v3222_v6 = vrot.slane %v6387_v14, 6 }
 0x860   : > { %v3099_v4 = vpack.c.bf16 %v3098_v7, %v3098_v7  ;;  %v6601_v7 = vld [vmem:[#allocation10 + $0x60] ss:$16 sps:$4 sm:$0xff]  }
 0x861   : > { %7501 = vst [vmem:[#allocation61_spill] sm:$0xff] %v6601_v7 }
 0x862   : > { %v4670_v35 = vpop.eup %4669  ;;  %3262 = vmatmul.mubr.bf16.vlgmr.msra.gmra.mrb[56].mxu0 %v3099_v4  ;;  %3303 = vmatmul.mubr.bf16.vlgmr.msra.gmra.mrb[56].mxu1 %v3099_v4  ;;  %v6576_v4 = vld [vmem:[#allocation10 + $0x20] ss:$16 sps:$4 sm:$0xff]  }
 0x863   : > { %v4672_v63 = vpop.eup %4671  ;;  %v3205_v39 = vadd.f32 1.0, %v4670_v35  ;;  %3316 = vmatpush1.bf16.msra.mxu0 %v6562_v55  ;;  %3357 = vmatpush1.bf16.msra.mxu1 %v6565_v33 }
 0x864   : > { %v3211_v32 = vadd.f32 1.0, %v4672_v63  ;;  %3317 = vmatprep.subr.bf16.mxu0 %v6568_v1  ;;  %3358 = vmatprep.subr.bf16.mxu1 %v6571_v61  ;;  %v4674_v42 = vpop.eup %4673 }
 0x865   : > { %4677 = vrcp.f32 %v3205_v39  ;;  %3347 = vmatprep.mubr.bf16.mxu0 %v7179_v50  ;;  %3388 = vmatprep.mubr.bf16.mxu1 %v7179_v50  ;;  %v4676_v38 = vpop.eup %4675  ;;  %v3218_v63 = vadd.f32 1.0, %v4674_v42  ;;  %v6607_v39 = vld [vmem:[#allocation10 + $0x84] ss:$16 sps:$4 sm:$0xff]  }
 0x866   : > { %4679 = vrcp.f32 %v3211_v32  ;;  %v6610_v32 = vld [vmem:[#allocation10 + $0x8c] ss:$16 sps:$4 sm:$0xff]   ;;  %v6621_v42 = vld [vmem:[#allocation10 + $0xa4] ss:$16 sps:$4 sm:$0xff]  }
 0x867   : > { %3318 = vmatpush1.bf16.msra.mxu0 %v6576_v4  ;;  %3359 = vmatpush1.bf16.msra.mxu1 %v6579_v31  ;;  %4681 = vrcp.f32 %v3218_v63  ;;  %7502 = vst [vmem:[#allocation28_spill] sm:$0xff] %v6621_v42  ;;  %v6640_v63 = vld [vmem:[#allocation10 + $0xc0] ss:$16 sps:$4 sm:$0xff]  }
 0x868   : > { %3319 = vmatprep.subr.bf16.mxu0 %v6582_v34  ;;  %3360 = vmatprep.subr.bf16.mxu1 %v6585_v45  ;;  %7508 = vst [vmem:[#allocation34_spill] sm:$0xff] %v6640_v63 }
 0x86b   : > { %3320 = vmatpush1.bf16.msra.mxu0 %v6588_v8  ;;  %3361 = vmatpush1.bf16.msra.mxu1 %v6591_v36 }
 0x86c   : > { %3321 = vmatprep.subr.bf16.mxu0 %v6594_v17  ;;  %3362 = vmatprep.subr.bf16.mxu1 %v6597_v41  ;;  %v6615_v17 = vld [vmem:[#allocation10 + $0x80] ss:$16 sps:$4 sm:$0xff]  }
 0x86f   : > { %v4678_v44 = vpop.eup %4677  ;;  %3322 = vmatpush1.bf16.msra.mxu0 %v6601_v7  ;;  %3363 = vmatpush1.bf16.msra.mxu1 %v6604_v21  ;;  %v6618_v7 = vld [vmem:[#allocation10 + $0x88] ss:$16 sps:$4 sm:$0xff]  }
 0x870   : > { %v4680_v3 = vpop.eup %4679  ;;  %v3225_v35 = vmul.f32 %v4678_v44, %v4676_v38  ;;  %3323 = vmatprep.subr.bf16.mxu0 %v6607_v39  ;;  %3364 = vmatprep.subr.bf16.mxu1 %v6610_v32  ;;  %v6624_v38 = vld [vmem:[#allocation10 + $0xac] ss:$16 sps:$4 sm:$0xff]   ;;  %v6628_v44 = vld [vmem:[#allocation10 + $0xa0] ss:$16 sps:$4 sm:$0xff]  }
 0x871   : > { %v3224_v14 = vmul.f32 %v4680_v3, %v3222_v6  ;;  %7503 = vst [vmem:[#allocation29_spill] sm:$0xff] %v6624_v38  ;;  %7504 = vst [vmem:[#allocation30_spill] sm:$0xff] %v6628_v44  ;;  %v6631_v6 = vld [vmem:[#allocation10 + $0xa8] ss:$16 sps:$4 sm:$0xff]   ;;  %v6634_v3 = vld [vmem:[#allocation10 + $0xc4] ss:$16 sps:$4 sm:$0xff]  }
 0x872   : > { %7505 = vst [vmem:[#allocation31_spill] sm:$0xff] %v6631_v6  ;;  %7506 = vst [vmem:[#allocation32_spill] sm:$0xff] %v6634_v3 }
 0x873   : > { %v6613_v41 = vadd.f32 %v3225_v35, %v3224_v14  ;;  %3324 = vmatpush1.bf16.msra.mxu0 %v6615_v17  ;;  %3365 = vmatpush1.bf16.msra.mxu1 %v6618_v7  ;;  %v6637_v35 = vld [vmem:[#allocation10 + $0xcc] ss:$16 sps:$4 sm:$0xff]   ;;  %v6643_v14 = vld [vmem:[#allocation10 + $0xc8] ss:$16 sps:$4 sm:$0xff]  }
 0x874   : > { %3325 = vmatprep.subr.bf16.mxu0 %v6621_v42  ;;  %3366 = vmatprep.subr.bf16.mxu1 %v6624_v38  ;;  %7507 = vst [vmem:[#allocation33_spill] sm:$0xff] %v6637_v35  ;;  %7509 = vst [vmem:[#allocation35_spill] sm:$0xff] %v6643_v14  ;;  %v6652_v42 = vld [vmem:[#allocation10 + $0xe0] ss:$16 sps:$4 sm:$0xff]  }
 0x875   : > { %4683 = vtanh.f32 %v6613_v41 }
 0x877   : > { %3326 = vmatpush1.bf16.msra.mxu0 %v6628_v44  ;;  %3367 = vmatpush1.bf16.msra.mxu1 %v6631_v6  ;;  %v6646_v44 = vld [vmem:[#allocation10 + $0xe4] ss:$16 sps:$4 sm:$0xff]   ;;  %v6649_v6 = vld [vmem:[#allocation10 + $0xec] ss:$16 sps:$4 sm:$0xff]  }
 0x878   : > { %3327 = vmatprep.subr.bf16.mxu0 %v6634_v3  ;;  %3368 = vmatprep.subr.bf16.mxu1 %v6637_v35  ;;  %7510 = vst [vmem:[#allocation36_spill] sm:$0xff] %v6646_v44  ;;  %v4682_v3 = vpop.eup %4681  ;;  %v6655_v35 = vld [vmem:[#allocation10 + $0xe8] ss:$16 sps:$4 sm:$0xff]  }
 0x87b   : > { %3328 = vmatpush1.bf16.msra.mxu0 %v6640_v63  ;;  %3369 = vmatpush1.bf16.msra.mxu1 %v6643_v14 }
 0x87c   : > { %3329 = vmatprep.subr.bf16.mxu0 %v6646_v44  ;;  %3370 = vmatprep.subr.bf16.mxu1 %v6649_v6 }
 0x87f   : > { %v4684_v38 = vpop.eup %4683  ;;  %3330 = vmatpush1.bf16.msra.mxu0 %v6652_v42  ;;  %3371 = vmatpush1.bf16.msra.mxu1 %v6655_v35 }
 0x880   : > { %3430 = vmatprep.subr.bf16.mxu0 %v6234_v40  ;;  %3471 = vmatprep.subr.bf16.mxu1 %v6237_v49  ;;  %v3228_v14 = vmul.f32 %v4684_v38, %v4682_v3  ;;  %v7511_v40 = vld [vmem:[#allocation62_spill] sm:$0xff]  ;;  %v7512_v49 = vld [vmem:[#allocation63_spill] sm:$0xff] }
 0x881   : > { %v7540_v3 = vld [vmem:[#allocation18_spill] sm:$0xff] }
 0x882   : > { %v3311_v44 = vpack.c.bf16 %v3228_v14, %v3228_v14 }
 0x884   : > { %v3313_v63 = vrot.slane %v3311_v44, 2 }
 0x886   : > { %3348 = vmatmul.mubr.bf16.vlgmr.msra.gmra.mrb[56].mxu0 %v3313_v63  ;;  %3389 = vmatmul.mubr.bf16.vlgmr.msra.gmra.mrb[56].mxu1 %v3313_v63 }
 0x887   : > { %3431 = vmatpush1.bf16.msra.mxu0 %v7449_v53  ;;  %3472 = vmatpush1.bf16.msra.mxu1 %v7450_v28  ;;  %v7519_v53 = vld [vmem:[#allocation23_spill] sm:$0xff]  ;;  %v7520_v28 = vld [vmem:[#allocation24_spill] sm:$0xff] }
 0x888   : > { %3432 = vmatprep.subr.bf16.mxu0 %v7451_v48  ;;  %3473 = vmatprep.subr.bf16.mxu1 %v7452_v37  ;;  %v7521_v48 = vld [vmem:[#allocation25_spill] sm:$0xff]  ;;  %v7522_v37 = vld [vmem:[#allocation26_spill] sm:$0xff] }
 0x889   : > { %3462 = vmatprep.mubr.bf16.mxu0 %v7179_v50  ;;  %3503 = vmatprep.mubr.bf16.mxu1 %v7179_v50 }
 0x88b   : > { %3433 = vmatpush1.bf16.msra.mxu0 %v7453_v46  ;;  %3474 = vmatpush1.bf16.msra.mxu1 %v7454_v54  ;;  %v7523_v46 = vld [vmem:[#allocation27_spill] sm:$0xff]  ;;  %v7524_v54 = vld [vmem:[#allocation52_spill] sm:$0xff] }
 0x88c   : > { %3434 = vmatprep.subr.bf16.mxu0 %v7455_v59  ;;  %3475 = vmatprep.subr.bf16.mxu1 %v7456_v24  ;;  %v7525_v59 = vld [vmem:[#allocation53_spill] sm:$0xff]  ;;  %v7526_v24 = vld [vmem:[#allocation54_spill] sm:$0xff] }
 0x88f   : > { %3435 = vmatpush1.bf16.msra.mxu0 %v7457_v19  ;;  %3476 = vmatpush1.bf16.msra.mxu1 %v7458_v26  ;;  %v7527_v19 = vld [vmem:[#allocation60_spill] sm:$0xff]  ;;  %v7528_v26 = vld [vmem:[#allocation65_spill] sm:$0xff] }
 0x890   : > { %3436 = vmatprep.subr.bf16.mxu0 %v7459_v27  ;;  %3477 = vmatprep.subr.bf16.mxu1 %v7460_v60  ;;  %v7529_v27 = vld [vmem:[#allocation38_spill] sm:$0xff]  ;;  %v7530_v60 = vld [vmem:[#allocation20_spill] sm:$0xff] }
 0x893   : > { %3437 = vmatpush1.bf16.msra.mxu0 %v7461_v29  ;;  %3478 = vmatpush1.bf16.msra.mxu1 %v7462_v47  ;;  %v7531_v29 = vld [vmem:[#allocation47_spill] sm:$0xff]  ;;  %v7532_v47 = vld [vmem:[#allocation48_spill] sm:$0xff] }
 0x894   : > { %3438 = vmatprep.subr.bf16.mxu0 %v7463_v58  ;;  %3479 = vmatprep.subr.bf16.mxu1 %v7464_v57  ;;  %v7533_v58 = vld [vmem:[#allocation49_spill] sm:$0xff]  ;;  %v7534_v57 = vld [vmem:[#allocation50_spill] sm:$0xff] }
 0x897   : > { %3439 = vmatpush1.bf16.msra.mxu0 %v7465_v56  ;;  %3480 = vmatpush1.bf16.msra.mxu1 %v7466_v2  ;;  %v7535_v56 = vld [vmem:[#allocation51_spill] sm:$0xff] }
 0x898   : > { %3440 = vmatprep.subr.bf16.mxu0 %v6298_v62  ;;  %3481 = vmatprep.subr.bf16.mxu1 %v6301_v25  ;;  %v7514_v62 = vld [vmem:[#allocation66_spill] sm:$0xff]  ;;  %v7515_v25 = vld [vmem:[#allocation67_spill] sm:$0xff] }
 0x899   : > { %v7536_v2 = vld [vmem:[#allocation55_spill] sm:$0xff] }
 0x89b   : > { %3441 = vmatpush1.bf16.msra.mxu0 %v6304_v9  ;;  %3482 = vmatpush1.bf16.msra.mxu1 %v6307_v22  ;;  %v7513_v22 = vld [vmem:[#allocation64_spill] sm:$0xff] }
 0x89c   : > { %3442 = vmatprep.subr.bf16.mxu0 %v6310_v52  ;;  %3483 = vmatprep.subr.bf16.mxu1 %v6313_v20  ;;  %v7516_v9 = vld [vmem:[#allocation68_spill] sm:$0xff]  ;;  %v7517_v52 = vld [vmem:[#allocation21_spill] sm:$0xff]  ;;  %v7518_v20 = vld [vmem:[#allocation22_spill] sm:$0xff] }
 0x89f   : > { %3443 = vmatpush1.bf16.msra.mxu0 %v6432_v12  ;;  %3484 = vmatpush1.bf16.msra.mxu1 %v6435_v15  ;;  %v7537_v12 = vld [vmem:[#allocation56_spill] sm:$0xff] }
 0x8a0   : > { %3444 = vmatprep.subr.bf16.mxu0 %v6438_v30  ;;  %3485 = vmatprep.subr.bf16.mxu1 %v6441_v11  ;;  %v7538_v11 = vld [vmem:[#allocation16_spill] sm:$0xff] }
 0x8a3   : > { %3445 = vmatpush1.bf16.msra.mxu0 %v6444_v43  ;;  %3486 = vmatpush1.bf16.msra.mxu1 %v6447_v16 }
 0x8a4   : > { %3555 = vmatprep.subr.bf16.mxu0 %v6450_v5  ;;  %3596 = vmatprep.subr.bf16.mxu1 %v6453_v51  ;;  %v7539_v51 = vld [vmem:[#allocation17_spill] sm:$0xff] }
 0x8a6   : > { %3463 = vmatmul.mubr.bf16.vlgmr.msra.gmra.mrb[60].mxu0 %v3313_v63  ;;  %3504 = vmatmul.mubr.bf16.vlgmr.msra.gmra.mrb[60].mxu1 %v3313_v63 }
 0x8a7   : > { %3556 = vmatpush1.bf16.msra.mxu0 %v6456_v0  ;;  %3597 = vmatpush1.bf16.msra.mxu1 %v6459_v23 }
 0x8a8   : > { %3557 = vmatprep.subr.bf16.mxu0 %v6462_v10  ;;  %3598 = vmatprep.subr.bf16.mxu1 %v6465_v13 }
 0x8a9   : > { %3587 = vmatprep.mubr.bf16.mxu0 %v7179_v50  ;;  %3628 = vmatprep.mubr.bf16.mxu1 %v7179_v50 }
 0x8ab   : > { %3558 = vmatpush1.bf16.msra.mxu0 %v6470_v18  ;;  %3599 = vmatpush1.bf16.msra.mxu1 %v7511_v40  ;;  %v7541_v40 = vld [vmem:[#allocation19_spill] sm:$0xff] }
 0x8ac   : > { %3559 = vmatprep.subr.bf16.mxu0 %v7512_v49  ;;  %3600 = vmatprep.subr.bf16.mxu1 %v7513_v22 }
 0x8af   : > { %3560 = vmatpush1.bf16.msra.mxu0 %v7514_v62  ;;  %3601 = vmatpush1.bf16.msra.mxu1 %v7515_v25 }
 0x8b0   : > { %3561 = vmatprep.subr.bf16.mxu0 %v7516_v9  ;;  %3602 = vmatprep.subr.bf16.mxu1 %v7517_v52 }
 0x8b3   : > { %3562 = vmatpush1.bf16.msra.mxu0 %v7518_v20  ;;  %3603 = vmatpush1.bf16.msra.mxu1 %v7519_v53 }
 0x8b4   : > { %3563 = vmatprep.subr.bf16.mxu0 %v7520_v28  ;;  %3604 = vmatprep.subr.bf16.mxu1 %v7521_v48 }
 0x8b7   : > { %3564 = vmatpush1.bf16.msra.mxu0 %v7522_v37  ;;  %3605 = vmatpush1.bf16.msra.mxu1 %v7523_v46  ;;  %v7542_v46 = vld [vmem:[#allocation57_spill] sm:$0xff] }
 0x8b8   : > { %3565 = vmatprep.subr.bf16.mxu0 %v7524_v54  ;;  %3606 = vmatprep.subr.bf16.mxu1 %v7525_v59 }
 0x8bb   : > { %3566 = vmatpush1.bf16.msra.mxu0 %v7526_v24  ;;  %3607 = vmatpush1.bf16.msra.mxu1 %v7527_v19 }
 0x8bc   : > { %3567 = vmatprep.subr.bf16.mxu0 %v7528_v26  ;;  %3608 = vmatprep.subr.bf16.mxu1 %v7529_v27 }
 0x8bf   : > { %3568 = vmatpush1.bf16.msra.mxu0 %v7530_v60  ;;  %3609 = vmatpush1.bf16.msra.mxu1 %v7531_v29  ;;  %v3426_v29 = vld [vmem:[#allocation2 + $0x20] sm:$0xc0] }
 0x8c0   : > { %3569 = vmatprep.subr.bf16.mxu0 %v7532_v47  ;;  %3610 = vmatprep.subr.bf16.mxu1 %v7533_v58 }
 0x8c3   : > { %3570 = vmatpush1.bf16.msra.mxu0 %v7534_v57  ;;  %3611 = vmatpush1.bf16.msra.mxu1 %v7535_v56 }
 0x8c4   : > { %3641 = vmatprep.subr.bf16.mxu0 %v7536_v2  ;;  %3682 = vmatprep.subr.bf16.mxu1 %v7537_v12  ;;  %v3427_v2 = vld [vmem:[#allocation2 + $0x28] sm:$0xc0] }
 0x959   : > { %v3349_v15 = vpop.f32.mrb[56].mxu0  ;;  %v3390_v30 = vpop.f32.mrb[56].mxu1 }
 0x95a   : > { %v4197_v43 = vadd.f32 %v3349_v15, %v7538_v11  ;;  %v3351_v16 = vpop.f32.mrb[57].mxu0  ;;  %v3392_v5 = vpop.f32.mrb[57].mxu1  ;;  %v4199_v49 = vadd.f32 %v3390_v30, %v7541_v40 }
 0x95b   : > { %v4198_v0 = vadd.f32 %v3351_v16, %v7539_v51  ;;  %v3353_v23 = vpop.f32.mrb[58].mxu0  ;;  %v3394_v10 = vpop.f32.mrb[58].mxu1  ;;  %v4200_v63 = vadd.f32 %v3392_v5, %v7540_v3 }
 0x95c   : > { %v4122_v13 = vmul.f32 -1.442695, %v4197_v43  ;;  %v3354_v18 = vpop.f32.mrb[59].mxu0  ;;  %v3395_v38 = vpop.f32.mrb[59].mxu1 }
 0x95d   : > { %v4123_v44 = vmul.f32 -1.442695, %v4198_v0  ;;  %v4124_v14 = vmul.f32 -1.442695, %v4200_v63  ;;  %v3429_v0 = vld [vmem:[#allocation2 + $0x38] sm:$0xc0] }
 0x95e   : > { %4685 = vpow2.f32 %v4122_v13 }
 0x95f   : > { %4687 = vpow2.f32 %v4123_v44  ;;  %v3428_v44 = vld [vmem:[#allocation2 + $0x30] sm:$0xc0] }
 0x960   : > { %4689 = vpow2.f32 %v4124_v14 }
 0x961   : > { %4691 = vtanh.f32 %v4199_v49 }
 0x968   : > { %v4686_v22 = vpop.eup %4685 }
 0x969   : > { %v4688_v62 = vpop.eup %4687  ;;  %v3404_v25 = vadd.f32 1.0, %v4686_v22 }
 0x96a   : > { %v3410_v9 = vadd.f32 1.0, %v4688_v62  ;;  %v4690_v52 = vpop.eup %4689 }
 0x96b   : > { %4693 = vrcp.f32 %v3404_v25  ;;  %v4692_v20 = vpop.eup %4691  ;;  %v3417_v37 = vadd.f32 1.0, %v4690_v52  ;;  %v3548_v52 = vrot.slane %v6613_v41, 6  ;;  %v7547_v41 = vld [vmem:[#allocation29_spill] sm:$0xff] }
 0x96c   : > { %4695 = vrcp.f32 %v3410_v9 }
 0x96d   : > { %4697 = vrcp.f32 %v3417_v37 }
 0x975   : > { %v4694_v53 = vpop.eup %4693 }
 0x976   : > { %v4696_v28 = vpop.eup %4695  ;;  %v3421_v48 = vmul.f32 %v4694_v53, %v4692_v20  ;;  %v7546_v20 = vld [vmem:[#allocation28_spill] sm:$0xff]  ;;  %v7549_v53 = vld [vmem:[#allocation31_spill] sm:$0xff] }
 0x977   : > { %v3420_v54 = vmul.f32 %v4696_v28, %v7542_v46  ;;  %v4698_v10 = vpop.eup %4697  ;;  %v7552_v28 = vld [vmem:[#allocation34_spill] sm:$0xff] }
 0x979   : > { %v6733_v59 = vadd.f32 %v3421_v48, %v3420_v54  ;;  %v3464_v24 = vpop.f32.mrb[60].mxu0  ;;  %v3505_v19 = vpop.f32.mrb[60].mxu1 }
 0x97a   : > { %v3516_v26 = vrot.slane %v3464_v24, 2  ;;  %v3466_v27 = vpop.f32.mrb[61].mxu0  ;;  %v3507_v60 = vpop.f32.mrb[61].mxu1  ;;  %v3518_v13 = vrot.slane %v3505_v19, 2 }
 0x97b   : > { %v3517_v47 = vrot.slane %v3466_v27, 2  ;;  %v3468_v58 = vpop.f32.mrb[62].mxu0  ;;  %v3509_v57 = vpop.f32.mrb[62].mxu1  ;;  %4699 = vtanh.f32 %v6733_v59  ;;  %v3519_v5 = vrot.slane %v3507_v60, 2 }
 0x97c   : > { %v3524_v56 = vadd.f32 %v3516_v26, %v3426_v29  ;;  %v3469_v12 = vpop.f32.mrb[63].mxu0  ;;  %v3510_v15 = vpop.f32.mrb[63].mxu1  ;;  %v3526_v14 = vadd.f32 %v3518_v13, %v3428_v44 }
 0x97d   : > { %v3525_v30 = vadd.f32 %v3517_v47, %v3427_v2  ;;  %v3527_v23 = vadd.f32 %v3519_v5, %v3429_v0 }
 0x97e   : > { %v4125_v43 = vmul.f32 -1.442695, %v3524_v56 }
 0x97f   : > { %v4126_v16 = vmul.f32 -1.442695, %v3525_v30  ;;  %v4127_v63 = vmul.f32 -1.442695, %v3527_v23 }
 0x980   : > { %4701 = vpow2.f32 %v4125_v43 }
 0x981   : > { %4703 = vpow2.f32 %v4126_v16 }
 0x982   : > { %4705 = vpow2.f32 %v4127_v63  ;;  %v4925_v63 = vld [vmem:[%s6818_s7] sm:$0xff] (!%p4131_p10)  }
 0x983   : > { %4707 = vtanh.f32 %v3526_v14  ;;  %v5057_v14 = vmov (!%p4131_p10), 0.0  }
 0x985   : > { %v4700_v18 = vpop.eup %4699 }
 0x986   : > { %v3424_v38 = vmul.f32 %v4700_v18, %v4698_v10 }
 0x988   : > { %v3425_v49 = vpack.c.bf16 %v3424_v38, %v3424_v38 }
 0x98a   : > { %v4702_v22 = vpop.eup %4701  ;;  %3588 = vmatmul.mubr.bf16.vlgmr.msra.gmra.mrb[64].mxu0 %v3425_v49  ;;  %3629 = vmatmul.mubr.bf16.vlgmr.msra.gmra.mrb[64].mxu1 %v3425_v49  ;;  %v4927_v49 = vld [vmem:[%s6818_s7 + $0x10] sm:$0xff] (!%p4131_p10)  }
 0x98b   : > { %v4704_v62 = vpop.eup %4703  ;;  %v3531_v25 = vadd.f32 1.0, %v4702_v22  ;;  %3642 = vmatpush1.bf16.msra.mxu0 %v6562_v55  ;;  %3683 = vmatpush1.bf16.msra.mxu1 %v6565_v33  ;;  %v7543_v55 = vld [vmem:[#allocation58_spill] sm:$0xff]  ;;  %v7544_v33 = vld [vmem:[#allocation59_spill] sm:$0xff]  ;;  %v4928_v22 = vld [vmem:[%s6818_s7 + $0x18] sm:$0xff] (!%p4131_p10)  }
 0x98c   : > { %v3537_v9 = vadd.f32 1.0, %v4704_v62  ;;  %3643 = vmatprep.subr.bf16.mxu0 %v6568_v1  ;;  %3684 = vmatprep.subr.bf16.mxu1 %v6571_v61  ;;  %v4706_v1 = vpop.eup %4705  ;;  %v4929_v62 = vld [vmem:[%s6818_s7 + $0x20] sm:$0xff] (!%p4131_p10)  }
 0x98d   : > { %4709 = vrcp.f32 %v3531_v25  ;;  %3673 = vmatprep.mubr.bf16.mxu0 %v7179_v50  ;;  %3714 = vmatprep.mubr.bf16.mxu1 %v7179_v50  ;;  %v4708_v61 = vpop.eup %4707  ;;  %v4930_v25 = vld [vmem:[%s6818_s7 + $0x28] sm:$0xff] (!%p4131_p10)  }
 0x98e   : > { %4711 = vrcp.f32 %v3537_v9  ;;  %v4931_v9 = vld [vmem:[%s6818_s7 + $0x30] sm:$0xff] (!%p4131_p10)  }
 0x98f   : > { %3644 = vmatpush1.bf16.msra.mxu0 %v6576_v4  ;;  %3685 = vmatpush1.bf16.msra.mxu1 %v6579_v31  ;;  %v7545_v4 = vld [vmem:[#allocation61_spill] sm:$0xff] }
 0x990   : > { %3645 = vmatprep.subr.bf16.mxu0 %v6582_v34  ;;  %3686 = vmatprep.subr.bf16.mxu1 %v6585_v45  ;;  %v3544_v45 = vadd.f32 1.0, %v4706_v1  ;;  %v4132_v1 = vld [vmem:[#allocation7] ss:$0 sm:$0xff] (!%p4131_p10) }
 0x992   : > { %4713 = vrcp.f32 %v3544_v45 }
 0x993   : > { %3646 = vmatpush1.bf16.msra.mxu0 %v6588_v8  ;;  %3687 = vmatpush1.bf16.msra.mxu1 %v6591_v36 }
 0x994   : > { %3647 = vmatprep.subr.bf16.mxu0 %v7543_v55  ;;  %3688 = vmatprep.subr.bf16.mxu1 %v7544_v33  ;;  %v4932_v55 = vld [vmem:[%s6818_s7 + $0x38] sm:$0xff] (!%p4131_p10)  }
 0x997   : > { %v4710_v50 = vpop.eup %4709  ;;  %3648 = vmatpush1.bf16.msra.mxu0 %v7545_v4  ;;  %3689 = vmatpush1.bf16.msra.mxu1 %v6604_v21  ;;  %v7548_v21 = vld [vmem:[#allocation30_spill] sm:$0xff] }
 0x998   : > { %v4712_v31 = vpop.eup %4711  ;;  %v3551_v34 = vmul.f32 %v4710_v50, %v4708_v61  ;;  %3649 = vmatprep.subr.bf16.mxu0 %v6607_v39  ;;  %3690 = vmatprep.subr.bf16.mxu1 %v6610_v32  ;;  %v7550_v39 = vld [vmem:[#allocation32_spill] sm:$0xff]  ;;  %v7551_v32 = vld [vmem:[#allocation33_spill] sm:$0xff] }
 0x999   : > { %v3550_v8 = vmul.f32 %v4712_v31, %v3548_v52 }
 0x99b   : > { %v3552_v36 = vadd.f32 %v3551_v34, %v3550_v8  ;;  %3650 = vmatpush1.bf16.msra.mxu0 %v6615_v17  ;;  %3691 = vmatpush1.bf16.msra.mxu1 %v6618_v7  ;;  %v7553_v17 = vld [vmem:[#allocation35_spill] sm:$0xff]  ;;  %v7554_v7 = vld [vmem:[#allocation36_spill] sm:$0xff] }
 0x99c   : > { %3651 = vmatprep.subr.bf16.mxu0 %v7546_v20  ;;  %3692 = vmatprep.subr.bf16.mxu1 %v7547_v41  ;;  %v4714_v48 = vpop.eup %4713 }
 0x99d   : > { %3752 = vst [vmem:[#allocation4 - $0x6] sm:$0xc0] %v3552_v36  ;;  %4715 = vtanh.f32 %v3552_v36 }
 0x99f   : > { %3652 = vmatpush1.bf16.msra.mxu0 %v7548_v21  ;;  %3693 = vmatpush1.bf16.msra.mxu1 %v7549_v53 }
 0x9a0   : > { %3653 = vmatprep.subr.bf16.mxu0 %v7550_v39  ;;  %3694 = vmatprep.subr.bf16.mxu1 %v7551_v32 }
 0x9a3   : > { %3654 = vmatpush1.bf16.msra.mxu0 %v7552_v28  ;;  %3695 = vmatpush1.bf16.msra.mxu1 %v7553_v17 }
 0x9a4   : > { %3655 = vmatprep.subr.bf16.mxu0 %v7554_v7  ;;  %3696 = vmatprep.subr.bf16.mxu1 %v6649_v6 }
 0x9a7   : > { %v4716_v37 = vpop.eup %4715  ;;  %3656 = vmatpush1.bf16.msra.mxu0 %v6652_v42  ;;  %3697 = vmatpush1.bf16.msra.mxu1 %v6655_v35 }
 0x9a8   : > { %v3554_v46 = vmul.f32 %v4716_v37, %v4714_v48  ;;  %4153 = vmatprep.subr.bf16.mxu0 (!%p4131_p10), %v5057_v14 }
 0x9aa   : > { %v3637_v54 = vpack.c.bf16 %v3554_v46, %v3554_v46  ;;  %3751 = vst [vmem:[#allocation3 - $0x6] sm:$0xc0] %v3554_v46 }
 0x9ac   : > { %v3639_v24 = vrot.slane %v3637_v54, 3 }
 0x9ae   : > { %3674 = vmatmul.mubr.bf16.vlgmr.msra.gmra.mrb[64].mxu0 %v3639_v24  ;;  %3715 = vmatmul.mubr.bf16.vlgmr.msra.gmra.mrb[64].mxu1 %v3639_v24 }
 0x9af   : > { %4154 = vmatpush3.bf16.msra.mxu0 (!%p4131_p10), %v4925_v63  ;;  %4169 = vmatprep.mubr.msk.bf16.mxu0 (!%p4131_p10), %vm5058_vm2, %v5057_v14 }
 0x9b0   : > { %4155 = vmatprep.subr.bf16.mxu0 (!%p4131_p10), %v5057_v14 }
 0xa81   : > { %v3675_v19 = vpop.f32.mrb[64].mxu0  ;;  %v3716_v26 = vpop.f32.mrb[64].mxu1 }
 0xa82   : > { %v4201_v27 = vadd.f32 %v3675_v19, %v7538_v11  ;;  %v3677_v60 = vpop.f32.mrb[65].mxu0  ;;  %v3718_v29 = vpop.f32.mrb[65].mxu1  ;;  %v4203_v15 = vadd.f32 %v3716_v26, %v7541_v40 }
 0xa83   : > { %v4202_v6 = vadd.f32 %v3677_v60, %v7539_v51  ;;  %v3679_v47 = vpop.f32.mrb[66].mxu0  ;;  %v3720_v58 = vpop.f32.mrb[66].mxu1  ;;  %v4204_v2 = vadd.f32 %v3718_v29, %v7540_v3 }
 0xa84   : > { %v4128_v57 = vmul.f32 -1.442695, %v4201_v27  ;;  %v3680_v42 = vpop.f32.mrb[67].mxu0  ;;  %v3721_v56 = vpop.f32.mrb[67].mxu1 }
 0xa85   : > { %v4129_v35 = vmul.f32 -1.442695, %v4202_v6  ;;  %v4130_v12 = vmul.f32 -1.442695, %v4204_v2 }
 0xa86   : > { %4717 = vpow2.f32 %v4128_v57 }
 0xa87   : > { %4719 = vpow2.f32 %v4129_v35 }
 0xa88   : > { %4721 = vpow2.f32 %v4130_v12 }
 0xa89   : > { %4723 = vtanh.f32 %v4203_v15 }
 0xa90   : > { %v4718_v30 = vpop.eup %4717 }
 0xa91   : > { %v4720_v43 = vpop.eup %4719  ;;  %v3730_v11 = vadd.f32 1.0, %v4718_v30 }
 0xa92   : > { %v3736_v16 = vadd.f32 1.0, %v4720_v43  ;;  %v4722_v51 = vpop.eup %4721 }
 0xa93   : > { %4725 = vrcp.f32 %v3730_v11  ;;  %v4724_v5 = vpop.eup %4723  ;;  %v3743_v13 = vadd.f32 1.0, %v4722_v51 }
 0xa94   : > { %4727 = vrcp.f32 %v3736_v16 }
 0xa95   : > { %4729 = vrcp.f32 %v3743_v13 }
 0xa9d   : > { %v4726_v0 = vpop.eup %4725 }
 0xa9e   : > { %v4728_v23 = vpop.eup %4727  ;;  %v3747_v10 = vmul.f32 %v4726_v0, %v4724_v5 }
 0xa9f   : > { %v3746_v18 = vmul.f32 %v4728_v23, %v6733_v59  ;;  %v4730_v40 = vpop.eup %4729  ;;  %v4926_v59 = vld [vmem:[%s6818_s7 + $0x8] sm:$0xff] (!%p4131_p10)  }
 0xaa0   : > { %4156 = vmatpush3.bf16.msra.mxu0 (!%p4131_p10), %v4926_v59 }
 0xaa1   : > { %v3748_v3 = vadd.f32 %v3747_v10, %v3746_v18  ;;  %4157 = vmatprep.subr.bf16.mxu0 (!%p4131_p10), %v5057_v14 }
 0xaa3   : > { %4731 = vtanh.f32 %v3748_v3  ;;  %3754 = vst [vmem:[#allocation6] sm:$0x3] %v3748_v3 }
 0xaa4   : > { %4158 = vmatpush3.bf16.msra.mxu0 (!%p4131_p10), %v4927_v49 }
 0xaa5   : > { %4159 = vmatprep.subr.bf16.mxu0 (!%p4131_p10), %v5057_v14 }
 0xaa8   : > { %4160 = vmatpush3.bf16.msra.mxu0 (!%p4131_p10), %v4928_v22 }
 0xaa9   : > { %4161 = vmatprep.subr.bf16.mxu0 (!%p4131_p10), %v5057_v14 }
 0xaaa   : > { %3758 = sbr.rel (%p4131_p10) target bundleno = 2962 (0xb92), region = 76 }
 0xaac   : > { %4162 = vmatpush3.bf16.msra.mxu0 (!%p4131_p10), %v4929_v62 }
 0xaad   : > { %v4732_v38 = vpop.eup %4731  ;;  %4163 = vmatprep.subr.bf16.mxu0 (!%p4131_p10), %v5057_v14 }
 0xaae   : > { %v3750_v44 = vmul.f32 %v4732_v38, %v4730_v40 }
 0xab0   : > { %3753 = vst [vmem:[#allocation5] sm:$0x3] %v3750_v44  ;;  %4164 = vmatpush3.bf16.msra.mxu0 (!%p4131_p10), %v4930_v25  ;;  %v3759_v33 = vpack.c.bf16 (!%p4131_p10), %v3750_v44, %v3750_v44 }
 0xab1   : > { %4165 = vmatprep.subr.bf16.mxu0 %v5057_v14 }
 0xab4   : > { %4166 = vmatpush3.bf16.msra.mxu0 %v4931_v9 }
 0xab5   : > { %4167 = vmatprep.subr.bf16.mxu0 %v5057_v14 }
 0xab8   : > { %4168 = vmatpush3.bf16.msra.mxu0 %v4932_v55 }
 0xabb   : > { %4170 = vmatmul.mubr.bf16.vlgmr.msra.gmra.mrb[0].mxu0 %v3759_v33 }
 0xb8e   : > { %v3865_v61 = vpop.f32.mrb[0].mxu0 }
 0xb8f   : > { %v3866_v50 = vadd.f32 %v4132_v1, %v3865_v61  ;;  %v4171_v52 = vpop.f32.mrb[1].mxu0 }
 0xb90   : > { %v3868_v4 = vpop.f32.mrb[2].mxu0 }
 0xb91   : > { %3872 = vst.msk [vmem:[%s6820_s9] sm:$0x3] %vm3871_vm3, %v3866_v50  ;;  %v4172_v31 = vpop.f32.mrb[3].mxu0 }
 0xb92 PF: > { %s23_s13 = sadd.s32 1, %s5047_s13   ;;  %s7555_s11 = smov %s5043_s12 }
 0xb93   : > { %p20_p11 = scmp.ge.s32.totalorder %s23_s13, 4   ;;  %s7556_s12 = smov %s7558_s19 }
 0xb95   :  { %22 = sbr.rel (!%p20_p11) target bundleno = 6 (0x6), region = 107 }
 0xb9c   :  { %3892 = vsyncpa [#allocation9], 1 }
 0xb9d   :  { %3894 = vsyncpa [#allocation9 + $0x1], 1 }
 0xb9e   :  { %3895 = vsyncpa [#allocation11], 1 }

</bundles_post_ra>
